<compile_context>
chip_gen: v7x
topology: tpu7x:2x2x1
jax: 0.10.0
libtpu: 0.0.40
codegen_flags: <defaults>
</compile_context>

<pallas_src>
import functools

import jax
import jax.numpy as jnp
from jax import lax
from jax.experimental import pallas as pl
from jax.experimental.pallas import tpu as pltpu


def _spatial_encoding_kernel(pos_rows_ref, pos_cols_ref, batch_rows_ref,
                             batch_cols_ref, centers_ref, neg_inv_2w2_ref,
                             w_ref, b_ref, out_ref, *, compute_dtype):
    tm = pos_rows_ref.shape[0]
    tn = pos_cols_ref.shape[1]
    node_dim, num_radial = w_ref.shape

    pos_rows = pos_rows_ref[...]                 # [TM, 3]  f32
    pos_cols = pos_cols_ref[...]                 # [3, TN]  f32 (pre-transposed in wrapper)

    # ---- pairwise distances, per coordinate on the VPU (lane-dense [TM, TN], f32) ----
    d2 = jnp.zeros((tm, tn), jnp.float32)
    for c in range(pos_rows.shape[1]):                       # static loop over 3 coords
        diff = pos_rows[:, c:c + 1] - pos_cols[c:c + 1, :]   # [TM,1] - [1,TN] -> [TM,TN]
        d2 = d2 + diff * diff

    same_graph = (batch_rows_ref[...] == batch_cols_ref[...]).astype(jnp.float32)
    dist = jnp.sqrt(d2) * same_graph                         # [TM, TN]  (padding masked here)

    # ---- radial basis, lane-dense [TM, R, TN]; exponent in f32, exp in compute_dtype ----
    delta = dist[:, None, :] - centers_ref[...][None, :, :]          # [TM, R, TN]
    expo = (delta * delta) * neg_inv_2w2_ref[...][None, :, :]        # scale pre-negated
    rbf = jnp.exp(expo.astype(compute_dtype))                        # bf16 EUP on v6e/v7x

    # ---- projection: batched MXU matmul  W[D,R] @ rbf_i[R,TN] -> [TM, D, TN], f32 acc ----
    w = w_ref[...]                                                   # [D, R] compute_dtype
    w_b = jnp.broadcast_to(w, (tm, node_dim, num_radial))            # [TM, D, R]
    proj = lax.dot_general(
        w_b, rbf,
        dimension_numbers=(((2,), (1,)), ((0,), (0,))),              # contract R, batch TM
        preferred_element_type=jnp.float32)                          # [TM, D, TN]

    out = proj + b_ref[...][None, :, :]                              # + bias [1, D, 1] (f32)
    out_ref[...] = out.astype(out_ref.dtype)                         # lane-dense store


def _pick_tile(n, target, align):
    """Largest multiple of `align` that divides n and is <= target (n is a multiple of align)."""
    t = min(target, n)
    t -= t % align
    while t > align and n % t != 0:
        t -= align
    return t


def spatial_encoding(pos, batch, centers, widths, w_proj, b_proj, *,
                     tile_m=None, tile_n=None,
                     compute_dtype=jnp.bfloat16,
                     out_dtype=jnp.bfloat16,
                     layout="nnd"):
    """SpatialEncoding forward.

    pos:     [N, 3] float node positions
    batch:   [N] int graph ids (>= 0)
    centers: [R] RBF centers,   widths: [R] RBF widths
    w_proj:  [node_dim, R] nn.Linear weight,   b_proj: [node_dim] bias
             (for the node_dim == num_radial / nn.Identity branch, pass eye(R) and zeros)
    compute_dtype: dtype of the exp + MXU matmul (bf16 fast path, f32 exact path)
    out_dtype:     stored output dtype (bf16 halves HBM writeback; f32 for exact checks)
    layout:  "nnd" -> (N, N, node_dim)  (module layout, one XLA transpose outside the kernel)
             "ndn" -> (N, node_dim, N)  (kernel-native lane-dense slab, no transpose)
    """
    if layout not in ("nnd", "ndn"):
        raise ValueError("layout must be 'nnd' or 'ndn'")

    n, pdim = pos.shape
    num_radial = centers.shape[0]
    node_dim = w_proj.shape[0]

    # ---- pad N up to a multiple of 128 so every lane/store is dense; fold padding into the
    # ---- same-graph mask via an out-of-range batch id (sliced off below).
    n_pad = max(128, -(-n // 128) * 128)
    pos_p = pos.astype(jnp.float32)
    batch_p = batch.astype(jnp.int32)
    if n_pad != n:
        pad = n_pad - n
        pad_id = jnp.max(batch_p) + 1                      # never equals a real graph id
        pos_p = jnp.concatenate([pos_p, jnp.zeros((pad, pdim), jnp.float32)], axis=0)
        batch_p = jnp.concatenate([batch_p, jnp.full((pad,), pad_id, jnp.int32)], axis=0)

    if tile_m is None:
        tile_m = _pick_tile(n_pad, 128, 8)                 # rows per grid step
        if n_pad // tile_m < 2 and tile_m % 16 == 0:
            tile_m //= 2                                   # >= 2 parallel steps (v7x: 2 TCs)
    if tile_n is None:
        tile_n = _pick_tile(n_pad, 512, 128)               # cols per grid step (lane axis)
    assert n_pad % tile_m == 0 and tile_m % 8 == 0
    assert n_pad % tile_n == 0 and tile_n % 128 == 0

    pos_rows = pos_p                                              # [Np, 3]
    pos_cols = jnp.transpose(pos_p)                               # [3, Np] pre-transposed
    batch_rows = batch_p.reshape(n_pad, 1)                        # [Np, 1]
    batch_cols = batch_p.reshape(1, n_pad)                        # [1, Np] pre-transposed
    centers_c = centers.astype(jnp.float32).reshape(num_radial, 1)
    neg_inv_2w2 = (-1.0 / (2.0 * widths.astype(jnp.float32) ** 2)).reshape(num_radial, 1)
    w = w_proj.astype(compute_dtype)                              # [D, R]
    b = b_proj.astype(jnp.float32).reshape(node_dim, 1)           # [D, 1]

    grid = (n_pad // tile_m, n_pad // tile_n)
    kernel = functools.partial(_spatial_encoding_kernel, compute_dtype=compute_dtype)

    out_ndn = pl.pallas_call(
        kernel,
        out_shape=jax.ShapeDtypeStruct((n_pad, node_dim, n_pad), out_dtype),
        grid_spec=pltpu.PrefetchScalarGridSpec(
            num_scalar_prefetch=0,
            grid=grid,
            in_specs=[
                pl.BlockSpec((tile_m, pdim), lambda i, j: (i, 0)),            # pos rows
                pl.BlockSpec((pdim, tile_n), lambda i, j: (0, j)),            # pos cols (T)
                pl.BlockSpec((tile_m, 1), lambda i, j: (i, 0)),               # batch rows
                pl.BlockSpec((1, tile_n), lambda i, j: (0, j)),               # batch cols (T)
                pl.BlockSpec((num_radial, 1), lambda i, j: (0, 0)),           # centers
                pl.BlockSpec((num_radial, 1), lambda i, j: (0, 0)),           # -1/(2 w^2)
                pl.BlockSpec((node_dim, num_radial), lambda i, j: (0, 0)),    # W [D, R]
                pl.BlockSpec((node_dim, 1), lambda i, j: (0, 0)),             # bias [D, 1]
            ],
            out_specs=pl.BlockSpec((tile_m, node_dim, tile_n),
                                   lambda i, j: (i, 0, j)),
        ),
        compiler_params=pltpu.CompilerParams(
            dimension_semantics=("parallel", "parallel"),
            vmem_limit_bytes=48 * 1024 * 1024),
    )(pos_rows, pos_cols, batch_rows, batch_cols, centers_c, neg_inv_2w2, w, b)

    out_ndn = out_ndn[:n, :, :n]                      # strip padding (no-op when n % 128 == 0)
    if layout == "ndn":
        return out_ndn                                # kernel-native slab, no extra HBM pass
    # Layout plumbing only: present the module's (N, N, node_dim) layout.  With the bf16
    # default this transpose moves half as many bytes as before; use layout="ndn" to skip it.
    return jnp.transpose(out_ndn, (0, 2, 1))


def _reference(pos, batch, centers, widths, w_proj, b_proj):
    diff = pos[:, None, :] - pos[None, :, :]
    dist = jnp.sqrt(jnp.sum(diff * diff, axis=-1))
    mask = (batch[:, None] == batch[None, :]).astype(jnp.float32)
    dist = dist * mask
    rbf = jnp.exp(-(dist[..., None] - centers[None, None, :]) ** 2
                  / (2.0 * widths[None, None, :] ** 2))
    return rbf @ w_proj.T + b_proj


if __name__ == "__main__":
    POS_DIM = 3
    NUM_RADIAL, NODE_DIM = 16, 32
    RADIAL_MIN, RADIAL_MAX = 0.0, 5.0

    key = jax.random.PRNGKey(0)
    k_pos, k_w, k_b, k_pos2 = jax.random.split(key, 4)

    # RadialBasisEmbedding buffers (deterministic, per __init__ semantics).
    centers = jnp.linspace(RADIAL_MIN, RADIAL_MAX, NUM_RADIAL).astype(jnp.float32)
    widths = jnp.full((NUM_RADIAL,), centers[1] - centers[0], dtype=jnp.float32)
    # nn.Linear(num_radial, node_dim): weight [node_dim, num_radial], bias [node_dim].
    w_proj = (jax.random.normal(k_w, (NODE_DIM, NUM_RADIAL), dtype=jnp.float32)
              / jnp.sqrt(NUM_RADIAL))
    b_proj = jax.random.normal(k_b, (NODE_DIM,), dtype=jnp.float32) * 0.1

    # --- case 1: lane-aligned N (no padding) -----------------------------------------
    N = 128
    pos = jax.random.normal(k_pos, (N, POS_DIM), dtype=jnp.float32) * 2.0
    batch = jnp.repeat(jnp.arange(2, dtype=jnp.int32), N // 2)     # two graphs of 64 nodes
    ref = _reference(pos, batch, centers, widths, w_proj, b_proj)

    # exact path: f32 exp, f32 MXU, f32 output
    out_f32 = spatial_encoding(pos, batch, centers, widths, w_proj, b_proj,
                               compute_dtype=jnp.float32, out_dtype=jnp.float32)
    out_f32 = jax.block_until_ready(out_f32)
    assert out_f32.shape == (N, N, NODE_DIM) and out_f32.dtype == jnp.float32
    assert jnp.allclose(out_f32, ref, atol=1e-4, rtol=1e-4), \
        float(jnp.max(jnp.abs(out_f32 - ref)))

    # fast default path: bf16 exp + bf16 MXU (f32 accumulation) + bf16 output
    out_bf16 = spatial_encoding(pos, batch, centers, widths, w_proj, b_proj)
    out_bf16 = jax.block_until_ready(out_bf16)
    assert out_bf16.shape == (N, N, NODE_DIM) and out_bf16.dtype == jnp.bfloat16
    assert jnp.allclose(out_bf16.astype(jnp.float32), ref, atol=3e-2, rtol=3e-2), \
        float(jnp.max(jnp.abs(out_bf16.astype(jnp.float32) - ref)))

    # transpose-free consumer layout: (N, node_dim, N) slab, no extra HBM round trip
    out_ndn = spatial_encoding(pos, batch, centers, widths, w_proj, b_proj, layout="ndn")
    out_ndn = jax.block_until_ready(out_ndn)
    assert out_ndn.shape == (N, NODE_DIM, N)
    assert jnp.array_equal(jnp.transpose(out_ndn, (0, 2, 1)), out_bf16)

    # --- case 2: odd N -> row/col padding folded into the same-graph mask ------------
    N2 = 50
    pos2 = jax.random.normal(k_pos2, (N2, POS_DIM), dtype=jnp.float32) * 2.0
    batch2 = (jnp.arange(N2, dtype=jnp.int32) >= 25).astype(jnp.int32)
    ref2 = _reference(pos2, batch2, centers, widths, w_proj, b_proj)
    out2 = spatial_encoding(pos2, batch2, centers, widths, w_proj, b_proj)
    out2 = jax.block_until_ready(out2)
    assert out2.shape == (N2, N2, NODE_DIM)
    assert jnp.allclose(out2.astype(jnp.float32), ref2, atol=3e-2, rtol=3e-2), \
        float(jnp.max(jnp.abs(out2.astype(jnp.float32) - ref2)))

    print("KERNEL_OK")
</pallas_src>

<mosaic_0001>
module attributes {stable_mosaic.version = 11 : i64} {
  func.func @_spatial_encoding_kernel(%arg0: i32, %arg1: i32, %arg2: memref<64x3xf32, #tpu.memory_space<vmem>>, %arg3: memref<3x128xf32, #tpu.memory_space<vmem>>, %arg4: memref<64x1xi32, #tpu.memory_space<vmem>>, %arg5: memref<1x128xi32, #tpu.memory_space<vmem>>, %arg6: memref<16x1xf32, #tpu.memory_space<vmem>>, %arg7: memref<16x1xf32, #tpu.memory_space<vmem>>, %arg8: memref<32x16xf32, #tpu.memory_space<vmem>>, %arg9: memref<32x1xf32, #tpu.memory_space<vmem>>, %arg10: memref<64x32x128xf32, #tpu.memory_space<vmem>>) attributes {dimension_semantics = [#tpu.dimension_semantics<parallel>, #tpu.dimension_semantics<parallel>], iteration_bounds = array<i64: 2, 1>, scalar_prefetch = 0 : i64, scratch_operands = 0 : i64, tpu.core_type = #tpu.core_type<tc>, window_params = [{transform_indices = @transform_0, window_bounds = array<i64: 64, 3>}, {transform_indices = @transform_1, window_bounds = array<i64: 3, 128>}, {transform_indices = @transform_2, window_bounds = array<i64: 64, 1>}, {transform_indices = @transform_3, window_bounds = array<i64: 1, 128>}, {pipeline_mode = #tpu.pipeline_mode<synchronous>, transform_indices = @transform_4, window_bounds = array<i64: 16, 1>}, {pipeline_mode = #tpu.pipeline_mode<synchronous>, transform_indices = @transform_5, window_bounds = array<i64: 16, 1>}, {pipeline_mode = #tpu.pipeline_mode<synchronous>, transform_indices = @transform_6, window_bounds = array<i64: 32, 16>}, {pipeline_mode = #tpu.pipeline_mode<synchronous>, transform_indices = @transform_7, window_bounds = array<i64: 32, 1>}, {transform_indices = @transform_8, window_bounds = array<i64: 64, 32, 128>}]} {
    %c0 = arith.constant 0 : index
    %c0_0 = arith.constant 0 : index
    %0 = vector.load %arg2[%c0, %c0_0] : memref<64x3xf32, #tpu.memory_space<vmem>>, vector<64x3xf32>
    %c0_1 = arith.constant 0 : index
    %c0_2 = arith.constant 0 : index
    %1 = vector.load %arg3[%c0_1, %c0_2] : memref<3x128xf32, #tpu.memory_space<vmem>>, vector<3x128xf32>
    %cst = arith.constant 0.000000e+00 : f32
    %2 = vector.broadcast %cst : f32 to vector<64x128xf32>
    %3 = vector.extract_strided_slice %0 {offsets = [0, 0], sizes = [64, 1], strides = [1, 1]} : vector<64x3xf32> to vector<64x1xf32>
    %4 = vector.extract_strided_slice %1 {offsets = [0, 0], sizes = [1, 128], strides = [1, 1]} : vector<3x128xf32> to vector<1x128xf32>
    %5 = vector.broadcast %3 : vector<64x1xf32> to vector<64x128xf32>
    %6 = vector.broadcast %4 : vector<1x128xf32> to vector<64x128xf32>
    %7 = arith.subf %5, %6 : vector<64x128xf32>
    %8 = arith.mulf %7, %7 : vector<64x128xf32>
    %9 = arith.addf %2, %8 : vector<64x128xf32>
    %10 = vector.extract_strided_slice %0 {offsets = [0, 1], sizes = [64, 1], strides = [1, 1]} : vector<64x3xf32> to vector<64x1xf32>
    %11 = vector.extract_strided_slice %1 {offsets = [1, 0], sizes = [1, 128], strides = [1, 1]} : vector<3x128xf32> to vector<1x128xf32>
    %12 = vector.broadcast %10 : vector<64x1xf32> to vector<64x128xf32>
    %13 = vector.broadcast %11 : vector<1x128xf32> to vector<64x128xf32>
    %14 = arith.subf %12, %13 : vector<64x128xf32>
    %15 = arith.mulf %14, %14 : vector<64x128xf32>
    %16 = arith.addf %9, %15 : vector<64x128xf32>
    %17 = vector.extract_strided_slice %0 {offsets = [0, 2], sizes = [64, 1], strides = [1, 1]} : vector<64x3xf32> to vector<64x1xf32>
    %18 = vector.extract_strided_slice %1 {offsets = [2, 0], sizes = [1, 128], strides = [1, 1]} : vector<3x128xf32> to vector<1x128xf32>
    %19 = vector.broadcast %17 : vector<64x1xf32> to vector<64x128xf32>
    %20 = vector.broadcast %18 : vector<1x128xf32> to vector<64x128xf32>
    %21 = arith.subf %19, %20 : vector<64x128xf32>
    %22 = arith.mulf %21, %21 : vector<64x128xf32>
    %23 = arith.addf %16, %22 : vector<64x128xf32>
    %c0_3 = arith.constant 0 : index
    %c0_4 = arith.constant 0 : index
    %24 = vector.load %arg4[%c0_3, %c0_4] : memref<64x1xi32, #tpu.memory_space<vmem>>, vector<64x1xi32>
    %c0_5 = arith.constant 0 : index
    %c0_6 = arith.constant 0 : index
    %25 = vector.load %arg5[%c0_5, %c0_6] : memref<1x128xi32, #tpu.memory_space<vmem>>, vector<1x128xi32>
    %26 = vector.broadcast %24 : vector<64x1xi32> to vector<64x128xi32>
    %27 = vector.broadcast %25 : vector<1x128xi32> to vector<64x128xi32>
    %28 = arith.cmpi eq, %26, %27 : vector<64x128xi32>
    %29 = arith.extui %28 : vector<64x128xi1> to vector<64x128xi32>
    %30 = arith.sitofp %29 : vector<64x128xi32> to vector<64x128xf32>
    %31 = math.sqrt %23 : vector<64x128xf32>
    %32 = arith.mulf %31, %30 : vector<64x128xf32>
    %33 = vector.shape_cast %32 : vector<64x128xf32> to vector<64x1x128xf32>
    %c0_7 = arith.constant 0 : index
    %c0_8 = arith.constant 0 : index
    %34 = vector.load %arg6[%c0_7, %c0_8] : memref<16x1xf32, #tpu.memory_space<vmem>>, vector<16x1xf32>
    %35 = vector.shape_cast %34 : vector<16x1xf32> to vector<1x16x1xf32>
    %36 = vector.broadcast %33 : vector<64x1x128xf32> to vector<64x16x128xf32>
    %37 = vector.broadcast %35 : vector<1x16x1xf32> to vector<64x16x128xf32>
    %38 = arith.subf %36, %37 : vector<64x16x128xf32>
    %39 = arith.mulf %38, %38 : vector<64x16x128xf32>
    %c0_9 = arith.constant 0 : index
    %c0_10 = arith.constant 0 : index
    %40 = vector.load %arg7[%c0_9, %c0_10] : memref<16x1xf32, #tpu.memory_space<vmem>>, vector<16x1xf32>
    %41 = vector.shape_cast %40 : vector<16x1xf32> to vector<1x16x1xf32>
    %42 = vector.broadcast %41 : vector<1x16x1xf32> to vector<64x16x128xf32>
    %43 = arith.mulf %39, %42 : vector<64x16x128xf32>
    %44 = math.exp %43 : vector<64x16x128xf32>
    %c0_11 = arith.constant 0 : index
    %c0_12 = arith.constant 0 : index
    %45 = vector.load %arg8[%c0_11, %c0_12] : memref<32x16xf32, #tpu.memory_space<vmem>>, vector<32x16xf32>
    %46 = vector.shape_cast %45 : vector<32x16xf32> to vector<1x32x16xf32>
    %47 = vector.broadcast %46 : vector<1x32x16xf32> to vector<64x32x16xf32>
    %cst_13 = arith.constant dense<0.000000e+00> : vector<64x32x128xf32>
    %48 = tpu.matmul %47, %44, %cst_13 {dimension_numbers = #tpu.dot_dimension_numbers<[2], [1], [1], [2], [0, 0, 0, 1, 1, 2], [0], [0]>} : vector<64x32x16xf32>, vector<64x16x128xf32>, vector<64x32x128xf32> -> vector<64x32x128xf32>
    %c0_14 = arith.constant 0 : index
    %c0_15 = arith.constant 0 : index
    %49 = vector.load %arg9[%c0_14, %c0_15] : memref<32x1xf32, #tpu.memory_space<vmem>>, vector<32x1xf32>
    %50 = vector.shape_cast %49 : vector<32x1xf32> to vector<1x32x1xf32>
    %51 = vector.broadcast %50 : vector<1x32x1xf32> to vector<64x32x128xf32>
    %52 = arith.addf %48, %51 : vector<64x32x128xf32>
    %c0_16 = arith.constant 0 : index
    %c0_17 = arith.constant 0 : index
    %c0_18 = arith.constant 0 : index
    %53 = vector.load %arg10[%c0_16, %c0_17, %c0_18] : memref<64x32x128xf32, #tpu.memory_space<vmem>>, vector<64x32x128xf32>
    tpu.vector_store %arg10[%c0_16, %c0_17, %c0_18], %52 {strides = array<i32>} : memref<64x32x128xf32, #tpu.memory_space<vmem>>, vector<64x32x128xf32>,
    return
  }
  func.func @transform_0(%arg0: i32, %arg1: i32) -> (i32, i32) {
    %c0_i32 = arith.constant 0 : i32
    %c0_i32_0 = arith.constant 0 : i32
    return %arg0, %c0_i32 : i32, i32
  }
  func.func @transform_1(%arg0: i32, %arg1: i32) -> (i32, i32) {
    %c0_i32 = arith.constant 0 : i32
    %c0_i32_0 = arith.constant 0 : i32
    return %c0_i32, %arg1 : i32, i32
  }
  func.func @transform_2(%arg0: i32, %arg1: i32) -> (i32, i32) {
    %c0_i32 = arith.constant 0 : i32
    %c0_i32_0 = arith.constant 0 : i32
    return %arg0, %c0_i32 : i32, i32
  }
  func.func @transform_3(%arg0: i32, %arg1: i32) -> (i32, i32) {
    %c0_i32 = arith.constant 0 : i32
    %c0_i32_0 = arith.constant 0 : i32
    return %c0_i32, %arg1 : i32, i32
  }
  func.func @transform_4(%arg0: i32, %arg1: i32) -> (i32, i32) {
    %c0_i32 = arith.constant 0 : i32
    %c0_i32_0 = arith.constant 0 : i32
    %c0_i32_1 = arith.constant 0 : i32
    return %c0_i32, %c0_i32_0 : i32, i32
  }
  func.func @transform_5(%arg0: i32, %arg1: i32) -> (i32, i32) {
    %c0_i32 = arith.constant 0 : i32
    %c0_i32_0 = arith.constant 0 : i32
    %c0_i32_1 = arith.constant 0 : i32
    return %c0_i32, %c0_i32_0 : i32, i32
  }
  func.func @transform_6(%arg0: i32, %arg1: i32) -> (i32, i32) {
    %c0_i32 = arith.constant 0 : i32
    %c0_i32_0 = arith.constant 0 : i32
    %c0_i32_1 = arith.constant 0 : i32
    return %c0_i32, %c0_i32_0 : i32, i32
  }
  func.func @transform_7(%arg0: i32, %arg1: i32) -> (i32, i32) {
    %c0_i32 = arith.constant 0 : i32
    %c0_i32_0 = arith.constant 0 : i32
    %c0_i32_1 = arith.constant 0 : i32
    return %c0_i32, %c0_i32_0 : i32, i32
  }
  func.func @transform_8(%arg0: i32, %arg1: i32) -> (i32, i32, i32) {
    %c0_i32 = arith.constant 0 : i32
    %c0_i32_0 = arith.constant 0 : i32
    return %arg0, %c0_i32, %arg1 : i32, i32, i32
  }
}

</mosaic_0001>

<bundles_post_ra>
// kernel: tpu_custom_call.1
= control target key start
LH: loop header
LB: loop body
LE: loop exit
PB: predicated region body
PF: predicated region fallthrough
CT: control target
= control target key end

     0   :  { %13 = vsyncpa [#allocation3], 0  ;;  %s12369_s0 = inlined_call_operand.vmem [shape: f32[128,3], index: 0, kind: input, shape index: {}]   ;;  %s12370_s1 = inlined_call_operand.hbm [shape: f32[3,128], index: 1, kind: input, shape index: {}]   ;;  %s12371_s2 = inlined_call_operand.vmem [shape: s32[128,1], index: 2, kind: input, shape index: {}]   ;;  %s12372_s3 = inlined_call_operand.hbm [shape: s32[1,128], index: 3, kind: input, shape index: {}]   ;;  %s12373_s4 = inlined_call_operand.vmem [shape: f32[16,1], index: 4, kind: input, shape index: {}]   ;;  %s12374_s5 = inlined_call_operand.vmem [shape: f32[16,1], index: 5, kind: input, shape index: {}]   ;;  %s12375_s6 = inlined_call_operand.vmem [shape: f32[32,16], index: 6, kind: input, shape index: {}]   ;;  %s12376_s7 = inlined_call_operand.vmem [shape: f32[32,1], index: 7, kind: input, shape index: {}]   ;;  %s12377_s8 = inlined_call_operand.hbm [shape: f32[128,32,128], index: 8, kind: output, shape index: {}]  }
   0x1   :  { %14 = vsyncpa [#allocation6], 0 }
   0x2   :  { %15 = vsyncpa [#allocation4], 0 }
   0x3   :  { %17 = vsyncpa [#allocation4 + $0x1], 0  ;;  %s10115_s27 = smov 0   ;;  %s10117_s28 = smov 0  }
   0x4   :  { %s10119_s29 = smov 0   ;;  %s10121_s30 = smov 0  }
   0x5   :  { %s10123_s9 = smov 0   ;;  %s10125_s10 = smov 0  }
   0x6 LB: > { %12384 = sst [smem:[#allocation11_spill]] %s10054_s9  ;;  %s7952_s11 = sadd.s32 4294967295, %s10058_s10   ;;  %s10058_s10 = sphi %s10125_s10, %s23_s10   ;;  %s10054_s9 = sphi %s10123_s9, %s12396_s9   ;;  %s10050_s30 = sphi %s10121_s30, %s12395_s30   ;;  %s10046_s29 = sphi %s10119_s29, %s12399_s29   ;;  %s10042_s28 = sphi %s10117_s28, %s12398_s28   ;;  %s10038_s27 = sphi %s10115_s27, %s12397_s27  }
   0x7   : > { %s7953_s12 = sadd.s32 4294967294, %s10058_s10   ;;  %s35_s13 = sadd.s32 1, %s10054_s9 }
   0x8   : > { %s232_s14 = sadd.s32 1, %s10046_s29  ;;  %p37_p0 = scmp.ge.s32.totalorder %s35_s13, 2 }
   0x9   : > { %p242_p1 = scmp.ne.s32.totalorder %s10046_s29, %s10042_s28  ;;  %p243_p2 = scmp.eq.s32.totalorder %s7952_s11, 1 }
   0xa   : > { %p248_p3 = scmp.ne.s32.totalorder %s10042_s28, %s10038_s27  ;;  %s12401_s13 = smov (%p37_p0, %s35_s13), 0 }
   0xb   : > { %12385 = sst [smem:[#allocation12_spill]] %s12401_s13  ;;  %p10155_p4 = por %p243_p2, %p242_p1 }
   0xc   : > { %p249_p5 = scmp.eq.s32.totalorder %s7953_s12, 1  ;;  %s227_s16 = ssub.s32 %s10054_s9, %s12401_s13 }
   0xd   : > { %s12386_s15 = scalar_select %p10155_p4, 1, 0 }
   0xe   : > { %p7954_p6 = scmp.ge.s32.totalorder %s10058_s10, 1  ;;  %p230_p7 = scmp.eq.s32.totalorder %s227_s16, 0 }
   0xf   : > { %p10162_p8 = por %p249_p5, %p248_p3  ;;  %p256_p9 = scmp.lt.s32.totalorder %s10058_s10, 3 }
  0x10   : > { %s10168_s18 = scalar_select %p230_p7, %s10046_s29, %s232_s14  }
  0x11   : > { %s12387_s17 = scalar_select %p10162_p8, 1, 0 }
  0x12   : > { %p10170_p10 = pnand %p7954_p6, %p256_p9  ;;  %p10174_p11 = scmp.eq.s32.totalorder %s7952_s11, 0 }
  0x13   : > { %s10060_s21 = smov [#allocation2]   ;;  %s10061_s23 = smov [#allocation5]  }
  0x14   : > { %s12388_s19 = scalar_select %p10170_p10, 1, 0 }
  0x15   : > { %s12389_s20 = scalar_select %p10174_p11, 1, 0 }
  0x16   : > { %p9529_p12 = pneg %p10170_p10  ;;  %s271_s22 = sshll.u32 %s10060_s21, 4  ;;  %s272_s22 = int_to_ptr.vmem [resolvable:$true] %s271_s22 }
  0x17   : > { %s284_s24 = sshll.u32 %s10061_s23, 4  ;;  %s9916_s12 = scalar_lea.hbm %s12370_s1, 64  ;;  %s10186_s24 = int_to_ptr.vmem [resolvable:$true] %s284_s24 }
  0x18   : > { %p10182_p13 = pnand %p10174_p11, %p9529_p12  ;;  %p9917_p0 = scmp.ne.s32.totalorder %s12370_s1, %s9916_s12 }
  0x19   : > { %p9923_p5 = scmp.lt.u32.totalorder %s9916_s12, %s12370_s1 }
  0x1a   : > { %p9918_p1 = pneg %p10182_p13 }
  0x1c   : > { %p9919_p2 = pnand %p9918_p1, %p9917_p0 }
  0x1e   : > { %p9920_p3 = pneg %p9919_p2 }
  0x20   : > { %p9925_p6 = pnand %p9923_p5, %p9920_p3 }
  0x22   : > { %9928 = shalt.err (!%p9925_p6)
}
  0x23   : > { %s9929_s13 = scalar_lea.vmem %s272_s22, 64  ;;  %p9937_p8 = scmp.lt.s32.totalorder %s272_s22, %s272_s22 }
  0x24   : > { %p9930_p7 = scmp.ne.s32.totalorder %s272_s22, %s9929_s13  ;;  %p9938_p4 = scmp.lt.s32.totalorder %s9929_s13, %s9929_s13 }
  0x26   : > { %p9932_p9 = pnand %p9930_p7, %p9918_p1  ;;  %p9939_p11 = por %p9938_p4, %p9937_p8 }
  0x28   : > { %p9933_p12 = pneg %p9932_p9 }
  0x2a   : > { %p9940_p10 = pnand %p9939_p11, %p9933_p12 }
  0x2c   : > { %9943 = shalt.err (!%p9940_p10)
}
  0x2d   : > { %9532 = dma.hbm_to_vmem [thread:$0]  (!%p10182_p13), %s12370_s1, 64, %s272_s22, [#allocation3]  }
  0x2e   : > { %s9944_s16 = scalar_lea.hbm %s12372_s3, 16 }
  0x2f   : > { %p9945_p0 = scmp.ne.s32.totalorder %s12372_s3, %s9944_s16  ;;  %p9951_p10 = scmp.lt.u32.totalorder %s9944_s16, %s12372_s3 }
  0x31   : > { %p9947_p4 = pnand %p9945_p0, %p9918_p1 }
  0x33   : > { %p9948_p8 = pneg %p9947_p4 }
  0x35   : > { %p9953_p11 = pnand %p9951_p10, %p9948_p8 }
  0x37   : > { %9956 = shalt.err (!%p9953_p11)
}
  0x38   : > { %s9957_s22 = scalar_lea.vmem %s10186_s24, 16  ;;  %s9964_s26 = scalar_lea.vmem %s10186_s24, 32 }
  0x39   : > { %p9958_p2 = scmp.ne.s32.totalorder %s10186_s24, %s9957_s22  ;;  %p9965_p6 = scmp.lt.s32.totalorder %s10186_s24, %s10186_s24 }
  0x3a   : > { %p9966_p7 = scmp.lt.s32.totalorder %s9964_s26, %s9957_s22 }
  0x3b   : > { %p9960_p3 = pnand %p9958_p2, %p9918_p1 }
  0x3c   : > { %p9967_p9 = por %p9966_p7, %p9965_p6 }
  0x3d   : > { %p9961_p5 = pneg %p9960_p3 }
  0x3f   : > { %p9968_p12 = pnand %p9967_p9, %p9961_p5 }
  0x41   : > { %9971 = shalt.err (!%p9968_p12)
}
  0x42   : > { %9535 = dma.hbm_to_vmem [thread:$0]  (!%p10182_p13), %s12372_s3, 16, %s10186_s24, [#allocation6]  }
  0x43   : > { %p12391_p0 = scmp.ne.s32.totalorder %s12388_s19, 0 }
  0x44   : > { %p12392_p1 = scmp.ne.s32.totalorder (!%p12391_p0), %s12389_s20, 0 }
  0x45   : > { %327 = sbr.rel (%p12391_p0) target bundleno = 814 (0x32e), region = 52 }
  0x4c   : > { %10025 = dma.done.wait (%p12392_p1), [#allocation3], 64  }
  0x4d   : > { %10027 = vsyncadd (%p12392_p1), [#allocation3], 4294967232 }
  0x4e   : > { %10029 = dma.done.wait (%p12392_p1), [#allocation6], 16  }
  0x4f   : > { %10031 = vsyncadd (%p12392_p1), [#allocation6], 4294967280  ;;  %s7962_s25 = sshll.u32 %s10050_s30, 3  ;;  %v10062_v0 = vmov 2   ;;  %v10063_v1 = vmov 0   ;;  %v10064_v4 = vmov 1   ;;  %v432_v24 = vlaneseq }
  0x50   : > { %9604 = vset.pattern.permute.xlu1 %v10062_v0  ;;  %9602 = vset.pattern.permute.xlu0 %v10063_v1  ;;  %p371_p13 = scmp.lt.s32.totalorder %s7962_s25, 15  ;;  %v1105_v6 = vld [vmem:[%s12373_s4] sm:$0xff]  ;;  %v1106_v7 = vld [vmem:[%s12373_s4 + $0x8] sm:$0xff]  ;;  %vm2117_vm0 = vcmask 130048   ;;  %v10065_v46 = vmov 1966171168  }
  0x51   : > { %v1694_v8 = vld [vmem:[%s12374_s5 + $0x8] sm:$0xff]  ;;  %v1693_v10 = vld [vmem:[%s12374_s5] sm:$0xff]  ;;  %v433_v25 = vshrl.u32 %v432_v24, 7  ;;  %v715_v47 = vunpack.c.l.s4 %v10065_v46  ;;  %v10066_v54 = vmov 0.0   ;;  %p12393_p8 = scmp.ne.s32.totalorder %s12386_s15, 0  ;;  %s10067_s26 = smov [#allocation7]  }
  0x52   : > { %s12403_s25 = smov (!%p371_p13, %s7962_s25), 15  ;;  %v10316_v23 = vld [vmem:[%s12375_s6] sm:$0xff]  ;;  %s9976_s9 = sshll.u32 %s10067_s26, 4  ;;  %s9977_s9 = int_to_ptr.vmem [resolvable:$false] %s9976_s9 }
  0x53   : > { %s7963_s19 = sshll.u32 %s12403_s25, 3  ;;  %8627 = vmatprep.mubr.msk.f32.mxu0 %vm2117_vm0, %v10316_v23  ;;  %8637 = vmatprep.mubr.msk.f32.mxu1 %vm2117_vm0, %v10316_v23  ;;  %v10322_v26 = vsub.s32 0, %v433_v25  ;;  %v554_v27 = vsub.s32 2, %v433_v25  ;;  %v391_v28 = vld [vmem:[#allocation2] sm:$0x7]  ;;  %v494_v29 = vsub.s32 1, %v433_v25  ;;  %v716_v52 = vunpack.c.0.s8 %v715_v47 }
  0x54   : > { %s10252_s14 = scalar_lea.vmem %s12369_s0, %s7963_s19  ;;  %s10258_s21 = scalar_lea.vmem %s12371_s2, %s7963_s19  ;;  %v10334_v48 = vld [vmem:[#allocation5] ss:$0 sm:$0xff] }
  0x55   : > { %v383_v2 = vld [vmem:[%s10252_s14] sm:$0xff]  ;;  %v384_v5 = vld [vmem:[%s10252_s14 + $0x8] sm:$0xff]  ;;  %v385_v9 = vld [vmem:[%s10252_s14 + $0x10] sm:$0xff]  ;;  %v10325_v30 = vrot.slane %v391_v28, %v10322_v26  ;;  %v10327_v32 = vrot.slane %v391_v28, %v554_v27  ;;  %v10329_v33 = vrot.slane %v391_v28, %v494_v29  ;;  %v10338_v56 = vsub.s32 %v716_v52, %v433_v25  ;;  %s367_s25 = sand.u32 1, %s10042_s28   ;;  %s9978_s11 = scalar_lea.vmem %s9977_s9, 65536 }
  0x56   : > { %521 = vperm.xlu1 %9604, %v383_v2   ;;  %394 = vperm.xlu0 %9602, %v383_v2   ;;  %v580_v3 = vld [vmem:[%s10258_s21] sm:$0xff]  ;;  %v581_v11 = vld [vmem:[%s10258_s21 + $0x8] sm:$0xff]  ;;  %v386_v12 = vld [vmem:[%s10252_s14 + $0x18] sm:$0xff]  ;;  %s11360_s19 = sshll.u32 %s367_s25, 11 }
  0x57   : > { %v582_v13 = vld [vmem:[%s10258_s21 + $0x10] sm:$0xff]  ;;  %v387_v14 = vld [vmem:[%s10252_s14 + $0x20] sm:$0xff]  ;;  %v388_v16 = vld [vmem:[%s10252_s14 + $0x28] sm:$0xff]  ;;  %s11424_s23 = scalar_lea.vmem [#allocation7], %s11360_s19 }
  0x58   : > { %v584_v15 = vld [vmem:[%s10258_s21 + $0x20] sm:$0xff]  ;;  %v583_v17 = vld [vmem:[%s10258_s21 + $0x18] sm:$0xff]  ;;  %v389_v18 = vld [vmem:[%s10252_s14 + $0x30] sm:$0xff]  ;;  %s7842_s20 = sshll.u32 %s11424_s23, 4  ;;  %s12316_s20 = int_to_ptr.vmem [resolvable:$true] %s7842_s20 }
  0x59   : > { %v586_v19 = vld [vmem:[%s10258_s21 + $0x30] sm:$0xff]  ;;  %v390_v20 = vld [vmem:[%s10252_s14 + $0x38] sm:$0xff]  ;;  %v585_v21 = vld [vmem:[%s10258_s21 + $0x28] sm:$0xff]  ;;  %s8238_s14 = sshll.u32 %s10050_s30, 15  ;;  %s12323_s30 = scalar_lea.sflag [#allocation4], %s367_s25 }
  0x5a   : > { %9605 = vset.pattern.permute.xlu1 %v10063_v1  ;;  %9603 = vset.pattern.permute.xlu0 %v10064_v4  ;;  %v587_v22 = vld [vmem:[%s10258_s21 + $0x38] sm:$0xff]  ;;  %s12314_s13 = scalar_lea.hbm %s12377_s8, %s8238_s14  ;;  %s9972_s22 = scalar_lea.vmem %s12316_s20, 32768 }
  0x5b   : > { %590 = vperm.xlu1 %9605, %v580_v3   ;;  %461 = vperm.xlu0 %9603, %v383_v2   ;;  %p9973_p4 = scmp.ne.s32.totalorder %s12316_s20, %s9972_s22  ;;  %p9979_p2 = scmp.lt.s32.totalorder %s12316_s20, %s9977_s9 }
  0x5c   : > { %p9980_p3 = scmp.lt.s32.totalorder %s9978_s11, %s9972_s22 }
  0x5d   : > { %p9974_p10 = pnand %p9973_p4, %p12393_p8 }
  0x5e   : > { %p9981_p5 = por %p9980_p3, %p9979_p2 }
  0x5f   : > { %399 = vperm.xlu1 %9605, %v384_v5   ;;  %465 = vperm.xlu0 %9603, %v384_v5   ;;  %p9975_p11 = pneg %p9974_p10 }
  0x61   : > { %p9982_p6 = pnand %p9981_p5, %p9975_p11 }
  0x63   : > { %1429 = vperm.xlu1 %9605, %v1105_v6   ;;  %9606 = vset.pattern.permute.xlu0 %v10063_v1 }
  0x64   : > { %1434 = vperm.xlu0 %9606, %v1106_v7  }
  0x67   : > { %9607 = vset.pattern.permute.xlu1 %v10062_v0 }
  0x68   : > { %525 = vperm.xlu1 %9607, %v384_v5   ;;  %1702 = vperm.xlu0 %9606, %v1694_v8  }
  0x6c   : > { %9608 = vset.pattern.permute.xlu1 %v10063_v1  ;;  %404 = vperm.xlu0 %9606, %v385_v9  }
  0x6d   : > { %1697 = vperm.xlu1 %9608, %v1693_v10  }
  0x70   : > { %9610 = vset.pattern.permute.xlu0 %v10062_v0 }
  0x71   : > { %593 = vperm.xlu1 %9608, %v581_v11   ;;  %529 = vperm.xlu0 %9610, %v385_v9  }
  0x75   : > { %9609 = vset.pattern.permute.xlu1 %v10064_v4  ;;  %9612 = vset.pattern.permute.xlu0 %v10064_v4 }
  0x76   : > { %469 = vperm.xlu1 %9609, %v385_v9   ;;  %473 = vperm.xlu0 %9612, %v386_v12  }
  0x7a   : > { %9611 = vset.pattern.permute.xlu1 %v10063_v1  ;;  %9615 = vset.pattern.permute.xlu0 %v10063_v1 }
  0x7b   : > { %596 = vperm.xlu1 %9611, %v582_v13   ;;  %414 = vperm.xlu0 %9615, %v387_v14  }
  0x7f   : > { %409 = vperm.xlu1 %9611, %v386_v12   ;;  %602 = vperm.xlu0 %9615, %v584_v15  }
  0x83   : > { %9613 = vset.pattern.permute.xlu1 %v10062_v0  ;;  %9619 = vset.pattern.permute.xlu0 %v10064_v4 }
  0x84   : > { %533 = vperm.xlu1 %9613, %v386_v12   ;;  %481 = vperm.xlu0 %9619, %v388_v16  }
  0x88   : > { %9614 = vset.pattern.permute.xlu1 %v10063_v1  ;;  %9622 = vset.pattern.permute.xlu0 %v10063_v1 }
  0x89   : > { %599 = vperm.xlu1 %9614, %v583_v17   ;;  %424 = vperm.xlu0 %9622, %v389_v18  }
  0x8d   : > { %9616 = vset.pattern.permute.xlu1 %v10064_v4  ;;  %608 = vperm.xlu0 %9622, %v586_v19  }
  0x8e   : > { %477 = vperm.xlu1 %9616, %v387_v14  }
  0x91   : > { %9626 = vset.pattern.permute.xlu0 %v10064_v4 }
  0x92   : > { %9617 = vset.pattern.permute.xlu1 %v10062_v0  ;;  %489 = vperm.xlu0 %9626, %v390_v20  }
  0x93   : > { %537 = vperm.xlu1 %9617, %v387_v14  }
  0x96   : > { %9629 = vset.pattern.permute.xlu0 %v10063_v1 }
  0x97   : > { %9618 = vset.pattern.permute.xlu1 %v10063_v1 }
  0x98   : > { %419 = vperm.xlu1 %9618, %v388_v16  }
  0x9c   : > { %9620 = vset.pattern.permute.xlu1 %v10062_v0 }
  0x9d   : > { %541 = vperm.xlu1 %9620, %v388_v16  }
  0xa1   : > { %9621 = vset.pattern.permute.xlu1 %v10063_v1 }
  0xa2   : > { %605 = vperm.xlu1 %9621, %v585_v21  }
  0xa6   : > { %9623 = vset.pattern.permute.xlu1 %v10064_v4 }
  0xa7   : > { %485 = vperm.xlu1 %9623, %v389_v18  }
  0xab   : > { %9624 = vset.pattern.permute.xlu1 %v10062_v0 }
  0xac   : > { %545 = vperm.xlu1 %9624, %v389_v18  }
  0xb0   : > { %9625 = vset.pattern.permute.xlu1 %v10063_v1 }
  0xb1   : > { %429 = vperm.xlu1 %9625, %v390_v20  }
  0xb5   : > { %9627 = vset.pattern.permute.xlu1 %v10062_v0 }
  0xb6   : > { %549 = vperm.xlu1 %9627, %v390_v20  }
  0xba   : > { %9628 = vset.pattern.permute.xlu1 %v10063_v1 }
  0xbb   : > { %611 = vperm.xlu1 %9628, %v587_v22  }
  0xd5   : > { %v395_v31 = vpop.permute.xlu0 %394  ;;  %v522_v34 = vpop.permute.xlu1 %521 }
  0xd6   : > { %v436_v35 = vsub.f32 %v395_v31, %v10325_v30  ;;  %v556_v36 = vsub.f32 %v522_v34, %v10327_v32 }
  0xd8   : > { %v444_v39 = vmul.f32 %v436_v35, %v436_v35  ;;  %v564_v40 = vmul.f32 %v556_v36, %v556_v36 }
  0xda   : > { %v462_v37 = vpop.permute.xlu0 %461  ;;  %v591_v50 = vpop.permute.xlu1 %590 }
  0xdb   : > { %v496_v38 = vsub.f32 %v462_v37, %v10329_v33  ;;  %vm617_vm2 = vcmp.eq.s32.totalorder %v591_v50, %v10334_v48 }
  0xdc   : > { %v7967_v55 = vsel %vm617_vm2, 1.0, %v10066_v54 }
  0xdd   : > { %v504_v41 = vmul.f32 %v496_v38, %v496_v38 }
  0xde   : > { %v400_v60 = vpop.permute.xlu1 %399  ;;  %v466_v63 = vpop.permute.xlu0 %465 }
  0xdf   : > { %v512_v42 = vadd.f32 %v504_v41, %v444_v39  ;;  %v437_v22 = vsub.f32 %v400_v60, %v10325_v30  ;;  %v497_v24 = vsub.f32 %v466_v63, %v10329_v33  ;;  %v10388_v63 = vld [vmem:[%s12375_s6 + $0x8] sm:$0xff] }
  0xe1   : > { %v572_v43 = vadd.f32 %v564_v40, %v512_v42  ;;  %v445_v29 = vmul.f32 %v437_v22, %v437_v22  ;;  %v505_v31 = vmul.f32 %v497_v24, %v497_v24 }
  0xe2   : > { %v10344_v1 = vpop.permute.xlu1 %1429 }
  0xe3   : > { %9630 = vrsqrt.f32 %v572_v43  ;;  %vm643_vm1 = vcmp.eq.f32.partialorder %v572_v43, inf  ;;  %v646_v51 = vand.u32 2147483648, %v572_v43  ;;  %vm645_vm3 = vcmp.eq.f32.partialorder %v572_v43, 0.0  ;;  %v10347_v3 = vpop.permute.xlu0 %1434 }
  0xe4   : > { %v513_v37 = vadd.f32 %v505_v31, %v445_v29 }
  0xe7   : > { %v526_v7 = vpop.permute.xlu1 %525  ;;  %v10355_v14 = vpop.permute.xlu0 %1702 }
  0xe8   : > { %v557_v27 = vsub.f32 %v526_v7, %v10327_v32 }
  0xea   : > { %v565_v34 = vmul.f32 %v557_v27, %v557_v27 }
  0xec   : > { %v10353_v12 = vpop.permute.xlu1 %1697  ;;  %v10365_v39 = vadd.f32 %v565_v34, %v513_v37 }
  0xed   : > { %v9631_v44 = vpop.eup %9630 }
  0xee   : > { %v642_v45 = vmul.f32 %v9631_v44, %v572_v43  ;;  %vm650_vm4 = vcmp.eq.f32.partialorder %v10365_v39, inf  ;;  %v653_v24 = vand.u32 2147483648, %v10365_v39  ;;  %vm652_vm6 = vcmp.eq.f32.partialorder %v10365_v39, 0.0 }
  0xf0   : > { %v644_v49 = vsel %vm643_vm1, %v572_v43, %v642_v45 }
  0xf1   : > { %v647_v53 = vsel %vm645_vm3, %v646_v51, %v644_v49 }
  0xf2   : > { %v697_v57 = vmul.f32 %v7967_v55, %v647_v53  ;;  %v2094_v53 = vld [vmem:[%s12376_s7 + $0x8] sm:$0xff] }
  0xf3   : > { %2104 = vperm.xlu1 %9628, %v2094_v53  }
  0xf4   : > { %v720_v58 = vrot.slane %v697_v57, %v10338_v56  ;;  %v713_v38 = vcombine.high %v697_v57, %v697_v57 }
  0xf6   : > { %v728_v59 = vcombine.high %v720_v58, %v720_v58  ;;  %v736_v61 = vrot.slane %v720_v58, %v10338_v56  ;;  %v10371_v45 = vrot.slane %v713_v38, %v10338_v56 }
  0xf8   : > { %v750_v62 = vrot.slane %v728_v59, %v10338_v56  ;;  %v1110_v0 = vrot.slane %v736_v61, %v10322_v26  ;;  %v758_v28 = vcombine.high %v736_v61, %v736_v61  ;;  %v10381_v55 = vrot.slane %v10371_v45, %v10338_v56 }
  0xf9   : > { %v729_v22 = vcombine.high %v10371_v45, %v10371_v45  ;;  %v405_v45 = vpop.permute.xlu0 %404 }
  0xfa   : > { %v1114_v2 = vrot.slane %v750_v62, %v10322_v26  ;;  %v1437_v4 = vsub.f32 %v1110_v0, %v10344_v1  ;;  %v1438_v5 = vsub.f32 %v1110_v0, %v10347_v3  ;;  %v760_v35 = vcombine.high %v750_v62, %v750_v62 }
  0xfb   : > { %v1118_v36 = vrot.slane %v758_v28, %v10322_v26  ;;  %v10437_v31 = vrot.slane %v729_v22, %v10338_v56 }
  0xfc   : > { %v1439_v6 = vsub.f32 %v1114_v2, %v10344_v1  ;;  %v1440_v8 = vsub.f32 %v1114_v2, %v10347_v3  ;;  %v1565_v9 = vmul.f32 %v1437_v4, %v1437_v4  ;;  %v1566_v10 = vmul.f32 %v1438_v5, %v1438_v5  ;;  %v10397_v5 = vld [vmem:[%s12375_s6 + $0x10] sm:$0xff] }
  0xfd   : > { %v1441_v40 = vsub.f32 %v1118_v36, %v10344_v1  ;;  %v1122_v41 = vrot.slane %v760_v35, %v10322_v26  ;;  %v1442_v43 = vsub.f32 %v1118_v36, %v10347_v3  ;;  %v1126_v2 = vrot.slane %v10381_v55, %v10322_v26 }
  0xfe   : > { %v1567_v11 = vmul.f32 %v1439_v6, %v1439_v6  ;;  %v1568_v13 = vmul.f32 %v1440_v8, %v1440_v8  ;;  %v1705_v15 = vmul.f32 %v10353_v12, %v1565_v9  ;;  %v1706_v16 = vmul.f32 %v10355_v14, %v1566_v10 }
  0xff   : > { %v1569_v49 = vmul.f32 %v1441_v40, %v1441_v40  ;;  %v1443_v50 = vsub.f32 %v1122_v41, %v10344_v1  ;;  %v1444_v51 = vsub.f32 %v1122_v41, %v10347_v3  ;;  %v1570_v52 = vmul.f32 %v1442_v43, %v1442_v43 }
 0x100   : > { %v1707_v17 = vmul.f32 %v10353_v12, %v1567_v11  ;;  %v1708_v18 = vmul.f32 %v10355_v14, %v1568_v13  ;;  %v1833_v19 = vmul.f32 1.442695, %v1705_v15  ;;  %v1835_v20 = vmul.f32 1.442695, %v1706_v16  ;;  %v10409_v11 = vld [vmem:[%s12375_s6 + $0x18] sm:$0xff]  ;;  %v2095_v13 = vld [vmem:[%s12376_s7 + $0x10] sm:$0xff] }
 0x101   : > { %v1709_v59 = vmul.f32 %v10353_v12, %v1569_v49  ;;  %v1571_v60 = vmul.f32 %v1443_v50, %v1443_v50  ;;  %v1572_v61 = vmul.f32 %v1444_v51, %v1444_v51  ;;  %v1710_v62 = vmul.f32 %v10355_v14, %v1570_v52  ;;  %2109 = vperm.xlu1 %9628, %v2095_v13  }
 0x102   : > { %v1837_v21 = vmul.f32 1.442695, %v1707_v17  ;;  %v1839_v25 = vmul.f32 1.442695, %v1708_v18  ;;  %9632 = vpow2.f32 %v1833_v19  ;;  %v1445_v10 = vsub.f32 %v1126_v2, %v10344_v1  ;;  %v594_v19 = vpop.permute.xlu1 %593 }
 0x103   : > { %9634 = vpow2.f32 %v1835_v20  ;;  %v1711_v0 = vmul.f32 %v10353_v12, %v1571_v60  ;;  %v1712_v4 = vmul.f32 %v10355_v14, %v1572_v61  ;;  %v1841_v6 = vmul.f32 1.442695, %v1709_v59  ;;  %v2093_v60 = vld [vmem:[%s12376_s7] sm:$0xff] }
 0x104   : > { %9636 = vpow2.f32 %v1837_v21  ;;  %v1843_v7 = vmul.f32 1.442695, %v1710_v62  ;;  %v1446_v16 = vsub.f32 %v1126_v2, %v10347_v3  ;;  %v1573_v18 = vmul.f32 %v1445_v10, %v1445_v10  ;;  %2099 = vperm.xlu0 %9629, %v2093_v60  }
 0x105   : > { %9638 = vpow2.f32 %v1839_v25  ;;  %v1845_v9 = vmul.f32 1.442695, %v1711_v0  ;;  %v1847_v15 = vmul.f32 1.442695, %v1712_v4  ;;  %vm618_vm5 = vcmp.eq.s32.totalorder %v594_v19, %v10334_v48  ;;  %v530_v0 = vpop.permute.xlu0 %529 }
 0x106   : > { %9640 = vrsqrt.f32 %v10365_v39  ;;  %v1574_v20 = vmul.f32 %v1446_v16, %v1446_v16  ;;  %v1713_v25 = vmul.f32 %v10353_v12, %v1573_v18  ;;  %v7968_v27 = vsel %vm618_vm5, 1.0, %v10066_v54  ;;  %v470_v52 = vpop.permute.xlu1 %469 }
 0x107   : > { %9642 = vpow2.f32 %v1841_v6  ;;  %v759_v59 = vcombine.high %v10381_v55, %v10381_v55  ;;  %v498_v62 = vsub.f32 %v470_v52, %v10329_v33 }
 0x108   : > { %9644 = vpow2.f32 %v1843_v7  ;;  %v1714_v29 = vmul.f32 %v10355_v14, %v1574_v20  ;;  %v1849_v35 = vmul.f32 1.442695, %v1713_v25  ;;  %v761_v25 = vcombine.high %v10437_v31, %v10437_v31 }
 0x109   : > { %9646 = vpow2.f32 %v1845_v9  ;;  %v1134_v9 = vrot.slane %v759_v59, %v10322_v26 }
 0x10a   : > { %9648 = vpow2.f32 %v1847_v15  ;;  %v1851_v40 = vmul.f32 1.442695, %v1714_v29  ;;  %v506_v15 = vmul.f32 %v498_v62, %v498_v62 }
 0x10b   : > { %9650 = vpow2.f32 %v1849_v35  ;;  %v1449_v20 = vsub.f32 %v1134_v9, %v10344_v1  ;;  %v1450_v29 = vsub.f32 %v1134_v9, %v10347_v3 }
 0x10c   : > { %v9633_v42 = vpop.eup %9632  ;;  %9652 = vpow2.f32 %v1851_v40 }
 0x10d   : > { %v9635_v44 = vpop.eup %9634 }
 0x10e   : > { %v9637_v46 = vpop.eup %9636  ;;  %v9263_v57 = vpack.c.bf16 %v9635_v44, %v9633_v42  ;;  %v1130_v42 = vrot.slane %v10437_v31, %v10322_v26  ;;  %v1138_v31 = vrot.slane %v761_v25, %v10322_v26 }
 0x10f   : > { %v9639_v47 = vpop.eup %9638 }
 0x110   : > { %v9267_v58 = vpack.c.bf16 %v9639_v47, %v9637_v46  ;;  %9264 = vmatprep.subr.bf16.mxu0 %v9263_v57  ;;  %v9641_v8 = vpop.eup %9640  ;;  %v1447_v46 = vsub.f32 %v1130_v42, %v10344_v1  ;;  %v1448_v47 = vsub.f32 %v1130_v42, %v10347_v3 }
 0x111   : > { %9266 = vmatpush3.bf16.msra.mxu0 %v9263_v57  ;;  %v649_v17 = vmul.f32 %v9641_v8, %v10365_v39  ;;  %v9643_v34 = vpop.eup %9642  ;;  %v558_v8 = vsub.f32 %v530_v0, %v10327_v32 }
 0x112   : > { %9268 = vmatprep.subr.bf16.mxu1 %v9267_v58  ;;  %v9645_v36 = vpop.eup %9644  ;;  %v1575_v50 = vmul.f32 %v1447_v46, %v1447_v46  ;;  %v1576_v51 = vmul.f32 %v1448_v47, %v1448_v47  ;;  %v10507_v47 = vpop.permute.xlu1 %596 }
 0x113   : > { %9270 = vmatpush3.bf16.msra.mxu1 %v9267_v58  ;;  %v651_v21 = vsel %vm650_vm4, %v10365_v39, %v649_v17  ;;  %v9647_v38 = vpop.eup %9646  ;;  %v9271_v43 = vpack.c.bf16 %v9645_v36, %v9643_v34  ;;  %v438_v58 = vsub.f32 %v405_v45, %v10325_v30  ;;  %v2096_v17 = vld [vmem:[%s12376_s7 + $0x18] sm:$0xff]  ;;  %v566_v19 = vmul.f32 %v558_v8, %v558_v8 }
 0x114   : > { %8628 = vmatmul.mubr.msk.f32.vlgmr.msra.gmra.mrb[0].mxu0 %vm2117_vm0, %v10388_v63  ;;  %v654_v28 = vsel %vm652_vm6, %v653_v24, %v651_v21  ;;  %v9649_v41 = vpop.eup %9648  ;;  %v1715_v53 = vmul.f32 %v10353_v12, %v1575_v50  ;;  %v1716_v57 = vmul.f32 %v10355_v14, %v1576_v51  ;;  %2114 = vperm.xlu0 %9629, %v2096_v17  }
 0x115   : > { %8630 = vmatprep.mubr.msk.f32.mxu0 %vm2117_vm0, %v10397_v5  ;;  %v10439_v37 = vmul.f32 %v7968_v27, %v654_v28  ;;  %v9275_v44 = vpack.c.bf16 %v9649_v41, %v9647_v38  ;;  %9272 = vmatprep.subr.bf16.mxu0 %v9271_v43  ;;  %v9651_v2 = vpop.eup %9650  ;;  %v446_v7 = vmul.f32 %v438_v58, %v438_v58 }
 0x116   : > { %8638 = vmatmul.mubr.msk.f32.vlgmr.msra.gmra.mrb[0].mxu1 %vm2117_vm0, %v10388_v63  ;;  %9274 = vmatpush3.bf16.msra.mxu0 %v9271_v43  ;;  %v1853_v55 = vmul.f32 1.442695, %v1715_v53  ;;  %v1855_v4 = vmul.f32 1.442695, %v1716_v57  ;;  %v9653_v6 = vpop.eup %9652  ;;  %v1577_v34 = vmul.f32 %v1449_v20, %v1449_v20  ;;  %vm619_vm7 = vcmp.eq.s32.totalorder %v10507_v47, %v10334_v48 }
 0x117   : > { %8640 = vmatprep.mubr.msk.f32.mxu1 %vm2117_vm0, %v10397_v5  ;;  %v769_v39 = vrot.slane %v10439_v37, %v10338_v56  ;;  %9276 = vmatprep.subr.bf16.mxu1 %v9275_v44  ;;  %v9279_v16 = vpack.c.bf16 %v9653_v6, %v9651_v2  ;;  %v514_v24 = vadd.f32 %v506_v15, %v446_v7 }
 0x118   : > { %8631 = vmatmul.mubr.msk.f32.gmra.mrb[2].mxu0 %vm2117_vm0, %v10409_v11  ;;  %9278 = vmatpush3.bf16.msra.mxu1 %v9275_v44  ;;  %9654 = vpow2.f32 %v1853_v55  ;;  %v1717_v43 = vmul.f32 %v10353_v12, %v1577_v34  ;;  %v762_v9 = vcombine.high %v10439_v37, %v10439_v37 }
 0x119   : > { %8647 = vmatprep.mubr.msk.f32.mxu0 %vm2117_vm0, %v10316_v23  ;;  %v785_v49 = vrot.slane %v769_v39, %v10338_v56  ;;  %v777_v10 = vcombine.high %v769_v39, %v769_v39  ;;  %9280 = vmatprep.subr.bf16.mxu0 %v9279_v16  ;;  %9656 = vpow2.f32 %v1855_v4  ;;  %v10495_v38 = vadd.f32 %v566_v19, %v514_v24  ;;  %v410_v4 = vpop.permute.xlu1 %409 }
 0x11a   : > { %8641 = vmatmul.mubr.msk.f32.gmra.mrb[2].mxu1 %vm2117_vm0, %v10409_v11  ;;  %v1578_v39 = vmul.f32 %v1450_v29, %v1450_v29  ;;  %v1857_v59 = vmul.f32 1.442695, %v1717_v43  ;;  %v439_v24 = vsub.f32 %v410_v4, %v10325_v30 }
 0x11b   : > { %8657 = vmatprep.mubr.msk.f32.mxu1 %vm2117_vm0, %v10316_v23  ;;  %v1142_v61 = vrot.slane %v785_v49, %v10322_v26  ;;  %v10483_v21 = vrot.slane %v777_v10, %v10338_v56  ;;  %v807_v28 = vcombine.high %v785_v49, %v785_v49  ;;  %9658 = vrsqrt.f32 %v10495_v38 }
 0x11c   : > { %8648 = vmatmul.mubr.msk.f32.vlgmr.msra.gmra.mrb[4].mxu0 %vm2117_vm0, %v10388_v63  ;;  %v1451_v49 = vsub.f32 %v1138_v31, %v10344_v1  ;;  %v1718_v58 = vmul.f32 %v10355_v14, %v1578_v39  ;;  %vm657_vm8 = vcmp.eq.f32.partialorder %v10495_v38, inf  ;;  %vm659_vm9 = vcmp.eq.f32.partialorder %v10495_v38, 0.0 }
 0x11d   : > { %8650 = vmatprep.mubr.msk.f32.mxu0 %vm2117_vm0, %v10397_v5  ;;  %v1453_v13 = vsub.f32 %v1142_v61, %v10344_v1  ;;  %v1454_v18 = vsub.f32 %v1142_v61, %v10347_v3  ;;  %9282 = vmatpush3.bf16.msra.mxu0 %v9279_v16  ;;  %v1146_v35 = vrot.slane %v10483_v21, %v10322_v26 }
 0x11e   : > { %8658 = vmatmul.mubr.msk.f32.vlgmr.msra.gmra.mrb[4].mxu1 %vm2117_vm0, %v10388_v63  ;;  %v1150_v41 = vrot.slane %v807_v28, %v10322_v26  ;;  %v1452_v61 = vsub.f32 %v1138_v31, %v10347_v3  ;;  %v1579_v62 = vmul.f32 %v1451_v49, %v1451_v49  ;;  %v1859_v2 = vmul.f32 1.442695, %v1718_v58 }
 0x11f   : > { %8660 = vmatprep.mubr.msk.f32.mxu1 %vm2117_vm0, %v10397_v5  ;;  %v1581_v22 = vmul.f32 %v1453_v13, %v1453_v13  ;;  %v1582_v27 = vmul.f32 %v1454_v18, %v1454_v18  ;;  %v1455_v45 = vsub.f32 %v1146_v35, %v10344_v1  ;;  %v1456_v50 = vsub.f32 %v1146_v35, %v10347_v3  ;;  %v474_v13 = vpop.permute.xlu0 %473 }
 0x120   : > { %8651 = vmatmul.mubr.msk.f32.gmra.mrb[6].mxu0 %vm2117_vm0, %v10409_v11  ;;  %v1457_v52 = vsub.f32 %v1150_v41, %v10344_v1  ;;  %v1458_v53 = vsub.f32 %v1150_v41, %v10347_v3  ;;  %v1580_v6 = vmul.f32 %v1452_v61, %v1452_v61  ;;  %v1719_v7 = vmul.f32 %v10353_v12, %v1579_v62 }
 0x121   : > { %8667 = vmatprep.mubr.msk.f32.mxu0 %vm2117_vm0, %v10316_v23  ;;  %v1721_v36 = vmul.f32 %v10353_v12, %v1581_v22  ;;  %v1722_v40 = vmul.f32 %v10355_v14, %v1582_v27  ;;  %v1583_v60 = vmul.f32 %v1455_v45, %v1455_v45  ;;  %v1584_v0 = vmul.f32 %v1456_v50, %v1456_v50  ;;  %v534_v27 = vpop.permute.xlu1 %533 }
 0x122   : > { %8661 = vmatmul.mubr.msk.f32.gmra.mrb[6].mxu1 %vm2117_vm0, %v10409_v11  ;;  %v9655_v42 = vpop.eup %9654  ;;  %v1585_v55 = vmul.f32 %v1457_v52, %v1457_v52  ;;  %v1586_v8 = vmul.f32 %v1458_v53, %v1458_v53  ;;  %v1720_v15 = vmul.f32 %v10355_v14, %v1580_v6  ;;  %v1861_v16 = vmul.f32 1.442695, %v1719_v7 }
 0x123   : > { %8677 = vmatprep.mubr.msk.f32.mxu1 %vm2117_vm0, %v10316_v23  ;;  %v9657_v44 = vpop.eup %9656  ;;  %v1865_v46 = vmul.f32 1.442695, %v1721_v36  ;;  %v1867_v51 = vmul.f32 1.442695, %v1722_v40  ;;  %v1723_v10 = vmul.f32 %v10353_v12, %v1583_v60  ;;  %v809_v17 = vcombine.high %v10483_v21, %v10483_v21 }
 0x124   : > { %8668 = vmatmul.mubr.msk.f32.vlgmr.msra.gmra.mrb[8].mxu0 %vm2117_vm0, %v10388_v63  ;;  %v9283_v57 = vpack.c.bf16 %v9657_v44, %v9655_v42  ;;  %v1724_v18 = vmul.f32 %v10355_v14, %v1584_v0  ;;  %v1725_v20 = vmul.f32 %v10353_v12, %v1585_v55  ;;  %v1863_v22 = vmul.f32 1.442695, %v1720_v15 }
 0x125   : > { %8670 = vmatprep.mubr.msk.f32.mxu0 %vm2117_vm0, %v10397_v5  ;;  %9660 = vpow2.f32 %v1865_v46  ;;  %v9659_v19 = vpop.eup %9658  ;;  %v1726_v37 = vmul.f32 %v10355_v14, %v1586_v8  ;;  %v499_v25 = vsub.f32 %v474_v13, %v10329_v33  ;;  %v776_v21 = vrot.slane %v762_v9, %v10338_v56  ;;  %v10554_v7 = vpop.permute.xlu1 %599 }
 0x126   : > { %9662 = vpow2.f32 %v1867_v51  ;;  %9284 = vmatprep.subr.bf16.mxu1 %v9283_v57  ;;  %v1869_v28 = vmul.f32 1.442695, %v1723_v10  ;;  %v1154_v29 = vrot.slane %v809_v17, %v10322_v26  ;;  %v656_v34 = vmul.f32 %v9659_v19, %v10495_v38  ;;  %v415_v13 = vpop.permute.xlu0 %414 }
 0x127   : > { %9664 = vpow2.f32 %v1857_v59  ;;  %9286 = vmatpush3.bf16.msra.mxu1 %v9283_v57  ;;  %v1871_v35 = vmul.f32 1.442695, %v1724_v18  ;;  %v1873_v31 = vmul.f32 1.442695, %v1725_v20  ;;  %v447_v41 = vmul.f32 %v439_v24, %v439_v24 }
 0x128   : > { %8671 = vmatmul.mubr.msk.f32.gmra.mrb[10].mxu0 %vm2117_vm0, %v10409_v11  ;;  %9666 = vpow2.f32 %v1859_v2  ;;  %v507_v42 = vmul.f32 %v499_v25, %v499_v25  ;;  %v559_v39 = vsub.f32 %v534_v27, %v10327_v32  ;;  %v1875_v43 = vmul.f32 1.442695, %v1726_v37 }
 0x129   : > { %8687 = vmatprep.mubr.msk.f32.mxu0 %vm2117_vm0, %v10316_v23  ;;  %9668 = vpow2.f32 %v1861_v16  ;;  %v778_v45 = vcombine.high %v776_v21, %v776_v21  ;;  %v792_v49 = vrot.slane %v776_v21, %v10338_v56  ;;  %v1459_v50 = vsub.f32 %v1154_v29, %v10344_v1 }
 0x12a   : > { %8678 = vmatmul.mubr.msk.f32.vlgmr.msra.gmra.mrb[8].mxu1 %vm2117_vm0, %v10388_v63  ;;  %9670 = vpow2.f32 %v1863_v22  ;;  %v658_v51 = vsel %vm657_vm8, %v10495_v38, %v656_v34  ;;  %v660_v52 = vand.u32 2147483648, %v10495_v38  ;;  %v1460_v57 = vsub.f32 %v1154_v29, %v10347_v3 }
 0x12b   : > { %8680 = vmatprep.mubr.msk.f32.mxu1 %vm2117_vm0, %v10397_v5  ;;  %9672 = vpow2.f32 %v1869_v28  ;;  %v515_v58 = vadd.f32 %v507_v42, %v447_v41  ;;  %v567_v59 = vmul.f32 %v559_v39, %v559_v39  ;;  %v806_v61 = vrot.slane %v778_v45, %v10338_v56 }
 0x12c   : > { %9674 = vpow2.f32 %v1871_v35  ;;  %v7969_v62 = vsel %vm619_vm7, 1.0, %v10066_v54  ;;  %v661_v0 = vsel %vm659_vm9, %v660_v52, %v658_v51  ;;  %v1158_v38 = vrot.slane %v792_v49, %v10322_v26  ;;  %v478_v35 = vpop.permute.xlu1 %477 }
 0x12d   : > { %9676 = vpow2.f32 %v1873_v31  ;;  %v1587_v55 = vmul.f32 %v1459_v50, %v1459_v50  ;;  %v808_v6 = vcombine.high %v792_v49, %v792_v49  ;;  %v1588_v8 = vmul.f32 %v1460_v57, %v1460_v57 }
 0x12e   : > { %8681 = vmatmul.mubr.msk.f32.gmra.mrb[10].mxu1 %vm2117_vm0, %v10409_v11  ;;  %9678 = vpow2.f32 %v1875_v43  ;;  %v699_v9 = vmul.f32 %v7969_v62, %v661_v0  ;;  %v10556_v10 = vadd.f32 %v567_v59, %v515_v58  ;;  %v810_v47 = vcombine.high %v806_v61, %v806_v61 }
 0x12f   : > { %v9661_v36 = vpop.eup %9660  ;;  %8697 = vmatprep.mubr.msk.f32.mxu1 %vm2117_vm0, %v10316_v23  ;;  %v1162_v16 = vrot.slane %v806_v61, %v10322_v26  ;;  %v1461_v17 = vsub.f32 %v1158_v38, %v10344_v1  ;;  %v1727_v18 = vmul.f32 %v10353_v12, %v1587_v55  ;;  %v1166_v20 = vrot.slane %v808_v6, %v10322_v26 }
 0x130   : > { %v9663_v40 = vpop.eup %9662  ;;  %v1462_v22 = vsub.f32 %v1158_v38, %v10347_v3  ;;  %v440_v37 = vsub.f32 %v415_v13, %v10325_v30  ;;  %v811_v25 = vcombine.high %v699_v9, %v699_v9  ;;  %9680 = vrsqrt.f32 %v10556_v10  ;;  %v538_v0 = vpop.permute.xlu1 %537 }
 0x131   : > { %v9665_v44 = vpop.eup %9664  ;;  %v9295_v2 = vpack.c.bf16 %v9663_v40, %v9661_v36  ;;  %v1728_v21 = vmul.f32 %v10355_v14, %v1588_v8  ;;  %v1170_v28 = vrot.slane %v810_v47, %v10322_v26  ;;  %v1463_v29 = vsub.f32 %v1162_v16, %v10344_v1 }
 0x132   : > { %v9667_v46 = vpop.eup %9666  ;;  %v818_v34 = vrot.slane %v699_v9, %v10338_v56  ;;  %v1464_v31 = vsub.f32 %v1162_v16, %v10347_v3  ;;  %v1589_v40 = vmul.f32 %v1461_v17, %v1461_v17  ;;  %v1877_v41 = vmul.f32 1.442695, %v1727_v18 }
 0x133   : > { %v9287_v53 = vpack.c.bf16 %v9667_v46, %v9665_v44  ;;  %v9669_v60 = vpop.eup %9668  ;;  %v1465_v42 = vsub.f32 %v1166_v20, %v10344_v1  ;;  %v1590_v39 = vmul.f32 %v1462_v22, %v1462_v22  ;;  %v448_v43 = vmul.f32 %v440_v37, %v440_v37 }
 0x134   : > { %v9671_v4 = vpop.eup %9670  ;;  %v1466_v44 = vsub.f32 %v1166_v20, %v10347_v3  ;;  %v825_v45 = vrot.slane %v811_v25, %v10338_v56  ;;  %v1879_v49 = vmul.f32 1.442695, %v1728_v21  ;;  %v1467_v50 = vsub.f32 %v1170_v28, %v10344_v1 }
 0x135   : > { %9288 = vmatprep.subr.bf16.mxu0 %v9287_v53  ;;  %v9291_v15 = vpack.c.bf16 %v9671_v4, %v9669_v60  ;;  %v9673_v19 = vpop.eup %9672  ;;  %v1591_v51 = vmul.f32 %v1463_v29, %v1463_v29  ;;  %v826_v52 = vcombine.high %v818_v34, %v818_v34  ;;  %v1592_v57 = vmul.f32 %v1464_v31, %v1464_v31 }
 0x136   : > { %9290 = vmatpush3.bf16.msra.mxu0 %v9287_v53  ;;  %v9675_v24 = vpop.eup %9674  ;;  %v1729_v58 = vmul.f32 %v10353_v12, %v1589_v40  ;;  %v500_v59 = vsub.f32 %v478_v35, %v10329_v33  ;;  %9682 = vpow2.f32 %v1877_v41  ;;  %v1468_v60 = vsub.f32 %v1170_v28, %v10347_v3 }
 0x137   : > { %9296 = vmatprep.subr.bf16.mxu0 %v9295_v2  ;;  %9292 = vmatprep.subr.bf16.mxu1 %v9291_v15  ;;  %v9677_v27 = vpop.eup %9676  ;;  %v9299_v46 = vpack.c.bf16 %v9675_v24, %v9673_v19  ;;  %v1730_v61 = vmul.f32 %v10355_v14, %v1590_v39  ;;  %v834_v62 = vrot.slane %v818_v34, %v10338_v56  ;;  %9684 = vpow2.f32 %v1879_v49 }
 0x138   : > { %9294 = vmatpush3.bf16.msra.mxu1 %v9291_v15  ;;  %v9679_v36 = vpop.eup %9678  ;;  %v10595_v38 = vmul.f32 %v1466_v44, %v1466_v44  ;;  %v827_v55 = vcombine.high %v825_v45, %v825_v45  ;;  %v10601_v4 = vmul.f32 %v1467_v50, %v1467_v50  ;;  %v848_v6 = vrot.slane %v826_v52, %v10338_v56 }
 0x139   : > { %8688 = vmatmul.mubr.msk.f32.vlgmr.msra.gmra.mrb[12].mxu0 %vm2117_vm0, %v10388_v63  ;;  %v9303_v53 = vpack.c.bf16 %v9679_v36, %v9677_v27  ;;  %9300 = vmatprep.subr.bf16.mxu1 %v9299_v46  ;;  %v1731_v8 = vmul.f32 %v10353_v12, %v1591_v51  ;;  %v508_v13 = vmul.f32 %v500_v59, %v500_v59  ;;  %v1881_v47 = vmul.f32 1.442695, %v1729_v58 }
 0x13a   : > { %9298 = vmatpush3.bf16.msra.mxu0 %v9295_v2  ;;  %8690 = vmatprep.mubr.msk.f32.mxu0 %vm2117_vm0, %v10397_v5  ;;  %v10593_v2 = vmul.f32 %v1465_v42, %v1465_v42  ;;  %v9681_v9 = vpop.eup %9680  ;;  %v560_v15 = vsub.f32 %v538_v0, %v10327_v32  ;;  %v1732_v16 = vmul.f32 %v10355_v14, %v1592_v57  ;;  %v1883_v20 = vmul.f32 1.442695, %v1730_v61 }
 0x13b   : > { %8698 = vmatmul.mubr.msk.f32.vlgmr.msra.gmra.mrb[12].mxu1 %vm2117_vm0, %v10388_v63  ;;  %9304 = vmatprep.subr.bf16.mxu0 %v9303_v53  ;;  %v10611_v17 = vmul.f32 %v1468_v60, %v1468_v60  ;;  %v841_v18 = vrot.slane %v825_v45, %v10338_v56  ;;  %v1174_v19 = vrot.slane %v834_v62, %v10322_v26  ;;  %v1885_v24 = vmul.f32 1.442695, %v1731_v8 }
 0x13c   : > { %8700 = vmatprep.mubr.msk.f32.mxu1 %vm2117_vm0, %v10397_v5  ;;  %9302 = vmatpush3.bf16.msra.mxu1 %v9299_v46  ;;  %v855_v22 = vrot.slane %v827_v55, %v10338_v56  ;;  %v856_v37 = vcombine.high %v834_v62, %v834_v62  ;;  %vm620_vm10 = vcmp.eq.s32.totalorder %v10554_v7, %v10334_v48  ;;  %vm664_vm11 = vcmp.eq.f32.partialorder %v10556_v10, inf }
 0x13d   : > { %8691 = vmatmul.mubr.msk.f32.gmra.mrb[14].mxu0 %vm2117_vm0, %v10409_v11  ;;  %v858_v25 = vcombine.high %v848_v6, %v848_v6  ;;  %v663_v21 = vmul.f32 %v9681_v9, %v10556_v10  ;;  %v1887_v27 = vmul.f32 1.442695, %v1732_v16  ;;  %vm666_vm12 = vcmp.eq.f32.partialorder %v10556_v10, 0.0 }
 0x13e   : > { %8707 = vmatprep.mubr.msk.f32.mxu0 %vm2117_vm0, %v10316_v23  ;;  %v516_v28 = vadd.f32 %v508_v13, %v448_v43  ;;  %v568_v29 = vmul.f32 %v560_v15, %v560_v15  ;;  %9686 = vpow2.f32 %v1881_v47  ;;  %v857_v34 = vcombine.high %v841_v18, %v841_v18 }
 0x13f   : > { %8701 = vmatmul.mubr.msk.f32.gmra.mrb[14].mxu1 %vm2117_vm0, %v10409_v11  ;;  %v1178_v35 = vrot.slane %v848_v6, %v10322_v26  ;;  %v1469_v36 = vsub.f32 %v1174_v19, %v10344_v1  ;;  %9688 = vpow2.f32 %v1883_v20  ;;  %v859_v40 = vcombine.high %v855_v22, %v855_v22 }
 0x140   : > { %8717 = vmatprep.mubr.msk.f32.mxu1 %vm2117_vm0, %v10316_v23  ;;  %v9683_v31 = vpop.eup %9682  ;;  %v1182_v41 = vrot.slane %v856_v37, %v10322_v26  ;;  %v667_v42 = vand.u32 2147483648, %v10556_v10  ;;  %9690 = vpow2.f32 %v1885_v24  ;;  %v1186_v39 = vrot.slane %v858_v25, %v10322_v26 }
 0x141   : > { %8708 = vmatmul.mubr.msk.f32.vlgmr.msra.gmra.mrb[16].mxu0 %vm2117_vm0, %v10388_v63  ;;  %v1470_v43 = vsub.f32 %v1174_v19, %v10347_v3  ;;  %v665_v44 = vsel %vm664_vm11, %v10556_v10, %v663_v21  ;;  %9692 = vpow2.f32 %v1887_v27  ;;  %v9685_v45 = vpop.eup %9684  ;;  %v1190_v46 = vrot.slane %v841_v18, %v10322_v26 }
 0x142   : > { %9306 = vmatpush3.bf16.msra.mxu0 %v9303_v53  ;;  %8710 = vmatprep.mubr.msk.f32.mxu0 %vm2117_vm0, %v10397_v5  ;;  %v1194_v49 = vrot.slane %v855_v22, %v10322_v26  ;;  %v7970_v50 = vsel %vm620_vm10, 1.0, %v10066_v54  ;;  %v10650_v51 = vadd.f32 %v568_v29, %v516_v28  ;;  %v1198_v52 = vrot.slane %v857_v34, %v10322_v26 }
 0x143   : > { %8718 = vmatmul.mubr.msk.f32.vlgmr.msra.gmra.mrb[16].mxu1 %vm2117_vm0, %v10388_v63  ;;  %v1471_v53 = vsub.f32 %v1178_v35, %v10344_v1  ;;  %v1597_v57 = vmul.f32 %v1469_v36, %v1469_v36  ;;  %v9307_v58 = vpack.c.bf16 %v9685_v45, %v9683_v31  ;;  %v1202_v59 = vrot.slane %v859_v40, %v10322_v26 }
 0x144   : > { %8720 = vmatprep.mubr.msk.f32.mxu1 %vm2117_vm0, %v10397_v5  ;;  %v1472_v60 = vsub.f32 %v1178_v35, %v10347_v3  ;;  %v1473_v61 = vsub.f32 %v1182_v41, %v10344_v1  ;;  %v668_v62 = vsel %vm666_vm12, %v667_v42, %v665_v44  ;;  %v1474_v48 = vsub.f32 %v1182_v41, %v10347_v3 }
 0x145   : > { %8711 = vmatmul.mubr.msk.f32.gmra.mrb[18].mxu0 %vm2117_vm0, %v10409_v11  ;;  %v1475_v7 = vsub.f32 %v1186_v39, %v10344_v1  ;;  %v1476_v0 = vsub.f32 %v1186_v39, %v10347_v3  ;;  %v1598_v55 = vmul.f32 %v1470_v43, %v1470_v43  ;;  %9308 = vmatprep.subr.bf16.mxu1 %v9307_v58  ;;  %9694 = vrsqrt.f32 %v10650_v51 }
 0x146   : > { %8727 = vmatprep.mubr.msk.f32.mxu0 %vm2117_vm0, %v10316_v23  ;;  %v1477_v6 = vsub.f32 %v1190_v46, %v10344_v1  ;;  %v1478_v8 = vsub.f32 %v1190_v46, %v10347_v3  ;;  %v1479_v9 = vsub.f32 %v1194_v49, %v10344_v1  ;;  %v1480_v10 = vsub.f32 %v1194_v49, %v10347_v3 }
 0x147   : > { %8721 = vmatmul.mubr.msk.f32.gmra.mrb[18].mxu1 %vm2117_vm0, %v10409_v11  ;;  %v1481_v13 = vsub.f32 %v1198_v52, %v10344_v1  ;;  %v1482_v15 = vsub.f32 %v1198_v52, %v10347_v3  ;;  %v1737_v47 = vmul.f32 %v10353_v12, %v1597_v57  ;;  %v700_v16 = vmul.f32 %v7970_v50, %v668_v62 }
 0x148   : > { %8737 = vmatprep.mubr.msk.f32.mxu1 %vm2117_vm0, %v10316_v23  ;;  %9310 = vmatpush3.bf16.msra.mxu1 %v9307_v58  ;;  %v9687_v18 = vpop.eup %9686  ;;  %v1483_v19 = vsub.f32 %v1202_v59, %v10344_v1  ;;  %v1484_v20 = vsub.f32 %v1202_v59, %v10347_v3  ;;  %v1599_v22 = vmul.f32 %v1471_v53, %v1471_v53  ;;  %vm671_vm13 = vcmp.eq.f32.partialorder %v10650_v51, inf }
 0x149   : > { %8728 = vmatmul.mubr.msk.f32.vlgmr.msra.gmra.mrb[20].mxu0 %vm2117_vm0, %v10388_v63  ;;  %v1733_v37 = vmul.f32 %v10353_v12, %v10593_v2  ;;  %v9689_v24 = vpop.eup %9688  ;;  %v1600_v25 = vmul.f32 %v1472_v60, %v1472_v60  ;;  %v1601_v21 = vmul.f32 %v1473_v61, %v1473_v61  ;;  %v1602_v27 = vmul.f32 %v1474_v48, %v1474_v48 }
 0x14a   : > { %8730 = vmatprep.mubr.msk.f32.mxu0 %vm2117_vm0, %v10397_v5  ;;  %v1738_v28 = vmul.f32 %v10355_v14, %v1598_v55  ;;  %v9691_v29 = vpop.eup %9690  ;;  %v1603_v34 = vmul.f32 %v1475_v7, %v1475_v7  ;;  %v1604_v35 = vmul.f32 %v1476_v0, %v1476_v0  ;;  %v1605_v36 = vmul.f32 %v1477_v6, %v1477_v6 }
 0x14b   : > { %8738 = vmatmul.mubr.msk.f32.vlgmr.msra.gmra.mrb[20].mxu1 %vm2117_vm0, %v10388_v63  ;;  %v1734_v31 = vmul.f32 %v10355_v14, %v10595_v38  ;;  %v9693_v2 = vpop.eup %9692  ;;  %v1897_v40 = vmul.f32 1.442695, %v1737_v47  ;;  %v860_v41 = vcombine.high %v700_v16, %v700_v16  ;;  %v867_v42 = vrot.slane %v700_v16, %v10338_v56 }
 0x14c   : > { %8740 = vmatprep.mubr.msk.f32.mxu1 %vm2117_vm0, %v10397_v5  ;;  %v1735_v39 = vmul.f32 %v10353_v12, %v10601_v4  ;;  %v1606_v43 = vmul.f32 %v1478_v8, %v1478_v8  ;;  %v10687_v44 = vmul.f32 %v1479_v9, %v1479_v9  ;;  %v1889_v45 = vmul.f32 1.442695, %v1733_v37 }
 0x14d   : > { %8731 = vmatmul.mubr.msk.f32.gmra.mrb[22].mxu0 %vm2117_vm0, %v10409_v11  ;;  %v1736_v46 = vmul.f32 %v10355_v14, %v10611_v17  ;;  %v10691_v49 = vmul.f32 %v1480_v10, %v1480_v10  ;;  %v1739_v38 = vmul.f32 %v10353_v12, %v1599_v22  ;;  %v1899_v50 = vmul.f32 1.442695, %v1738_v28 }
 0x14e   : > { %8747 = vmatprep.mubr.msk.f32.mxu0 %vm2117_vm0, %v10316_v23  ;;  %v1740_v52 = vmul.f32 %v10355_v14, %v1600_v25  ;;  %v9311_v4 = vpack.c.bf16 %v9689_v24, %v9687_v18  ;;  %v9315_v53 = vpack.c.bf16 %v9693_v2, %v9691_v29  ;;  %v1891_v57 = vmul.f32 1.442695, %v1734_v31 }
 0x14f   : > { %8741 = vmatmul.mubr.msk.f32.gmra.mrb[22].mxu1 %vm2117_vm0, %v10409_v11  ;;  %9696 = vpow2.f32 %v1897_v40  ;;  %v874_v17 = vrot.slane %v860_v41, %v10338_v56  ;;  %v10702_v58 = vrot.slane %v867_v42, %v10338_v56  ;;  %v1893_v59 = vmul.f32 1.442695, %v1735_v39  ;;  %v9695_v24 = vpop.eup %9694 }
 0x150   : > { %8757 = vmatprep.mubr.msk.f32.mxu1 %vm2117_vm0, %v10316_v23  ;;  %v10704_v60 = vmul.f32 %v1481_v13, %v1481_v13  ;;  %v875_v61 = vcombine.high %v867_v42, %v867_v42  ;;  %9312 = vmatprep.subr.bf16.mxu0 %v9311_v4  ;;  %9698 = vpow2.f32 %v1889_v45  ;;  %v1895_v62 = vmul.f32 1.442695, %v1736_v46  ;;  %v10716_v13 = vpop.permute.xlu0 %602  ;;  %v10756_v42 = vld [vmem:[%s12375_s6] sm:$0xff] }
 0x151   : > { %9316 = vmatprep.subr.bf16.mxu1 %v9315_v53  ;;  %v10706_v48 = vmul.f32 %v1482_v15, %v1482_v15  ;;  %v10708_v7 = vmul.f32 %v1483_v19, %v1483_v19  ;;  %9700 = vpow2.f32 %v1899_v50  ;;  %9314 = vmatpush3.bf16.msra.mxu0 %v9311_v4  ;;  %v1901_v23 = vmul.f32 1.442695, %v1739_v38 }
 0x152   : > { %9318 = vmatpush3.bf16.msra.mxu1 %v9315_v53  ;;  %v10710_v0 = vmul.f32 %v1484_v20, %v1484_v20  ;;  %v1741_v55 = vmul.f32 %v10353_v12, %v1601_v21  ;;  %9702 = vpow2.f32 %v1891_v57  ;;  %v1903_v6 = vmul.f32 1.442695, %v1740_v52 }
 0x153   : > { %v1742_v8 = vmul.f32 %v10355_v14, %v1602_v27  ;;  %v876_v9 = vcombine.high %v874_v17, %v874_v17  ;;  %v1206_v10 = vrot.slane %v10702_v58, %v10322_v26  ;;  %9704 = vpow2.f32 %v1893_v59  ;;  %v420_v27 = vpop.permute.xlu1 %419 }
 0x154   : > { %v10719_v15 = vmul.f32 %v10353_v12, %v1605_v36  ;;  %v897_v47 = vrot.slane %v875_v61, %v10338_v56  ;;  %9706 = vpow2.f32 %v1895_v62  ;;  %8748 = vmatmul.mubr.msk.f32.vlgmr.msra.gmra.mrb[24].mxu0 %vm2117_vm0, %v10388_v63  ;;  %v1743_v16 = vmul.f32 %v10353_v12, %v1603_v34  ;;  %v10743_v34 = vld [vmem:[#allocation5] ss:$0 sm:$0xff]  ;;  %v482_v41 = vpop.permute.xlu0 %481 }
 0x155   : > { %8758 = vmatmul.mubr.msk.f32.vlgmr.msra.gmra.mrb[24].mxu1 %vm2117_vm0, %v10388_v63  ;;  %v10728_v18 = vmul.f32 %v10355_v14, %v1606_v43  ;;  %v890_v19 = vrot.slane %v874_v17, %v10338_v56  ;;  %8750 = vmatprep.mubr.msk.f32.mxu0 %vm2117_vm0, %v10397_v5  ;;  %9708 = vpow2.f32 %v1901_v23  ;;  %v1744_v20 = vmul.f32 %v10355_v14, %v1604_v35 }
 0x156   : > { %8760 = vmatprep.mubr.msk.f32.mxu1 %vm2117_vm0, %v10397_v5  ;;  %v905_v22 = vcombine.high %v10702_v58, %v10702_v58  ;;  %9710 = vpow2.f32 %v1903_v6  ;;  %v1905_v37 = vmul.f32 1.442695, %v1741_v55  ;;  %v904_v25 = vrot.slane %v876_v9, %v10338_v56 }
 0x157   : > { %v1485_v21 = vsub.f32 %v1206_v10, %v10344_v1  ;;  %vm673_vm14 = vcmp.eq.f32.partialorder %v10650_v51, 0.0  ;;  %v1907_v28 = vmul.f32 1.442695, %v1742_v8  ;;  %v907_v29 = vcombine.high %v897_v47, %v897_v47  ;;  %v542_v23 = vpop.permute.xlu1 %541 }
 0x158   : > { %v674_v5 = vand.u32 2147483648, %v10650_v51  ;;  %vm621_vm15 = vcmp.eq.s32.totalorder %v10716_v13, %v10743_v34  ;;  %8751 = vmatmul.mubr.msk.f32.gmra.mrb[26].mxu0 %vm2117_vm0, %v10409_v11  ;;  %v1909_v35 = vmul.f32 1.442695, %v1743_v16  ;;  %v906_v31 = vcombine.high %v890_v19, %v890_v19 }
 0x159   : > { %8761 = vmatmul.mubr.msk.f32.gmra.mrb[26].mxu1 %vm2117_vm0, %v10409_v11  ;;  %v9697_v36 = vpop.eup %9696  ;;  %v1210_v2 = vrot.slane %v897_v47, %v10322_v26  ;;  %v441_v40 = vsub.f32 %v420_v27, %v10325_v30  ;;  %8767 = vmatprep.mubr.msk.f32.mxu0 %vm2117_vm0, %v10756_v42  ;;  %v1911_v11 = vmul.f32 1.442695, %v1744_v20  ;;  %v1214_v43 = vrot.slane %v905_v22, %v10322_v26 }
 0x15a   : > { %8777 = vmatprep.mubr.msk.f32.mxu1 %vm2117_vm0, %v10756_v42  ;;  %v9699_v39 = vpop.eup %9698  ;;  %v1222_v45 = vrot.slane %v890_v19, %v10322_v26  ;;  %v670_v46 = vmul.f32 %v9695_v24, %v10650_v51  ;;  %9712 = vpow2.f32 %v1905_v37  ;;  %v908_v50 = vcombine.high %v904_v25, %v904_v25 }
 0x15b   : > { %v9701_v38 = vpop.eup %9700  ;;  %v1486_v52 = vsub.f32 %v1206_v10, %v10347_v3  ;;  %v1613_v4 = vmul.f32 %v1485_v21, %v1485_v21  ;;  %9714 = vpow2.f32 %v1907_v28  ;;  %v1218_v57 = vrot.slane %v907_v29, %v10322_v26 }
 0x15c   : > { %v9703_v53 = vpop.eup %9702  ;;  %v1226_v17 = vrot.slane %v904_v25, %v10322_v26  ;;  %v501_v58 = vsub.f32 %v482_v41, %v10329_v33  ;;  %9716 = vpow2.f32 %v1909_v35  ;;  %v1230_v61 = vrot.slane %v906_v31, %v10322_v26 }
 0x15d   : > { %v9705_v59 = vpop.eup %9704  ;;  %v1487_v62 = vsub.f32 %v1210_v2, %v10344_v1  ;;  %v9319_v55 = vpack.c.bf16 %v9703_v53, %v9699_v39  ;;  %9718 = vpow2.f32 %v1911_v11  ;;  %v1488_v8 = vsub.f32 %v1210_v2, %v10347_v3 }
 0x15e   : > { %v9707_v6 = vpop.eup %9706  ;;  %v1489_v9 = vsub.f32 %v1214_v43, %v10344_v1  ;;  %v10774_v10 = vsub.f32 %v1214_v43, %v10347_v3  ;;  %v672_v47 = vsel %vm671_vm13, %v10650_v51, %v670_v46  ;;  %v1614_v19 = vmul.f32 %v1486_v52, %v1486_v52 }
 0x15f   : > { %v9709_v16 = vpop.eup %9708  ;;  %v1753_v20 = vmul.f32 %v10353_v12, %v1613_v4  ;;  %9320 = vmatprep.subr.bf16.mxu0 %v9319_v55  ;;  %v9323_v22 = vpack.c.bf16 %v9707_v6, %v9705_v59  ;;  %v9327_v37 = vpack.c.bf16 %v9701_v38, %v9697_v36  ;;  %v1234_v25 = vrot.slane %v908_v50, %v10322_v26 }
 0x160   : > { %v9711_v24 = vpop.eup %9710  ;;  %v449_v21 = vmul.f32 %v441_v40, %v441_v40  ;;  %v509_v27 = vmul.f32 %v501_v58, %v501_v58  ;;  %v561_v28 = vsub.f32 %v542_v23, %v10327_v32  ;;  %9322 = vmatpush3.bf16.msra.mxu0 %v9319_v55  ;;  %v10783_v29 = vsub.f32 %v1218_v57, %v10344_v1 }
 0x161   : > { %v675_v35 = vsel %vm673_vm14, %v674_v5, %v672_v47  ;;  %v7971_v31 = vsel %vm621_vm15, 1.0, %v10066_v54  ;;  %9324 = vmatprep.subr.bf16.mxu1 %v9323_v22  ;;  %9328 = vmatprep.subr.bf16.mxu0 %v9327_v37  ;;  %v9331_v36 = vpack.c.bf16 %v9711_v24, %v9709_v16  ;;  %v10792_v2 = vsub.f32 %v1218_v57, %v10347_v3  ;;  %v10841_v47 = vld [vmem:[%s12375_s6 + $0x10] sm:$0xff] }
 0x162   : > { %v10795_v40 = vsub.f32 %v1222_v45, %v10344_v1  ;;  %v10798_v41 = vsub.f32 %v1222_v45, %v10347_v3  ;;  %v10801_v51 = vsub.f32 %v1226_v17, %v10344_v1  ;;  %9326 = vmatpush3.bf16.msra.mxu1 %v9323_v22  ;;  %v10804_v5 = vsub.f32 %v1226_v17, %v10347_v3 }
 0x163   : > { %v10807_v13 = vsub.f32 %v1230_v61, %v10344_v1  ;;  %v1754_v11 = vmul.f32 %v10355_v14, %v1614_v19  ;;  %v1929_v39 = vmul.f32 1.442695, %v1753_v20  ;;  %9332 = vmatprep.subr.bf16.mxu1 %v9331_v36  ;;  %v701_v46 = vmul.f32 %v7971_v31, %v675_v35  ;;  %8768 = vmatmul.mubr.msk.f32.vlgmr.msra.gmra.mrb[28].mxu0 %vm2117_vm0, %v10388_v63 }
 0x164   : > { %v9713_v43 = vpop.eup %9712  ;;  %v517_v38 = vadd.f32 %v509_v27, %v449_v21  ;;  %v569_v50 = vmul.f32 %v561_v28, %v561_v28  ;;  %v1913_v45 = vmul.f32 1.442695, %v10719_v15  ;;  %v10814_v4 = vsub.f32 %v1230_v61, %v10347_v3  ;;  %9330 = vmatpush3.bf16.msra.mxu0 %v9327_v37  ;;  %v10829_v61 = vld [vmem:[%s12375_s6 + $0x8] sm:$0xff]  ;;  %8770 = vmatprep.mubr.msk.f32.mxu0 %vm2117_vm0, %v10841_v47 }
 0x165   : > { %v9715_v52 = vpop.eup %9714  ;;  %v10817_v53 = vsub.f32 %v1234_v25, %v10344_v1  ;;  %v1747_v57 = vmul.f32 %v10353_v12, %v10687_v44  ;;  %v1748_v17 = vmul.f32 %v10355_v14, %v10691_v49  ;;  %v10824_v59 = vsub.f32 %v1234_v25, %v10347_v3  ;;  %8778 = vmatmul.mubr.msk.f32.vlgmr.msra.gmra.mrb[28].mxu1 %vm2117_vm0, %v10829_v61 }
 0x166   : > { %v9717_v58 = vpop.eup %9716  ;;  %v1615_v63 = vmul.f32 %v1487_v62, %v1487_v62  ;;  %v1616_v15 = vmul.f32 %v1488_v8, %v1488_v8  ;;  %v1915_v23 = vmul.f32 1.442695, %v10728_v18  ;;  %v1617_v55 = vmul.f32 %v1489_v9, %v1489_v9  ;;  %9334 = vmatpush3.bf16.msra.mxu1 %v9331_v36  ;;  %8780 = vmatprep.mubr.msk.f32.mxu1 %vm2117_vm0, %v10841_v47 }
 0x167   : > { %v9719_v44 = vpop.eup %9718  ;;  %9720 = vpow2.f32 %v1929_v39  ;;  %v1931_v49 = vmul.f32 1.442695, %v1754_v11  ;;  %v1749_v6 = vmul.f32 %v10353_v12, %v10704_v60  ;;  %v909_v62 = vcombine.high %v701_v46, %v701_v46  ;;  %v10851_v60 = vld [vmem:[%s12375_s6 + $0x18] sm:$0xff] }
 0x168   : > { %v10836_v8 = vadd.f32 %v569_v50, %v517_v38  ;;  %9722 = vpow2.f32 %v1913_v45  ;;  %v1750_v18 = vmul.f32 %v10355_v14, %v10706_v48  ;;  %v916_v9 = vrot.slane %v701_v46, %v10338_v56  ;;  %8771 = vmatmul.mubr.msk.f32.gmra.mrb[30].mxu0 %vm2117_vm0, %v10851_v60 }
 0x169   : > { %v1917_v16 = vmul.f32 1.442695, %v1747_v57  ;;  %v1919_v19 = vmul.f32 1.442695, %v1748_v17  ;;  %v1751_v20 = vmul.f32 %v10353_v12, %v10708_v7  ;;  %v9335_v22 = vpack.c.bf16 %v9715_v52, %v9713_v43  ;;  %8781 = vmatmul.mubr.msk.f32.gmra.mrb[30].mxu1 %vm2117_vm0, %v10851_v60  ;;  %8787 = vmatprep.mubr.msk.f32.mxu0 %vm2117_vm0, %v10756_v42 }
 0x16a   : > { %v9339_v48 = vpack.c.bf16 %v9719_v44, %v9717_v58  ;;  %9724 = vpow2.f32 %v1915_v23  ;;  %v1752_v37 = vmul.f32 %v10355_v14, %v10710_v0  ;;  %v1618_v24 = vmul.f32 %v10774_v10, %v10774_v10  ;;  %8797 = vmatprep.mubr.msk.f32.mxu1 %vm2117_vm0, %v10756_v42 }
 0x16b   : > { %v1755_v25 = vmul.f32 %v10353_v12, %v1615_v63  ;;  %9726 = vpow2.f32 %v1931_v49  ;;  %v1921_v7 = vmul.f32 1.442695, %v1749_v6  ;;  %v1619_v21 = vmul.f32 %v10783_v29, %v10783_v29  ;;  %9336 = vmatprep.subr.bf16.mxu0 %v9335_v22 }
 0x16c   : > { %v1756_v27 = vmul.f32 %v10355_v14, %v1616_v15  ;;  %9728 = vrsqrt.f32 %v10836_v8  ;;  %9340 = vmatprep.subr.bf16.mxu1 %v9339_v48  ;;  %v1923_v0 = vmul.f32 1.442695, %v1750_v18  ;;  %v1620_v10 = vmul.f32 %v10792_v2, %v10792_v2  ;;  %8788 = vmatmul.mubr.msk.f32.vlgmr.msra.gmra.mrb[32].mxu0 %vm2117_vm0, %v10829_v61  ;;  %v10928_v18 = vpop.permute.xlu1 %605 }
 0x16d   : > { %v923_v28 = vrot.slane %v909_v62, %v10338_v56  ;;  %9730 = vpow2.f32 %v1917_v16  ;;  %v1925_v35 = vmul.f32 1.442695, %v1751_v20  ;;  %v1621_v29 = vmul.f32 %v10795_v40, %v10795_v40  ;;  %9338 = vmatpush3.bf16.msra.mxu0 %v9335_v22  ;;  %8798 = vmatmul.mubr.msk.f32.vlgmr.msra.gmra.mrb[32].mxu1 %vm2117_vm0, %v10829_v61 }
 0x16e   : > { %v924_v31 = vcombine.high %v916_v9, %v916_v9  ;;  %9732 = vpow2.f32 %v1919_v19  ;;  %v1927_v36 = vmul.f32 1.442695, %v1752_v37  ;;  %v1622_v2 = vmul.f32 %v10798_v41, %v10798_v41  ;;  %9342 = vmatpush3.bf16.msra.mxu1 %v9339_v48  ;;  %8790 = vmatprep.mubr.msk.f32.mxu0 %vm2117_vm0, %v10841_v47 }
 0x16f   : > { %v1757_v11 = vmul.f32 %v10353_v12, %v1617_v55  ;;  %9734 = vpow2.f32 %v1921_v7  ;;  %v1933_v39 = vmul.f32 1.442695, %v1755_v25  ;;  %v1758_v40 = vmul.f32 %v10355_v14, %v1618_v24  ;;  %8800 = vmatprep.mubr.msk.f32.mxu1 %vm2117_vm0, %v10841_v47 }
 0x170   : > { %v932_v43 = vrot.slane %v916_v9, %v10338_v56  ;;  %9736 = vpow2.f32 %v1923_v0  ;;  %v1935_v46 = vmul.f32 1.442695, %v1756_v27  ;;  %v1623_v41 = vmul.f32 %v10801_v51, %v10801_v51  ;;  %8791 = vmatmul.mubr.msk.f32.gmra.mrb[34].mxu0 %vm2117_vm0, %v10851_v60 }
 0x171   : > { %v10892_v38 = vpop.eup %9720  ;;  %v10898_v50 = vmul.f32 %v10804_v5, %v10804_v5  ;;  %v925_v45 = vcombine.high %v923_v28, %v923_v28  ;;  %9738 = vpow2.f32 %v1925_v35  ;;  %v10904_v57 = vmul.f32 %v10807_v13, %v10807_v13  ;;  %8801 = vmatmul.mubr.msk.f32.gmra.mrb[34].mxu1 %vm2117_vm0, %v10851_v60  ;;  %8807 = vmatprep.mubr.msk.f32.mxu0 %vm2117_vm0, %v10756_v42 }
 0x172   : > { %v9723_v52 = vpop.eup %9722  ;;  %v946_v17 = vrot.slane %v924_v31, %v10338_v56  ;;  %9740 = vpow2.f32 %v1927_v36  ;;  %v1759_v51 = vmul.f32 %v10353_v12, %v1619_v21  ;;  %v939_v5 = vrot.slane %v923_v28, %v10338_v56  ;;  %8817 = vmatprep.mubr.msk.f32.mxu1 %vm2117_vm0, %v10756_v42 }
 0x173   : > { %9742 = vpow2.f32 %v1933_v39  ;;  %v1937_v58 = vmul.f32 1.442695, %v1757_v11  ;;  %v1760_v13 = vmul.f32 %v10355_v14, %v1620_v10  ;;  %v10918_v15 = vmul.f32 %v10814_v4, %v10814_v4  ;;  %v486_v39 = vpop.permute.xlu1 %485 }
 0x174   : > { %v9725_v63 = vpop.eup %9724  ;;  %v954_v23 = vcombine.high %v932_v43, %v932_v43  ;;  %9744 = vpow2.f32 %v1935_v46  ;;  %v1939_v44 = vmul.f32 1.442695, %v1758_v40  ;;  %v10922_v49 = vmul.f32 %v10817_v53, %v10817_v53  ;;  %8808 = vmatmul.mubr.msk.f32.vlgmr.msra.gmra.mrb[36].mxu0 %vm2117_vm0, %v10829_v61 }
 0x175   : > { %v9727_v55 = vpop.eup %9726  ;;  %v10925_v6 = vrot.slane %v925_v45, %v10338_v56  ;;  %v1238_v62 = vrot.slane %v932_v43, %v10322_v26  ;;  %v9343_v9 = vpack.c.bf16 %v9725_v63, %v9723_v52  ;;  %v10934_v16 = vmul.f32 %v10824_v59, %v10824_v59  ;;  %8818 = vmatmul.mubr.msk.f32.vlgmr.msra.gmra.mrb[36].mxu1 %vm2117_vm0, %v10829_v61 }
 0x176   : > { %v9729_v4 = vpop.eup %9728  ;;  %v1761_v19 = vmul.f32 %v10353_v12, %v1621_v29  ;;  %v956_v53 = vcombine.high %v946_v17, %v946_v17  ;;  %8810 = vmatprep.mubr.msk.f32.mxu0 %vm2117_vm0, %v10841_v47  ;;  %v1941_v20 = vmul.f32 1.442695, %v1759_v51  ;;  %v1762_v48 = vmul.f32 %v10355_v14, %v1622_v2  ;;  %8820 = vmatprep.mubr.msk.f32.mxu1 %vm2117_vm0, %v10841_v47 }
 0x177   : > { %v9731_v22 = vpop.eup %9730  ;;  %v955_v37 = vcombine.high %v939_v5, %v939_v5  ;;  %9344 = vmatprep.subr.bf16.mxu0 %v9343_v9  ;;  %9746 = vpow2.f32 %v1937_v58  ;;  %v1943_v59 = vmul.f32 1.442695, %v1760_v13  ;;  %v1242_v25 = vrot.slane %v946_v17, %v10322_v26 }
 0x178   : > { %v9733_v24 = vpop.eup %9732  ;;  %v1246_v7 = vrot.slane %v954_v23, %v10322_v26  ;;  %v10947_v21 = vrot.slane %v939_v5, %v10322_v26  ;;  %9346 = vmatpush3.bf16.msra.mxu0 %v9343_v9  ;;  %9748 = vpow2.f32 %v1939_v44  ;;  %v957_v0 = vcombine.high %v10925_v6, %v10925_v6 }
 0x179   : > { %v9735_v27 = vpop.eup %9734  ;;  %v10952_v10 = vsub.f32 %v1238_v62, %v10344_v1  ;;  %v10955_v28 = vsub.f32 %v1238_v62, %v10347_v3  ;;  %v9347_v35 = vpack.c.bf16 %v9733_v24, %v9731_v22  ;;  %8811 = vmatmul.mubr.msk.f32.gmra.mrb[38].mxu0 %vm2117_vm0, %v10851_v60  ;;  %v1250_v31 = vrot.slane %v956_v53, %v10322_v26 }
 0x17a   : > { %v9737_v29 = vpop.eup %9736  ;;  %v10962_v36 = vrot.slane %v10925_v6, %v10322_v26  ;;  %vm622_vm1 = vcmp.eq.s32.totalorder %v10928_v18, %v10743_v34  ;;  %8821 = vmatmul.mubr.msk.f32.gmra.mrb[38].mxu1 %vm2117_vm0, %v10851_v60  ;;  %8827 = vmatprep.mubr.msk.f32.mxu0 %vm2117_vm0, %v10756_v42  ;;  %9750 = vpow2.f32 %v1941_v20  ;;  %v1763_v2 = vmul.f32 %v10353_v12, %v1623_v41  ;;  %v425_v6 = vpop.permute.xlu0 %424 }
 0x17b   : > { %v9739_v11 = vpop.eup %9738  ;;  %9348 = vmatprep.subr.bf16.mxu1 %v9347_v35  ;;  %v9351_v40 = vpack.c.bf16 %v9737_v29, %v9735_v27  ;;  %8837 = vmatprep.mubr.msk.f32.mxu1 %vm2117_vm0, %v10756_v42  ;;  %9752 = vpow2.f32 %v1943_v59  ;;  %v1945_v43 = vmul.f32 1.442695, %v1761_v19  ;;  %v1764_v46 = vmul.f32 %v10355_v14, %v10898_v50 }
 0x17c   : > { %v9741_v45 = vpop.eup %9740  ;;  %v10976_v52 = vrot.slane %v955_v37, %v10322_v26  ;;  %v10979_v17 = vsub.f32 %v1242_v25, %v10344_v1  ;;  %v10982_v41 = vsub.f32 %v1242_v25, %v10347_v3  ;;  %9350 = vmatpush3.bf16.msra.mxu1 %v9347_v35  ;;  %v1947_v51 = vmul.f32 1.442695, %v1762_v48  ;;  %v546_v37 = vpop.permute.xlu1 %545 }
 0x17d   : > { %v9743_v5 = vpop.eup %9742  ;;  %v677_v58 = vmul.f32 %v9729_v4, %v10836_v8  ;;  %9352 = vmatprep.subr.bf16.mxu0 %v9351_v40  ;;  %v9355_v13 = vpack.c.bf16 %v9741_v45, %v9739_v11  ;;  %8828 = vmatmul.mubr.msk.f32.vlgmr.msra.gmra.mrb[40].mxu0 %vm2117_vm0, %v10829_v61  ;;  %v9359_v50 = vpack.c.bf16 %v9727_v55, %v10892_v38  ;;  %vm678_vm2 = vcmp.eq.f32.partialorder %v10836_v8, inf }
 0x17e   : > { %v9745_v63 = vpop.eup %9744  ;;  %v10989_v23 = vsub.f32 %v1246_v7, %v10344_v1  ;;  %v10992_v44 = vsub.f32 %v1246_v7, %v10347_v3  ;;  %9354 = vmatpush3.bf16.msra.mxu0 %v9351_v40  ;;  %8830 = vmatprep.mubr.msk.f32.mxu0 %vm2117_vm0, %v10841_v47  ;;  %v1949_v62 = vmul.f32 1.442695, %v1763_v2  ;;  %v10998_v9 = vrot.slane %v957_v0, %v10322_v26 }
 0x17f   : > { %9356 = vmatprep.subr.bf16.mxu1 %v9355_v13  ;;  %9360 = vmatprep.subr.bf16.mxu0 %v9359_v50  ;;  %9754 = vpow2.f32 %v1945_v43  ;;  %v1951_v38 = vmul.f32 1.442695, %v1764_v46  ;;  %v1765_v55 = vmul.f32 %v10353_v12, %v10904_v57  ;;  %v681_v4 = vand.u32 2147483648, %v10836_v8 }
 0x180   : > { %8838 = vmatmul.mubr.msk.f32.vlgmr.msra.gmra.mrb[40].mxu1 %vm2117_vm0, %v10829_v61  ;;  %v9363_v19 = vpack.c.bf16 %v9745_v63, %v9743_v5  ;;  %9756 = vpow2.f32 %v1947_v51  ;;  %v1766_v53 = vmul.f32 %v10355_v14, %v10918_v15  ;;  %v679_v22 = vsel %vm678_vm2, %v10836_v8, %v677_v58 }
 0x181   : > { %v9747_v20 = vpop.eup %9746  ;;  %vm680_vm3 = vcmp.eq.f32.partialorder %v10836_v8, 0.0  ;;  %v502_v48 = vsub.f32 %v486_v39, %v10329_v33  ;;  %v442_v57 = vsub.f32 %v425_v6, %v10325_v30  ;;  %9358 = vmatpush3.bf16.msra.mxu1 %v9355_v13  ;;  %8831 = vmatmul.mubr.msk.f32.gmra.mrb[42].mxu0 %vm2117_vm0, %v10851_v60  ;;  %v11016_v24 = vsub.f32 %v1250_v31, %v10344_v1 }
 0x182   : > { %v9749_v59 = vpop.eup %9748  ;;  %v11019_v15 = vsub.f32 %v1250_v31, %v10347_v3  ;;  %9364 = vmatprep.subr.bf16.mxu1 %v9363_v19  ;;  %8840 = vmatprep.mubr.msk.f32.mxu1 %vm2117_vm0, %v10841_v47  ;;  %9758 = vpow2.f32 %v1949_v62  ;;  %v1767_v25 = vmul.f32 %v10353_v12, %v10922_v49  ;;  %v1629_v7 = vmul.f32 %v10952_v10, %v10952_v10 }
 0x183   : > { %8847 = vmatprep.mubr.msk.f32.mxu0 %vm2117_vm0, %v10756_v42  ;;  %9760 = vpow2.f32 %v1951_v38  ;;  %v1953_v27 = vmul.f32 1.442695, %v1765_v55  ;;  %v1768_v0 = vmul.f32 %v10355_v14, %v10934_v16  ;;  %v1630_v29 = vmul.f32 %v10955_v28, %v10955_v28 }
 0x184   : > { %v9751_v35 = vpop.eup %9750  ;;  %v682_v31 = vsel %vm680_vm3, %v681_v4, %v679_v22  ;;  %v562_v49 = vsub.f32 %v546_v37, %v10327_v32  ;;  %8841 = vmatmul.mubr.msk.f32.gmra.mrb[42].mxu1 %vm2117_vm0, %v10851_v60  ;;  %v1955_v10 = vmul.f32 1.442695, %v1766_v53  ;;  %v7972_v11 = vsel %vm622_vm1, 1.0, %v10066_v54 }
 0x185   : > { %v9753_v2 = vpop.eup %9752  ;;  %v510_v16 = vmul.f32 %v502_v48, %v502_v48  ;;  %v450_v39 = vmul.f32 %v442_v57, %v442_v57  ;;  %8848 = vmatmul.mubr.msk.f32.vlgmr.msra.gmra.mrb[44].mxu0 %vm2117_vm0, %v10829_v61  ;;  %8857 = vmatprep.mubr.msk.f32.mxu1 %vm2117_vm0, %v10756_v42  ;;  %v9367_v8 = vpack.c.bf16 %v9749_v59, %v9747_v20  ;;  %v1957_v43 = vmul.f32 1.442695, %v1767_v25 }
 0x186   : > { %v11048_v28 = vsub.f32 %v10947_v21, %v10344_v1  ;;  %v11052_v40 = vsub.f32 %v10947_v21, %v10347_v3  ;;  %v1631_v18 = vmul.f32 %v10979_v17, %v10979_v17  ;;  %9362 = vmatpush3.bf16.msra.mxu0 %v9359_v50  ;;  %8850 = vmatprep.mubr.msk.f32.mxu0 %vm2117_vm0, %v10841_v47  ;;  %9762 = vpow2.f32 %v1953_v27 }
 0x187   : > { %v1632_v46 = vmul.f32 %v10982_v41, %v10982_v41  ;;  %v1769_v45 = vmul.f32 %v10353_v12, %v1629_v7  ;;  %9368 = vmatprep.subr.bf16.mxu0 %v9367_v8  ;;  %v1959_v51 = vmul.f32 1.442695, %v1768_v0  ;;  %v1770_v5 = vmul.f32 %v10355_v14, %v1630_v29 }
 0x188   : > { %v702_v21 = vmul.f32 %v7972_v11, %v682_v31  ;;  %8858 = vmatmul.mubr.msk.f32.vlgmr.msra.gmra.mrb[44].mxu1 %vm2117_vm0, %v10829_v61  ;;  %v9371_v17 = vpack.c.bf16 %v9753_v2, %v9751_v35  ;;  %9764 = vpow2.f32 %v1955_v10  ;;  %v1511_v13 = vsub.f32 %v10962_v36, %v10344_v1 }
 0x189   : > { %v9755_v58 = vpop.eup %9754  ;;  %v518_v50 = vadd.f32 %v510_v16, %v450_v39  ;;  %v570_v63 = vmul.f32 %v562_v49, %v562_v49  ;;  %9366 = vmatpush3.bf16.msra.mxu1 %v9363_v19  ;;  %8851 = vmatmul.mubr.msk.f32.gmra.mrb[46].mxu0 %vm2117_vm0, %v10851_v60  ;;  %v1512_v6 = vsub.f32 %v10962_v36, %v10347_v3  ;;  %9766 = vpow2.f32 %v1957_v43 }
 0x18a   : > { %v9757_v41 = vpop.eup %9756  ;;  %v1633_v62 = vmul.f32 %v10989_v23, %v10989_v23  ;;  %v1771_v38 = vmul.f32 %v10353_v12, %v1631_v18  ;;  %9372 = vmatprep.subr.bf16.mxu1 %v9371_v17  ;;  %8860 = vmatprep.mubr.msk.f32.mxu1 %vm2117_vm0, %v10841_v47  ;;  %v1634_v55 = vmul.f32 %v10992_v44, %v10992_v44  ;;  %v1961_v19 = vmul.f32 1.442695, %v1769_v45 }
 0x18b   : > { %v1772_v4 = vmul.f32 %v10355_v14, %v1632_v46  ;;  %8867 = vmatprep.mubr.msk.f32.mxu0 %vm2117_vm0, %v10756_v42  ;;  %9768 = vpow2.f32 %v1959_v51  ;;  %v1513_v23 = vsub.f32 %v10976_v52, %v10344_v1  ;;  %v1963_v53 = vmul.f32 1.442695, %v1770_v5 }
 0x18c   : > { %v9759_v36 = vpop.eup %9758  ;;  %v958_v20 = vcombine.high %v702_v21, %v702_v21  ;;  %v965_v22 = vrot.slane %v702_v21, %v10338_v56  ;;  %8861 = vmatmul.mubr.msk.f32.gmra.mrb[46].mxu1 %vm2117_vm0, %v10851_v60  ;;  %v1514_v44 = vsub.f32 %v10976_v52, %v10347_v3  ;;  %v11087_v57 = vadd.f32 %v570_v63, %v518_v50 }
 0x18d   : > { %v9761_v48 = vpop.eup %9760  ;;  %8868 = vmatmul.mubr.msk.f32.vlgmr.msra.gmra.mrb[48].mxu0 %vm2117_vm0, %v10829_v61  ;;  %8877 = vmatprep.mubr.msk.f32.mxu1 %vm2117_vm0, %v10756_v42  ;;  %v9375_v37 = vpack.c.bf16 %v9757_v41, %v9755_v58  ;;  %v1515_v59 = vsub.f32 %v10998_v9, %v10344_v1  ;;  %v1635_v25 = vmul.f32 %v11016_v24, %v11016_v24  ;;  %v1965_v52 = vmul.f32 1.442695, %v1771_v38 }
 0x18e   : > { %v1636_v7 = vmul.f32 %v11019_v15, %v11019_v15  ;;  %9370 = vmatpush3.bf16.msra.mxu0 %v9367_v8  ;;  %8870 = vmatprep.mubr.msk.f32.mxu0 %vm2117_vm0, %v10841_v47  ;;  %v1773_v27 = vmul.f32 %v10353_v12, %v1633_v62  ;;  %v1774_v0 = vmul.f32 %v10355_v14, %v1634_v55  ;;  %9770 = vpow2.f32 %v1961_v19 }
 0x18f   : > { %9376 = vmatprep.subr.bf16.mxu0 %v9375_v37  ;;  %v1967_v35 = vmul.f32 1.442695, %v1772_v4  ;;  %9772 = vpow2.f32 %v1963_v53  ;;  %v972_v29 = vrot.slane %v958_v20, %v10338_v56  ;;  %v973_v31 = vcombine.high %v965_v22, %v965_v22 }
 0x190   : > { %8878 = vmatmul.mubr.msk.f32.vlgmr.msra.gmra.mrb[48].mxu1 %vm2117_vm0, %v10829_v61  ;;  %v9379_v24 = vpack.c.bf16 %v9761_v48, %v9759_v36  ;;  %v9763_v15 = vpop.eup %9762  ;;  %v1516_v49 = vsub.f32 %v10998_v9, %v10347_v3  ;;  %v1637_v10 = vmul.f32 %v11048_v28, %v11048_v28  ;;  %v1638_v2 = vmul.f32 %v11052_v40, %v11052_v40 }
 0x191   : > { %9774 = vrsqrt.f32 %v11087_v57  ;;  %9374 = vmatpush3.bf16.msra.mxu1 %v9371_v17  ;;  %8871 = vmatmul.mubr.msk.f32.gmra.mrb[50].mxu0 %vm2117_vm0, %v10851_v60  ;;  %v1639_v16 = vmul.f32 %v1511_v13, %v1511_v13  ;;  %v981_v39 = vrot.slane %v965_v22, %v10338_v56  ;;  %v1775_v9 = vmul.f32 %v10353_v12, %v1635_v25  ;;  %v11148_v22 = vpop.permute.xlu0 %608 }
 0x192   : > { %v9765_v11 = vpop.eup %9764  ;;  %9380 = vmatprep.subr.bf16.mxu1 %v9379_v24  ;;  %8880 = vmatprep.mubr.msk.f32.mxu1 %vm2117_vm0, %v10841_v47  ;;  %9776 = vpow2.f32 %v1965_v52  ;;  %v1640_v8 = vmul.f32 %v1512_v6, %v1512_v6  ;;  %v1969_v28 = vmul.f32 1.442695, %v1773_v27  ;;  %v1776_v40 = vmul.f32 %v10355_v14, %v1636_v7 }
 0x193   : > { %8887 = vmatprep.mubr.msk.f32.mxu0 %vm2117_vm0, %v10756_v42  ;;  %9778 = vpow2.f32 %v1967_v35  ;;  %v9767_v18 = vpop.eup %9766  ;;  %v11122_v43 = vmul.f32 %v1513_v23, %v1513_v23  ;;  %v974_v46 = vcombine.high %v972_v29, %v972_v29  ;;  %v995_v45 = vrot.slane %v973_v31, %v10338_v56 }
 0x194   : > { %8881 = vmatmul.mubr.msk.f32.gmra.mrb[50].mxu1 %vm2117_vm0, %v10851_v60  ;;  %v1971_v51 = vmul.f32 1.442695, %v1774_v0  ;;  %v11127_v21 = vmul.f32 %v1514_v44, %v1514_v44  ;;  %v988_v17 = vrot.slane %v972_v29, %v10338_v56  ;;  %v9383_v58 = vpack.c.bf16 %v9765_v11, %v9763_v15 }
 0x195   : > { %v9769_v5 = vpop.eup %9768  ;;  %8888 = vmatmul.mubr.msk.f32.vlgmr.msra.gmra.mrb[52].mxu0 %vm2117_vm0, %v10829_v61  ;;  %8897 = vmatprep.mubr.msk.f32.mxu1 %vm2117_vm0, %v10756_v42  ;;  %v11134_v13 = vmul.f32 %v1515_v59, %v1515_v59  ;;  %v1777_v50 = vmul.f32 %v10353_v12, %v1637_v10  ;;  %v1003_v63 = vcombine.high %v981_v39, %v981_v39  ;;  %v1973_v41 = vmul.f32 1.442695, %v1775_v9  ;;  %v430_v9 = vpop.permute.xlu1 %429 }
 0x196   : > { %9378 = vmatpush3.bf16.msra.mxu0 %v9375_v37  ;;  %8890 = vmatprep.mubr.msk.f32.mxu0 %vm2117_vm0, %v10841_v47  ;;  %v1778_v6 = vmul.f32 %v10355_v14, %v1638_v2  ;;  %v1270_v62 = vrot.slane %v981_v39, %v10322_v26  ;;  %9780 = vpow2.f32 %v1969_v28  ;;  %v1975_v38 = vmul.f32 1.442695, %v1776_v40 }
 0x197   : > { %9384 = vmatprep.subr.bf16.mxu0 %v9383_v58  ;;  %v1002_v55 = vrot.slane %v974_v46, %v10338_v56  ;;  %v1005_v4 = vcombine.high %v995_v45, %v995_v45  ;;  %v9387_v19 = vpack.c.bf16 %v9769_v5, %v9767_v18  ;;  %9782 = vpow2.f32 %v1971_v51 }
 0x198   : > { %8898 = vmatmul.mubr.msk.f32.vlgmr.msra.gmra.mrb[52].mxu1 %vm2117_vm0, %v10829_v61  ;;  %v9771_v36 = vpop.eup %9770  ;;  %v11144_v23 = vmul.f32 %v1516_v49, %v1516_v49  ;;  %v1004_v53 = vcombine.high %v988_v17, %v988_v17  ;;  %v1274_v20 = vrot.slane %v995_v45, %v10322_v26  ;;  %vm685_vm4 = vcmp.eq.f32.partialorder %v11087_v57, inf }
 0x199   : > { %9382 = vmatpush3.bf16.msra.mxu1 %v9379_v24  ;;  %8891 = vmatmul.mubr.msk.f32.gmra.mrb[54].mxu0 %vm2117_vm0, %v10851_v60  ;;  %v9773_v48 = vpop.eup %9772  ;;  %v1278_v44 = vrot.slane %v1003_v63, %v10322_v26  ;;  %v11154_v37 = vrot.slane %v988_v17, %v10322_v26  ;;  %vm623_vm5 = vcmp.eq.s32.totalorder %v11148_v22, %v10743_v34  ;;  %9784 = vpow2.f32 %v1973_v41  ;;  %v490_v63 = vpop.permute.xlu0 %489 }
 0x19a   : > { %9388 = vmatprep.subr.bf16.mxu1 %v9387_v19  ;;  %8900 = vmatprep.mubr.msk.f32.mxu1 %vm2117_vm0, %v10841_v47  ;;  %v1779_v59 = vmul.f32 %v10353_v12, %v1639_v16  ;;  %v1517_v7 = vsub.f32 %v1270_v62, %v10344_v1  ;;  %9786 = vpow2.f32 %v1975_v38  ;;  %v1977_v52 = vmul.f32 1.442695, %v1777_v50 }
 0x19b   : > { %v9775_v25 = vpop.eup %9774  ;;  %8907 = vmatprep.mubr.msk.f32.mxu0 %vm2117_vm0, %v10756_v42  ;;  %v1780_v27 = vmul.f32 %v10355_v14, %v1640_v8  ;;  %v1006_v35 = vcombine.high %v1002_v55, %v1002_v55  ;;  %v1282_v29 = vrot.slane %v1005_v4, %v10322_v26  ;;  %v11167_v31 = vrot.slane %v1002_v55, %v10322_v26 }
 0x19c   : > { %v9777_v0 = vpop.eup %9776  ;;  %8901 = vmatmul.mubr.msk.f32.gmra.mrb[54].mxu1 %vm2117_vm0, %v10851_v60  ;;  %v1979_v24 = vmul.f32 1.442695, %v1778_v6  ;;  %v11172_v49 = vrot.slane %v1004_v53, %v10322_v26  ;;  %v1518_v10 = vsub.f32 %v1270_v62, %v10347_v3  ;;  %vm687_vm6 = vcmp.eq.f32.partialorder %v11087_v57, 0.0 }
 0x19d   : > { %v9779_v15 = vpop.eup %9778  ;;  %8908 = vmatmul.mubr.msk.f32.vlgmr.msra.gmra.mrb[56].mxu0 %vm2117_vm0, %v10829_v61  ;;  %8917 = vmatprep.mubr.msk.f32.mxu1 %vm2117_vm0, %v10756_v42  ;;  %v9391_v2 = vpack.c.bf16 %v9773_v48, %v9771_v36  ;;  %v1519_v11 = vsub.f32 %v1274_v20, %v10344_v1  ;;  %v1520_v16 = vsub.f32 %v1274_v20, %v10347_v3  ;;  %v1981_v8 = vmul.f32 1.442695, %v1779_v59 }
 0x19e   : > { %v684_v39 = vmul.f32 %v9775_v25, %v11087_v57  ;;  %9386 = vmatpush3.bf16.msra.mxu0 %v9383_v58  ;;  %8910 = vmatprep.mubr.msk.f32.mxu0 %vm2117_vm0, %v10841_v47  ;;  %v11186_v28 = vsub.f32 %v1278_v44, %v10344_v1  ;;  %9788 = vpow2.f32 %v1977_v52  ;;  %v1983_v40 = vmul.f32 1.442695, %v1780_v27 }
 0x19f   : > { %9392 = vmatprep.subr.bf16.mxu0 %v9391_v2  ;;  %v1781_v18 = vmul.f32 %v10353_v12, %v11122_v43  ;;  %v11191_v46 = vrot.slane %v1006_v35, %v10322_v26  ;;  %v9395_v45 = vpack.c.bf16 %v9779_v15, %v9777_v0  ;;  %9790 = vpow2.f32 %v1979_v24 }
 0x1a0   : > { %8918 = vmatmul.mubr.msk.f32.vlgmr.msra.gmra.mrb[56].mxu1 %vm2117_vm0, %v10829_v61  ;;  %v1782_v51 = vmul.f32 %v10355_v14, %v11127_v21  ;;  %v9781_v5 = vpop.eup %9780  ;;  %v1522_v17 = vsub.f32 %v1278_v44, %v10347_v3  ;;  %v11199_v58 = vsub.f32 %v1282_v29, %v10344_v1  ;;  %v1645_v50 = vmul.f32 %v1517_v7, %v1517_v7 }
 0x1a1   : > { %v688_v43 = vand.u32 2147483648, %v11087_v57  ;;  %9390 = vmatpush3.bf16.msra.mxu1 %v9387_v19  ;;  %8911 = vmatmul.mubr.msk.f32.gmra.mrb[58].mxu0 %vm2117_vm0, %v10851_v60  ;;  %v9783_v41 = vpop.eup %9782  ;;  %v1646_v6 = vmul.f32 %v1518_v10, %v1518_v10  ;;  %v686_v21 = vsel %vm685_vm4, %v11087_v57, %v684_v39  ;;  %9792 = vpow2.f32 %v1981_v8 }
 0x1a2   : > { %9396 = vmatprep.subr.bf16.mxu1 %v9395_v45  ;;  %8920 = vmatprep.mubr.msk.f32.mxu1 %vm2117_vm0, %v10841_v47  ;;  %v1783_v62 = vmul.f32 %v10353_v12, %v11134_v13  ;;  %v443_v38 = vsub.f32 %v430_v9, %v10325_v30  ;;  %9794 = vpow2.f32 %v1983_v40  ;;  %v1985_v55 = vmul.f32 1.442695, %v1781_v18  ;;  %v550_v13 = vpop.permute.xlu1 %549 }
 0x1a3   : > { %8927 = vmatprep.mubr.msk.f32.mxu0 %vm2117_vm0, %v10756_v42  ;;  %v1784_v4 = vmul.f32 %v10355_v14, %v11144_v23  ;;  %v9785_v19 = vpop.eup %9784  ;;  %v1524_v36 = vsub.f32 %v1282_v29, %v10347_v3  ;;  %v11219_v53 = vsub.f32 %v11154_v37, %v10344_v1  ;;  %v503_v20 = vsub.f32 %v490_v63, %v10329_v33 }
 0x1a4   : > { %8921 = vmatmul.mubr.msk.f32.gmra.mrb[58].mxu1 %vm2117_vm0, %v10851_v60  ;;  %v1987_v30 = vmul.f32 1.442695, %v1782_v51  ;;  %v9787_v48 = vpop.eup %9786  ;;  %v1647_v44 = vmul.f32 %v1519_v11, %v1519_v11  ;;  %v689_v59 = vsel %vm687_vm6, %v688_v43, %v686_v21  ;;  %v7973_v23 = vsel %vm623_vm5, 1.0, %v10066_v54 }
 0x1a5   : > { %8928 = vmatmul.mubr.msk.f32.vlgmr.msra.gmra.mrb[60].mxu0 %vm2117_vm0, %v10829_v61  ;;  %8937 = vmatprep.mubr.msk.f32.mxu1 %vm2117_vm0, %v10756_v42  ;;  %v9399_v33 = vpack.c.bf16 %v9783_v41, %v9781_v5  ;;  %v1648_v25 = vmul.f32 %v1520_v16, %v1520_v16  ;;  %v1785_v7 = vmul.f32 %v10353_v12, %v1645_v50  ;;  %v1989_v57 = vmul.f32 1.442695, %v1783_v62 }
 0x1a6   : > { %v1786_v52 = vmul.f32 %v10355_v14, %v1646_v6  ;;  %9394 = vmatpush3.bf16.msra.mxu0 %v9391_v2  ;;  %8930 = vmatprep.mubr.msk.f32.mxu0 %vm2117_vm0, %v10841_v47  ;;  %v451_v27 = vmul.f32 %v443_v38, %v443_v38  ;;  %v563_v34 = vsub.f32 %v550_v13, %v10327_v32  ;;  %9796 = vpow2.f32 %v1985_v55 }
 0x1a7   : > { %9400 = vmatprep.subr.bf16.mxu0 %v9399_v33  ;;  %v1991_v22 = vmul.f32 1.442695, %v1784_v4  ;;  %v703_v0 = vmul.f32 %v7973_v23, %v689_v59  ;;  %v511_v35 = vmul.f32 %v503_v20, %v503_v20  ;;  %v9403_v29 = vpack.c.bf16 %v9787_v48, %v9785_v19 }
 0x1a8   : > { %8938 = vmatmul.mubr.msk.f32.vlgmr.msra.gmra.mrb[60].mxu1 %vm2117_vm0, %v10829_v61  ;;  %9798 = vpow2.f32 %v1987_v30  ;;  %v9789_v24 = vpop.eup %9788  ;;  %v1526_v15 = vsub.f32 %v11154_v37, %v10347_v3  ;;  %v1527_v10 = vsub.f32 %v11167_v31, %v10344_v1  ;;  %v1528_v32 = vsub.f32 %v11167_v31, %v10347_v3 }
 0x1a9   : > { %9398 = vmatpush3.bf16.msra.mxu1 %v9395_v45  ;;  %8931 = vmatmul.mubr.msk.f32.gmra.mrb[62].mxu0 %vm2117_vm0, %v10851_v60  ;;  %v9791_v2 = vpop.eup %9790  ;;  %v11251_v11 = vsub.f32 %v11172_v49, %v10344_v1  ;;  %v1649_v16 = vmul.f32 %v11186_v28, %v11186_v28  ;;  %v1787_v37 = vmul.f32 %v10353_v12, %v1647_v44  ;;  %9800 = vpow2.f32 %v1989_v57 }
 0x1aa   : > { %9404 = vmatprep.subr.bf16.mxu1 %v9403_v29  ;;  %8940 = vmatprep.mubr.msk.f32.mxu1 %vm2117_vm0, %v10841_v47  ;;  %v1650_v31 = vmul.f32 %v1522_v17, %v1522_v17  ;;  %v1788_v39 = vmul.f32 %v10355_v14, %v1648_v25  ;;  %v1993_v9 = vmul.f32 1.442695, %v1785_v7  ;;  %9802 = vpow2.f32 %v1991_v22 }
 0x1ab   : > { %8947 = vmatprep.mubr.msk.f32.mxu0 %vm2117_vm0, %v10756_v42  ;;  %v9793_v8 = vpop.eup %9792  ;;  %v1995_v40 = vmul.f32 1.442695, %v1786_v52  ;;  %v1014_v18 = vrot.slane %v703_v0, %v10338_v56  ;;  %v519_v28 = vadd.f32 %v511_v35, %v451_v27  ;;  %v571_v45 = vmul.f32 %v563_v34, %v563_v34 }
 0x1ac   : > { %8941 = vmatmul.mubr.msk.f32.gmra.mrb[62].mxu1 %vm2117_vm0, %v10851_v60  ;;  %v9795_v51 = vpop.eup %9794  ;;  %v1530_v5 = vsub.f32 %v11172_v49, %v10347_v3  ;;  %v11268_v17 = vsub.f32 %v11191_v46, %v10344_v1  ;;  %v9407_v50 = vpack.c.bf16 %v9791_v2, %v9789_v24  ;;  %v1651_v43 = vmul.f32 %v11199_v58, %v11199_v58 }
 0x1ad   : > { %8948 = vmatmul.mubr.msk.f32.vlgmr.msra.gmra.mrb[64].mxu0 %vm2117_vm0, %v10829_v61  ;;  %8957 = vmatprep.mubr.msk.f32.mxu1 %vm2117_vm0, %v10756_v42  ;;  %v1652_v63 = vmul.f32 %v1524_v36, %v1524_v36  ;;  %v1007_v41 = vcombine.high %v703_v0, %v703_v0  ;;  %v1997_v49 = vmul.f32 1.442695, %v1787_v37  ;;  %v1789_v6 = vmul.f32 %v10353_v12, %v1649_v16 }
 0x1ae   : > { %9402 = vmatpush3.bf16.msra.mxu0 %v9399_v33  ;;  %8950 = vmatprep.mubr.msk.f32.mxu0 %vm2117_vm0, %v10841_v47  ;;  %v1790_v21 = vmul.f32 %v10355_v14, %v1650_v31  ;;  %9804 = vpow2.f32 %v1993_v9  ;;  %v1999_v62 = vmul.f32 1.442695, %v1788_v39  ;;  %v1022_v42 = vcombine.high %v1014_v18, %v1014_v18 }
 0x1af   : > { %9408 = vmatprep.subr.bf16.mxu0 %v9407_v50  ;;  %9806 = vpow2.f32 %v1995_v40  ;;  %v11280_v38 = vadd.f32 %v571_v45, %v519_v28  ;;  %v9411_v58 = vpack.c.bf16 %v9795_v51, %v9793_v8  ;;  %v1532_v4 = vsub.f32 %v11191_v46, %v10347_v3  ;;  %v11351_v28 = vpop.permute.xlu0 %2099 }
 0x1b0   : > { %8958 = vmatmul.mubr.msk.f32.vlgmr.msra.gmra.mrb[64].mxu1 %vm2117_vm0, %v10829_v61  ;;  %v9797_v55 = vpop.eup %9796  ;;  %v1653_v19 = vmul.f32 %v11219_v53, %v11219_v53  ;;  %v1654_v36 = vmul.f32 %v1526_v15, %v1526_v15  ;;  %v1021_v13 = vrot.slane %v1007_v41, %v10338_v56  ;;  %v1030_v30 = vrot.slane %v1014_v18, %v10338_v56  ;;  %v11298_v53 = vld [vmem:[%s12375_s6] sm:$0xff] }
 0x1b1   : > { %9406 = vmatpush3.bf16.msra.mxu1 %v9403_v29  ;;  %8951 = vmatmul.mubr.msk.f32.gmra.mrb[66].mxu0 %vm2117_vm0, %v10851_v60  ;;  %9808 = vpow2.f32 %v1997_v49  ;;  %v1791_v46 = vmul.f32 %v10353_v12, %v1651_v43  ;;  %v1655_v48 = vmul.f32 %v1527_v10, %v1527_v10  ;;  %v2001_v44 = vmul.f32 1.442695, %v1789_v6 }
 0x1b2   : > { %v9799_v20 = vpop.eup %9798  ;;  %9412 = vmatprep.subr.bf16.mxu1 %v9411_v58  ;;  %8960 = vmatprep.mubr.msk.f32.mxu1 %vm2117_vm0, %v10841_v47  ;;  %9810 = vpow2.f32 %v1999_v62  ;;  %v1792_v59 = vmul.f32 %v10355_v14, %v1652_v63  ;;  %v1656_v33 = vmul.f32 %v1528_v32, %v1528_v32  ;;  %v1044_v25 = vrot.slane %v1022_v42, %v10338_v56  ;;  %v11380_v62 = vld [vmem:[%s12375_s6 + $0x8] sm:$0xff] }
 0x1b3   : > { %8967 = vmatprep.mubr.msk.f32.mxu0 %vm2117_vm0, %v11298_v53  ;;  %v9801_v23 = vpop.eup %9800  ;;  %9812 = vrsqrt.f32 %v11280_v38  ;;  %v2003_v7 = vmul.f32 1.442695, %v1790_v21  ;;  %v11309_v57 = vmul.f32 %v11251_v11, %v11251_v11  ;;  %v11311_v27 = vmul.f32 %v1530_v5, %v1530_v5  ;;  %v11325_v11 = vpop.permute.xlu1 %611 }
 0x1b4   : > { %8961 = vmatmul.mubr.msk.f32.gmra.mrb[66].mxu1 %vm2117_vm0, %v10851_v60  ;;  %v9803_v52 = vpop.eup %9802  ;;  %v9415_v34 = vpack.c.bf16 %v9799_v20, %v9797_v55  ;;  %v1793_v22 = vmul.f32 %v10353_v12, %v1653_v19  ;;  %v1023_v0 = vcombine.high %v1021_v13, %v1021_v13  ;;  %v1052_v35 = vcombine.high %v1030_v30, %v1030_v30  ;;  %v11395_v55 = vld [vmem:[%s12375_s6 + $0x10] sm:$0xff] }
 0x1b5   : > { %8968 = vmatmul.mubr.msk.f32.vlgmr.msra.gmra.mrb[68].mxu0 %vm2117_vm0, %v10829_v61  ;;  %8977 = vmatprep.mubr.msk.f32.mxu1 %vm2117_vm0, %v11298_v53  ;;  %v2005_v29 = vmul.f32 1.442695, %v1791_v46  ;;  %v1794_v24 = vmul.f32 %v10355_v14, %v1654_v36  ;;  %v11322_v15 = vrot.slane %v1021_v13, %v10338_v56  ;;  %9814 = vpow2.f32 %v2001_v44 }
 0x1b6   : > { %9410 = vmatpush3.bf16.msra.mxu0 %v9407_v50  ;;  %8970 = vmatprep.mubr.msk.f32.mxu0 %vm2117_vm0, %v10841_v47  ;;  %v2007_v10 = vmul.f32 1.442695, %v1792_v59  ;;  %v1054_v32 = vcombine.high %v1044_v25, %v1044_v25  ;;  %v1302_v2 = vrot.slane %v1030_v30, %v10322_v26  ;;  %v11329_v16 = vpack.c.bf16 %v9803_v52, %v9801_v23 }
 0x1b7   : > { %9416 = vmatprep.subr.bf16.mxu0 %v9415_v34  ;;  %9816 = vpow2.f32 %v2003_v7  ;;  %v11334_v31 = vmul.f32 %v11268_v17, %v11268_v17  ;;  %v11336_v39 = vmul.f32 %v1532_v4, %v1532_v4  ;;  %v1306_v9 = vrot.slane %v1044_v25, %v10322_v26  ;;  %v11369_v41 = vpop.permute.xlu1 %2104  ;;  %v11412_v7 = vpop.permute.xlu0 %2114 }
 0x1b8   : > { %8978 = vmatmul.mubr.msk.f32.vlgmr.msra.gmra.mrb[68].mxu1 %vm2117_vm0, %v10829_v61  ;;  %v9805_v37 = vpop.eup %9804  ;;  %v11342_v61 = vrot.slane %v1023_v0, %v10338_v56  ;;  %v11345_v40 = vrot.slane %v1052_v35, %v10322_v26  ;;  %9818 = vpow2.f32 %v2005_v29  ;;  %v1795_v18 = vmul.f32 %v10353_v12, %v1655_v48  ;;  %v9911_v35 = vld [vmem:[#allocation5] ss:$0 sm:$0xff] }
 0x1b9   : > { %9414 = vmatpush3.bf16.msra.mxu1 %v9411_v58  ;;  %8971 = vmatmul.mubr.msk.f32.gmra.mrb[70].mxu0 %vm2117_vm0, %v10851_v60  ;;  %v9807_v8 = vpop.eup %9806  ;;  %v1053_v45 = vcombine.high %v11322_v15, %v11322_v15  ;;  %9820 = vpow2.f32 %v2007_v10  ;;  %v2009_v51 = vmul.f32 1.442695, %v1793_v22  ;;  %v1796_v5 = vmul.f32 %v10355_v14, %v1656_v33  ;;  %v11419_v22 = vld [vmem:[%s12375_s6 + $0x18] sm:$0xff] }
 0x1ba   : > { %9420 = vmatprep.subr.bf16.mxu1 %v11329_v16  ;;  %8980 = vmatprep.mubr.msk.f32.mxu1 %vm2117_vm0, %v10841_v47  ;;  %v11363_v47 = vrot.slane %v1054_v32, %v10322_v26  ;;  %v1533_v50 = vsub.f32 %v1302_v2, %v10344_v1  ;;  %v1534_v43 = vsub.f32 %v1302_v2, %v10347_v3  ;;  %v2011_v63 = vmul.f32 1.442695, %v1794_v24 }
 0x1bb   : > { %8987 = vmatprep.mubr.msk.f32.mxu0 %vm2117_vm0, %v11298_v53  ;;  %v9809_v17 = vpop.eup %9808  ;;  %v11372_v6 = vsub.f32 %v1306_v9, %v10344_v1  ;;  %v11375_v21 = vsub.f32 %v1306_v9, %v10347_v3  ;;  %v11390_v58 = vsub.f32 %v11345_v40, %v10344_v1  ;;  %v2013_v4 = vmul.f32 1.442695, %v1795_v18  ;;  %v11435_v24 = vpop.permute.xlu1 %2109 }
 0x1bc   : > { %8981 = vmatmul.mubr.msk.f32.gmra.mrb[70].mxu1 %vm2117_vm0, %v10851_v60  ;;  %v9811_v49 = vpop.eup %9810  ;;  %v11386_v60 = vpack.c.bf16 %v9807_v8, %v9805_v37  ;;  %v1797_v19 = vmul.f32 %v10353_v12, %v11309_v57  ;;  %v1798_v36 = vmul.f32 %v10355_v14, %v11311_v27  ;;  %9822 = vpow2.f32 %v2009_v51 }
 0x1bd   : > { %8988 = vmatmul.mubr.msk.f32.vlgmr.msra.gmra.mrb[72].mxu0 %vm2117_vm0, %v11380_v62  ;;  %8997 = vmatprep.mubr.msk.f32.mxu1 %vm2117_vm0, %v11298_v53  ;;  %v9813_v42 = vpop.eup %9812  ;;  %v2015_v30 = vmul.f32 1.442695, %v1796_v5  ;;  %v11408_v23 = vpack.c.bf16 %v9811_v49, %v9809_v17  ;;  %9824 = vpow2.f32 %v2011_v63  ;;  %v1661_v57 = vmul.f32 %v1533_v50, %v1533_v50 }
 0x1be   : > { %9418 = vmatpush3.bf16.msra.mxu0 %v9415_v34  ;;  %8990 = vmatprep.mubr.msk.f32.mxu0 %vm2117_vm0, %v11395_v55  ;;  %v1662_v27 = vmul.f32 %v1534_v43, %v1534_v43  ;;  %v691_v34 = vmul.f32 %v9813_v42, %v11280_v38  ;;  %vm624_vm7 = vcmp.eq.s32.totalorder %v11325_v11, %v9911_v35  ;;  %vm692_vm8 = vcmp.eq.f32.partialorder %v11280_v38, inf }
 0x1bf   : > { %9424 = vmatprep.subr.bf16.mxu0 %v11386_v60  ;;  %v9815_v52 = vpop.eup %9814  ;;  %9826 = vpow2.f32 %v2013_v4  ;;  %v1799_v29 = vmul.f32 %v10353_v12, %v11334_v31  ;;  %v2017_v32 = vmul.f32 1.442695, %v1797_v19  ;;  %v1800_v2 = vmul.f32 %v10355_v14, %v11336_v39 }
 0x1c0   : > { %8998 = vmatmul.mubr.msk.f32.vlgmr.msra.gmra.mrb[72].mxu1 %vm2117_vm0, %v11380_v62  ;;  %9828 = vpow2.f32 %v2015_v30  ;;  %v695_v31 = vand.u32 2147483648, %v11280_v38  ;;  %v2019_v18 = vmul.f32 1.442695, %v1798_v36  ;;  %v693_v50 = vsel %vm692_vm8, %v11280_v38, %v691_v34 }
 0x1c1   : > { %9422 = vmatpush3.bf16.msra.mxu1 %v11329_v16  ;;  %8991 = vmatmul.mubr.msk.f32.gmra.mrb[74].mxu0 %vm2117_vm0, %v11419_v22  ;;  %v9817_v0 = vpop.eup %9816  ;;  %vm694_vm9 = vcmp.eq.f32.partialorder %v11280_v38, 0.0  ;;  %v1538_v49 = vsub.f32 %v11345_v40, %v10347_v3  ;;  %v1663_v42 = vmul.f32 %v11372_v6, %v11372_v6  ;;  %v1664_v4 = vmul.f32 %v11375_v21, %v11375_v21 }
 0x1c2   : > { %9428 = vmatprep.subr.bf16.mxu1 %v11408_v23  ;;  %9000 = vmatprep.mubr.msk.f32.mxu1 %vm2117_vm0, %v11395_v55  ;;  %v9819_v8 = vpop.eup %9818  ;;  %v9431_v43 = vpack.c.bf16 %v9817_v0, %v9815_v52  ;;  %v2021_v19 = vmul.f32 1.442695, %v1799_v29  ;;  %v1801_v36 = vmul.f32 %v10353_v12, %v1661_v57  ;;  %9830 = vpow2.f32 %v2017_v32 }
 0x1c3   : > { %9007 = vmatprep.mubr.msk.f32.mxu0 %vm2117_vm0, %v11298_v53  ;;  %v9821_v39 = vpop.eup %9820  ;;  %v2023_v40 = vmul.f32 1.442695, %v1800_v2  ;;  %v7974_v6 = vsel %vm624_vm7, 1.0, %v10066_v54  ;;  %v696_v21 = vsel %vm694_vm9, %v695_v31, %v693_v50  ;;  %9832 = vpow2.f32 %v2019_v18 }
 0x1c4   : > { %9001 = vmatmul.mubr.msk.f32.gmra.mrb[74].mxu1 %vm2117_vm0, %v11419_v22  ;;  %v1055_v30 = vcombine.high %v11342_v61, %v11342_v61  ;;  %v1540_v38 = vsub.f32 %v11363_v47, %v10347_v3  ;;  %v1665_v11 = vmul.f32 %v11390_v58, %v11390_v58  ;;  %9834 = vpow2.f32 %v2021_v19 }
 0x1c5   : > { %9008 = vmatmul.mubr.msk.f32.vlgmr.msra.gmra.mrb[76].mxu0 %vm2117_vm0, %v11380_v62  ;;  %9017 = vmatprep.mubr.msk.f32.mxu1 %vm2117_vm0, %v11298_v53  ;;  %9836 = vpow2.f32 %v2023_v40  ;;  %v1322_v58 = vrot.slane %v11342_v61, %v10322_v26  ;;  %v1666_v52 = vmul.f32 %v1538_v49, %v1538_v49 }
 0x1c6   : > { %9426 = vmatpush3.bf16.msra.mxu0 %v11386_v60  ;;  %9010 = vmatprep.mubr.msk.f32.mxu0 %vm2117_vm0, %v11395_v55  ;;  %v9435_v60 = vpack.c.bf16 %v9821_v39, %v9819_v8  ;;  %v1330_v34 = vrot.slane %v1055_v30, %v10322_v26  ;;  %v1668_v35 = vmul.f32 %v1540_v38, %v1540_v38 }
 0x1c7   : > { %9432 = vmatprep.subr.bf16.mxu0 %v9431_v43  ;;  %v1544_v31 = vsub.f32 %v1322_v58, %v10347_v3 }
 0x1c8   : > { %9018 = vmatmul.mubr.msk.f32.vlgmr.msra.gmra.mrb[76].mxu1 %vm2117_vm0, %v11380_v62  ;;  %v1808_v49 = vmul.f32 %v10355_v14, %v1668_v35  ;;  %v11540_v19 = vsub.f32 %v1330_v34, %v10347_v3 }
 0x1c9   : > { %9430 = vmatpush3.bf16.msra.mxu1 %v11408_v23  ;;  %9011 = vmatmul.mubr.msk.f32.gmra.mrb[78].mxu0 %vm2117_vm0, %v11419_v22  ;;  %v2025_v23 = vmul.f32 1.442695, %v1801_v36 }
 0x1ca   : > { %9436 = vmatprep.subr.bf16.mxu1 %v9435_v60  ;;  %9020 = vmatprep.mubr.msk.f32.mxu1 %vm2117_vm0, %v11395_v55 }
 0x1cb   : > { %9027 = vmatprep.mubr.msk.f32.mxu0 %vm2117_vm0, %v11298_v53  ;;  %9838 = vpow2.f32 %v2025_v23 }
 0x1cc   : > { %9021 = vmatmul.mubr.msk.f32.gmra.mrb[78].mxu1 %vm2117_vm0, %v11419_v22 }
 0x1cd   : > { %9028 = vmatmul.mubr.msk.f32.vlgmr.msra.gmra.mrb[80].mxu0 %vm2117_vm0, %v11380_v62  ;;  %9037 = vmatprep.mubr.msk.f32.mxu1 %vm2117_vm0, %v11298_v53 }
 0x1ce   : > { %9434 = vmatpush3.bf16.msra.mxu0 %v9431_v43  ;;  %9030 = vmatprep.mubr.msk.f32.mxu0 %vm2117_vm0, %v11395_v55 }
 0x1d0   : > { %9038 = vmatmul.mubr.msk.f32.vlgmr.msra.gmra.mrb[80].mxu1 %vm2117_vm0, %v11380_v62 }
 0x1d1   : > { %9438 = vmatpush3.bf16.msra.mxu1 %v9435_v60  ;;  %9031 = vmatmul.mubr.msk.f32.gmra.mrb[82].mxu0 %vm2117_vm0, %v11419_v22 }
 0x1d2   : > { %9040 = vmatprep.mubr.msk.f32.mxu1 %vm2117_vm0, %v11395_v55  ;;  %9047 = vmatprep.mubr.msk.f32.mxu0 %vm2117_vm0, %v11298_v53 }
 0x1d4   : > { %9041 = vmatmul.mubr.msk.f32.gmra.mrb[82].mxu1 %vm2117_vm0, %v11419_v22 }
 0x1d5   : > { %9048 = vmatmul.mubr.msk.f32.vlgmr.msra.gmra.mrb[84].mxu0 %vm2117_vm0, %v11380_v62  ;;  %9057 = vmatprep.mubr.msk.f32.mxu1 %vm2117_vm0, %v11298_v53 }
 0x1d6   : > { %9050 = vmatprep.mubr.msk.f32.mxu0 %vm2117_vm0, %v11395_v55 }
 0x1d8   : > { %9058 = vmatmul.mubr.msk.f32.vlgmr.msra.gmra.mrb[84].mxu1 %vm2117_vm0, %v11380_v62 }
 0x1d9   : > { %9051 = vmatmul.mubr.msk.f32.gmra.mrb[86].mxu0 %vm2117_vm0, %v11419_v22  ;;  %9060 = vmatprep.mubr.msk.f32.mxu1 %vm2117_vm0, %v11395_v55 }
 0x1da   : > { %9067 = vmatprep.mubr.msk.f32.mxu0 %vm2117_vm0, %v11298_v53 }
 0x1dc   : > { %9061 = vmatmul.mubr.msk.f32.gmra.mrb[86].mxu1 %vm2117_vm0, %v11419_v22 }
 0x1dd   : > { %9077 = vmatprep.mubr.msk.f32.mxu1 %vm2117_vm0, %v11298_v53 }
 0x1e7   : > { %v8629_v20 = vpop.f32.mrb[0].mxu0 }
 0x1e8   : > { %v2202_v46 = vadd.f32 %v8629_v20, %v11369_v41  ;;  %v2196_v44 = vpop.f32.mrb[1].mxu0  ;;  %v1802_v20 = vmul.f32 %v10355_v14, %v1662_v27 }
 0x1e9   : > { %v8639_v13 = vpop.f32.mrb[0].mxu1  ;;  %v2197_v33 = vadd.f32 %v2196_v44, %v11351_v28  ;;  %v1803_v44 = vmul.f32 %v10353_v12, %v1663_v42 }
 0x1ea   : > { %v2287_v48 = vadd.f32 %v8639_v13, %v11369_v41  ;;  %v2281_v59 = vpop.f32.mrb[1].mxu1  ;;  %7571 = vst [vmem:[%s11424_s23 + $0x8] sm:$0xff] %v2202_v46  ;;  %v9823_v13 = vpop.eup %9822  ;;  %v1318_v46 = vrot.slane %v11322_v15, %v10322_v26  ;;  %v2027_v57 = vmul.f32 1.442695, %v1802_v20 }
 0x1eb   : > { %v2282_v25 = vadd.f32 %v2281_v59, %v11351_v28  ;;  %7570 = vst [vmem:[%s11424_s23] sm:$0xff] %v2197_v33  ;;  %v8632_v10 = vpop.f32.mrb[2].mxu0  ;;  %v9825_v54 = vpop.eup %9824  ;;  %v1804_v59 = vmul.f32 %v10355_v14, %v1664_v4  ;;  %v11497_v33 = vmul.f32 %v7974_v6, %v696_v21  ;;  %v2029_v29 = vmul.f32 1.442695, %v1803_v44 }
 0x1ec   : > { %7575 = vst [vmem:[%s11424_s23 + $0x28] sm:$0xff] %v2287_v48  ;;  %v2206_v16 = vpop.f32.mrb[3].mxu0  ;;  %v2212_v9 = vadd.f32 %v8632_v10, %v11412_v7  ;;  %v1539_v48 = vsub.f32 %v11363_v47, %v10344_v1  ;;  %v9827_v47 = vpop.eup %9826  ;;  %v1541_v0 = vsub.f32 %v1318_v46, %v10344_v1  ;;  %v9439_v61 = vpack.c.bf16 %v9825_v54, %v9823_v13 }
 0x1ed   : > { %7574 = vst [vmem:[%s11424_s23 + $0x20] sm:$0xff] %v2282_v25  ;;  %v8642_v37 = vpop.f32.mrb[2].mxu1  ;;  %v2207_v51 = vadd.f32 %v2206_v16, %v11435_v24  ;;  %v1326_v25 = vrot.slane %v1053_v45, %v10322_v26  ;;  %v9829_v27 = vpop.eup %9828  ;;  %v1542_v15 = vsub.f32 %v1318_v46, %v10347_v3  ;;  %v1805_v10 = vmul.f32 %v10353_v12, %v1665_v11 }
 0x1ee   : > { %v2291_v5 = vpop.f32.mrb[3].mxu1  ;;  %v2297_v17 = vadd.f32 %v8642_v37, %v11412_v7  ;;  %7573 = vst [vmem:[%s11424_s23 + $0x18] sm:$0xff] %v2212_v9  ;;  %v1667_v45 = vmul.f32 %v1539_v48, %v1539_v48  ;;  %v1063_v32 = vrot.slane %v11497_v33, %v10338_v56  ;;  %9440 = vmatprep.subr.bf16.mxu0 %v9439_v61  ;;  %v2031_v2 = vmul.f32 1.442695, %v1804_v59  ;;  %v9831_v8 = vpop.eup %9830 }
 0x1ef   : > { %v2292_v63 = vadd.f32 %v2291_v5, %v11435_v24  ;;  %7572 = vst [vmem:[%s11424_s23 + $0x10] sm:$0xff] %v2207_v51  ;;  %v1543_v16 = vsub.f32 %v1322_v58, %v10344_v1  ;;  %v1806_v37 = vmul.f32 %v10355_v14, %v1666_v52  ;;  %9840 = vpow2.f32 %v2027_v57  ;;  %v9833_v5 = vpop.eup %9832  ;;  %9442 = vmatpush3.bf16.msra.mxu0 %v9439_v61  ;;  %v8649_v44 = vpop.f32.mrb[4].mxu0 }
 0x1f0   : > { %7577 = vst [vmem:[%s11424_s23 + $0x38] sm:$0xff] %v2297_v17  ;;  %v9443_v9 = vpack.c.bf16 %v9829_v27, %v9827_v47  ;;  %v1545_v18 = vsub.f32 %v1326_v25, %v10344_v1  ;;  %v1546_v51 = vsub.f32 %v1326_v25, %v10347_v3  ;;  %v1669_v17 = vmul.f32 %v1541_v0, %v1541_v0  ;;  %v9835_v42 = vpop.eup %9834  ;;  %v2366_v58 = vpop.f32.mrb[5].mxu0 }
 0x1f1   : > { %7576 = vst [vmem:[%s11424_s23 + $0x30] sm:$0xff] %v2292_v63  ;;  %v1670_v39 = vmul.f32 %v1542_v15, %v1542_v15  ;;  %9842 = vpow2.f32 %v2029_v29  ;;  %v1807_v50 = vmul.f32 %v10353_v12, %v1667_v45  ;;  %v1071_v43 = vcombine.high %v1063_v32, %v1063_v32  ;;  %v9837_v40 = vpop.eup %9836  ;;  %v8659_v59 = vpop.f32.mrb[4].mxu1 }
 0x1f2   : > { %9444 = vmatprep.subr.bf16.mxu1 %v9443_v9  ;;  %9844 = vpow2.f32 %v2031_v2  ;;  %v2033_v63 = vmul.f32 1.442695, %v1805_v10  ;;  %v11537_v4 = vsub.f32 %v1330_v34, %v10344_v1  ;;  %v1671_v36 = vmul.f32 %v1543_v16, %v1543_v16  ;;  %v2451_v25 = vpop.f32.mrb[5].mxu1  ;;  %v9839_v52 = vpop.eup %9838  ;;  %9068 = vmatmul.mubr.msk.f32.vlgmr.msra.gmra.mrb[88].mxu0 %vm2117_vm0, %v11380_v62 }
 0x1f3   : > { %v2035_v20 = vmul.f32 1.442695, %v1806_v37  ;;  %v1672_v6 = vmul.f32 %v1544_v31, %v1544_v31  ;;  %v11544_v21 = vmul.f32 %v1545_v18, %v1545_v18  ;;  %v9447_v60 = vpack.c.bf16 %v9833_v5, %v9831_v8  ;;  %9446 = vmatpush3.bf16.msra.mxu1 %v9443_v9  ;;  %9070 = vmatprep.mubr.msk.f32.mxu0 %vm2117_vm0, %v11395_v55 }
 0x1f4   : > { %v1809_v13 = vmul.f32 %v10353_v12, %v1669_v17  ;;  %v1056_v30 = vcombine.high %v11497_v33, %v11497_v33  ;;  %v11554_v46 = vrot.slane %v1063_v32, %v10338_v56  ;;  %v2037_v48 = vmul.f32 1.442695, %v1807_v50  ;;  %v8652_v32 = vpop.f32.mrb[6].mxu0 }
 0x1f5   : > { %v1810_v54 = vmul.f32 %v10355_v14, %v1670_v39  ;;  %v11560_v38 = vrot.slane %v1071_v43, %v10338_v56  ;;  %9448 = vmatprep.subr.bf16.mxu0 %v9447_v60  ;;  %9846 = vpow2.f32 %v2033_v63  ;;  %v2039_v11 = vmul.f32 1.442695, %v1808_v49  ;;  %v8662_v2 = vpop.f32.mrb[6].mxu1  ;;  %v2376_v31 = vpop.f32.mrb[7].mxu0 }
 0x1f6   : > { %v11564_v23 = vpack.c.bf16 %v9837_v40, %v9835_v42  ;;  %9848 = vpow2.f32 %v2035_v20  ;;  %v2372_v33 = vadd.f32 %v8649_v44, %v11369_v41  ;;  %v2457_v47 = vadd.f32 %v8659_v59, %v11369_v41  ;;  %9450 = vmatpush3.bf16.msra.mxu0 %v9447_v60  ;;  %9078 = vmatmul.mubr.msk.f32.vlgmr.msra.gmra.mrb[88].mxu1 %vm2117_vm0, %v11380_v62 }
 0x1f7   : > { %v1674_v57 = vmul.f32 %v1546_v51, %v1546_v51  ;;  %v2367_v27 = vadd.f32 %v2366_v58, %v11351_v28  ;;  %v2452_v34 = vadd.f32 %v2451_v25, %v11351_v28  ;;  %v11573_v61 = vrot.slane %v1056_v30, %v10338_v56  ;;  %v2461_v51 = vpop.f32.mrb[7].mxu1  ;;  %9071 = vmatmul.mubr.msk.f32.gmra.mrb[90].mxu0 %vm2117_vm0, %v11419_v22 }
 0x1f8   : > { %v1334_v15 = vrot.slane %v11554_v46, %v10322_v26  ;;  %9452 = vmatprep.subr.bf16.mxu1 %v11564_v23  ;;  %9850 = vpow2.f32 %v2037_v48  ;;  %v1811_v45 = vmul.f32 %v10353_v12, %v1671_v36  ;;  %7579 = vst [vmem:[%s11424_s23 + $0x48] sm:$0xff] %v2372_v33  ;;  %7583 = vst [vmem:[%s11424_s23 + $0x68] sm:$0xff] %v2457_v47  ;;  %v2041_v29 = vmul.f32 1.442695, %v1809_v13 }
 0x1f9   : > { %v9841_v0 = vpop.eup %9840  ;;  %v1101_v35 = vcombine.high %v11554_v46, %v11554_v46  ;;  %9852 = vpow2.f32 %v2039_v11  ;;  %v1812_v10 = vmul.f32 %v10355_v14, %v1672_v6  ;;  %7578 = vst [vmem:[%s11424_s23 + $0x40] sm:$0xff] %v2367_v27  ;;  %7582 = vst [vmem:[%s11424_s23 + $0x60] sm:$0xff] %v2452_v34  ;;  %v1338_v37 = vrot.slane %v11560_v38, %v10322_v26  ;;  %v8669_v11 = vpop.f32.mrb[8].mxu0 }
 0x1fa   : > { %v2043_v9 = vmul.f32 1.442695, %v1810_v54  ;;  %v2382_v8 = vadd.f32 %v8652_v32, %v11412_v7  ;;  %v2467_v18 = vadd.f32 %v8662_v2, %v11412_v7  ;;  %v9455_v17 = vpack.c.bf16 %v9841_v0, %v9839_v52  ;;  %9454 = vmatpush3.bf16.msra.mxu1 %v11564_v23  ;;  %9080 = vmatprep.mubr.msk.f32.mxu1 %vm2117_vm0, %v11395_v55  ;;  %v2536_v33 = vpop.f32.mrb[9].mxu0 }
 0x1fb   : > { %v9843_v16 = vpop.eup %9842  ;;  %v2377_v39 = vadd.f32 %v2376_v31, %v11435_v24  ;;  %v2462_v50 = vadd.f32 %v2461_v51, %v11435_v24  ;;  %v1675_v43 = vmul.f32 %v11537_v4, %v11537_v4  ;;  %v1676_v63 = vmul.f32 %v11540_v19, %v11540_v19  ;;  %9087 = vmatprep.mubr.msk.f32.mxu0 %vm2117_vm0, %v11298_v53  ;;  %v8672_v32 = vpop.f32.mrb[10].mxu0 }
 0x1fc   : > { %v9845_v5 = vpop.eup %9844  ;;  %v1549_v49 = vsub.f32 %v1334_v15, %v10344_v1  ;;  %v2045_v42 = vmul.f32 1.442695, %v1811_v45  ;;  %7581 = vst [vmem:[%s11424_s23 + $0x58] sm:$0xff] %v2382_v8  ;;  %7585 = vst [vmem:[%s11424_s23 + $0x78] sm:$0xff] %v2467_v18  ;;  %v1072_v36 = vcombine.high %v11573_v61, %v11573_v61  ;;  %9456 = vmatprep.subr.bf16.mxu0 %v9455_v17  ;;  %9854 = vpow2.f32 %v2041_v29 }
 0x1fd   : > { %v2047_v20 = vmul.f32 1.442695, %v1812_v10  ;;  %v1813_v4 = vmul.f32 %v10353_v12, %v11544_v21  ;;  %7580 = vst [vmem:[%s11424_s23 + $0x50] sm:$0xff] %v2377_v39  ;;  %7584 = vst [vmem:[%s11424_s23 + $0x70] sm:$0xff] %v2462_v50  ;;  %v1550_v19 = vsub.f32 %v1334_v15, %v10347_v3  ;;  %v9459_v40 = vpack.c.bf16 %v9845_v5, %v9843_v16 }
 0x1fe   : > { %9856 = vpow2.f32 %v2043_v9  ;;  %v1814_v6 = vmul.f32 %v10355_v14, %v1674_v57  ;;  %v1103_v13 = vcombine.high %v11560_v38, %v11560_v38  ;;  %v1342_v30 = vrot.slane %v1101_v35, %v10322_v26  ;;  %9081 = vmatmul.mubr.msk.f32.gmra.mrb[90].mxu1 %vm2117_vm0, %v11419_v22  ;;  %9088 = vmatmul.mubr.msk.f32.vlgmr.msra.gmra.mrb[92].mxu0 %vm2117_vm0, %v11380_v62  ;;  %v2546_v9 = vpop.f32.mrb[11].mxu0 }
 0x1ff   : > { %v9847_v60 = vpop.eup %9846  ;;  %v1551_v46 = vsub.f32 %v1338_v37, %v10344_v1  ;;  %v1552_v48 = vsub.f32 %v1338_v37, %v10347_v3  ;;  %v1677_v54 = vmul.f32 %v1549_v49, %v1549_v49  ;;  %9460 = vmatprep.subr.bf16.mxu1 %v9459_v40  ;;  %9858 = vpow2.f32 %v2045_v42  ;;  %9097 = vmatprep.mubr.msk.f32.mxu1 %vm2117_vm0, %v11298_v53 }
 0x200   : > { %v9849_v21 = vpop.eup %9848  ;;  %v1815_v38 = vmul.f32 %v10353_v12, %v1675_v43  ;;  %9860 = vpow2.f32 %v2047_v20  ;;  %v2049_v44 = vmul.f32 1.442695, %v1813_v4  ;;  %v1816_v59 = vmul.f32 %v10355_v14, %v1676_v63  ;;  %9458 = vmatpush3.bf16.msra.mxu0 %v9455_v17  ;;  %9090 = vmatprep.mubr.msk.f32.mxu0 %vm2117_vm0, %v11395_v55 }
 0x201   : > { %v2542_v23 = vadd.f32 %v8669_v11, %v11369_v41  ;;  %v11638_v58 = vrot.slane %v11573_v61, %v10338_v56  ;;  %v1678_v25 = vmul.f32 %v1550_v19, %v1550_v19  ;;  %v2051_v52 = vmul.f32 1.442695, %v1814_v6 }
 0x202   : > { %v9851_v47 = vpop.eup %9850  ;;  %v2537_v57 = vadd.f32 %v2536_v33, %v11351_v28  ;;  %v1346_v34 = vrot.slane %v1103_v13, %v10322_v26  ;;  %v1553_v0 = vsub.f32 %v1342_v30, %v10344_v1  ;;  %v9463_v15 = vpack.c.bf16 %v9849_v21, %v9847_v60  ;;  %9098 = vmatmul.mubr.msk.f32.vlgmr.msra.gmra.mrb[92].mxu1 %vm2117_vm0, %v11380_v62 }
 0x203   : > { %v9853_v27 = vpop.eup %9852  ;;  %7587 = vst [vmem:[%s11424_s23 + $0x88] sm:$0xff] %v2542_v23  ;;  %v1554_v45 = vsub.f32 %v1342_v30, %v10347_v3  ;;  %v1679_v35 = vmul.f32 %v1551_v46, %v1551_v46  ;;  %v1680_v29 = vmul.f32 %v1552_v48, %v1552_v48  ;;  %v2053_v10 = vmul.f32 1.442695, %v1815_v38  ;;  %9462 = vmatpush3.bf16.msra.mxu1 %v9459_v40 }
 0x204   : > { %7586 = vst [vmem:[%s11424_s23 + $0x80] sm:$0xff] %v2537_v57  ;;  %v1817_v2 = vmul.f32 %v10353_v12, %v1677_v54  ;;  %9464 = vmatprep.subr.bf16.mxu0 %v9463_v15  ;;  %9862 = vpow2.f32 %v2049_v44  ;;  %v2055_v16 = vmul.f32 1.442695, %v1816_v59  ;;  %v2552_v37 = vadd.f32 %v8672_v32, %v11412_v7  ;;  %9091 = vmatmul.mubr.msk.f32.gmra.mrb[94].mxu0 %vm2117_vm0, %v11419_v22 }
 0x205   : > { %v1818_v8 = vmul.f32 %v10355_v14, %v1678_v25  ;;  %v9467_v31 = vpack.c.bf16 %v9853_v27, %v9851_v47  ;;  %9864 = vpow2.f32 %v2051_v52  ;;  %v2547_v18 = vadd.f32 %v2546_v9, %v11435_v24  ;;  %9100 = vmatprep.mubr.msk.f32.mxu1 %vm2117_vm0, %v11395_v55  ;;  %9107 = vmatprep.mubr.msk.f32.mxu0 %vm2117_vm0, %v11298_v53 }
 0x206   : > { %v9855_v51 = vpop.eup %9854  ;;  %v11664_v5 = vrot.slane %v1072_v36, %v10338_v56  ;;  %v1350_v17 = vrot.slane %v11638_v58, %v10322_v26  ;;  %7589 = vst [vmem:[%s11424_s23 + $0x98] sm:$0xff] %v2552_v37  ;;  %v1555_v50 = vsub.f32 %v1346_v34, %v10344_v1  ;;  %v1556_v43 = vsub.f32 %v1346_v34, %v10347_v3 }
 0x207   : > { %v1819_v63 = vmul.f32 %v10353_v12, %v1679_v35  ;;  %9468 = vmatprep.subr.bf16.mxu1 %v9467_v31  ;;  %9866 = vpow2.f32 %v2053_v10  ;;  %7588 = vst [vmem:[%s11424_s23 + $0x90] sm:$0xff] %v2547_v18  ;;  %v1681_v56 = vmul.f32 %v1553_v0, %v1553_v0  ;;  %v1820_v61 = vmul.f32 %v10355_v14, %v1680_v29 }
 0x208   : > { %v9857_v39 = vpop.eup %9856  ;;  %v2057_v49 = vmul.f32 1.442695, %v1817_v2  ;;  %9868 = vpow2.f32 %v2055_v16  ;;  %v1682_v36 = vmul.f32 %v1554_v45, %v1554_v45  ;;  %v2059_v20 = vmul.f32 1.442695, %v1818_v8  ;;  %9101 = vmatmul.mubr.msk.f32.gmra.mrb[94].mxu1 %vm2117_vm0, %v11419_v22  ;;  %9108 = vmatmul.mubr.msk.f32.vlgmr.msra.gmra.mrb[96].mxu0 %vm2117_vm0, %v11380_v62 }
 0x209   : > { %v9859_v42 = vpop.eup %9858  ;;  %v1102_v19 = vcombine.high %v11638_v58, %v11638_v58  ;;  %v1354_v40 = vrot.slane %v11664_v5, %v10322_v26  ;;  %9117 = vmatprep.mubr.msk.f32.mxu1 %vm2117_vm0, %v11298_v53  ;;  %v9471_v6 = vpack.c.bf16 %v9857_v39, %v9855_v51  ;;  %v1104_v60 = vcombine.high %v11664_v5, %v11664_v5  ;;  %v8679_v58 = vpop.f32.mrb[8].mxu1 }
 0x20a   : > { %v9861_v4 = vpop.eup %9860  ;;  %v1557_v13 = vsub.f32 %v1350_v17, %v10344_v1  ;;  %v1683_v30 = vmul.f32 %v1555_v50, %v1555_v50  ;;  %9466 = vmatpush3.bf16.msra.mxu0 %v9463_v15  ;;  %9110 = vmatprep.mubr.msk.f32.mxu0 %vm2117_vm0, %v11395_v55  ;;  %v2061_v46 = vmul.f32 1.442695, %v1819_v63  ;;  %v1684_v21 = vmul.f32 %v1556_v43, %v1556_v43  ;;  %v2621_v34 = vpop.f32.mrb[9].mxu1 }
 0x20b   : > { %v1821_v48 = vmul.f32 %v10353_v12, %v1681_v56  ;;  %9870 = vpow2.f32 %v2057_v49  ;;  %9472 = vmatprep.subr.bf16.mxu0 %v9471_v6  ;;  %v2063_v54 = vmul.f32 1.442695, %v1820_v61  ;;  %v1558_v38 = vsub.f32 %v1350_v17, %v10347_v3  ;;  %v8682_v9 = vpop.f32.mrb[10].mxu1 }
 0x20c   : > { %v1822_v11 = vmul.f32 %v10355_v14, %v1682_v36  ;;  %9872 = vpow2.f32 %v2059_v20  ;;  %9118 = vmatmul.mubr.msk.f32.vlgmr.msra.gmra.mrb[96].mxu1 %vm2117_vm0, %v11380_v62  ;;  %v9475_v44 = vpack.c.bf16 %v9861_v4, %v9859_v42  ;;  %v1358_v23 = vrot.slane %v1102_v19, %v10322_v26  ;;  %9111 = vmatmul.mubr.msk.f32.gmra.mrb[98].mxu0 %vm2117_vm0, %v11419_v22  ;;  %v2631_v51 = vpop.f32.mrb[11].mxu1 }
 0x20d   : > { %v1559_v33 = vsub.f32 %v1354_v40, %v10344_v1  ;;  %v1560_v47 = vsub.f32 %v1354_v40, %v10347_v3  ;;  %9470 = vmatpush3.bf16.msra.mxu1 %v9467_v31  ;;  %v1685_v52 = vmul.f32 %v1557_v13, %v1557_v13  ;;  %9120 = vmatprep.mubr.msk.f32.mxu1 %vm2117_vm0, %v11395_v55  ;;  %9874 = vpow2.f32 %v2061_v46 }
 0x20e   : > { %v9863_v59 = vpop.eup %9862  ;;  %9476 = vmatprep.subr.bf16.mxu1 %v9475_v44  ;;  %v1823_v57 = vmul.f32 %v10353_v12, %v1683_v30  ;;  %v2627_v27 = vadd.f32 %v8679_v58, %v11369_v41  ;;  %9127 = vmatprep.mubr.msk.f32.mxu0 %vm2117_vm0, %v11298_v53  ;;  %9876 = vpow2.f32 %v2063_v54  ;;  %v2065_v0 = vmul.f32 1.442695, %v1821_v48 }
 0x20f   : > { %v9865_v25 = vpop.eup %9864  ;;  %v1824_v15 = vmul.f32 %v10355_v14, %v1684_v21  ;;  %v2622_v45 = vadd.f32 %v2621_v34, %v11351_v28  ;;  %v1686_v29 = vmul.f32 %v1558_v38, %v1558_v38  ;;  %v2067_v10 = vmul.f32 1.442695, %v1822_v11  ;;  %v8689_v11 = vpop.f32.mrb[12].mxu0 }
 0x210   : > { %9121 = vmatmul.mubr.msk.f32.gmra.mrb[98].mxu1 %vm2117_vm0, %v11419_v22  ;;  %7591 = vst [vmem:[%s11424_s23 + $0xa8] sm:$0xff] %v2627_v27  ;;  %v1362_v2 = vrot.slane %v1104_v60, %v10322_v26  ;;  %v1561_v16 = vsub.f32 %v1358_v23, %v10344_v1  ;;  %9128 = vmatmul.mubr.msk.f32.vlgmr.msra.gmra.mrb[100].mxu0 %vm2117_vm0, %v11380_v62  ;;  %v2069_v18 = vmul.f32 1.442695, %v1823_v57  ;;  %9878 = vpow2.f32 %v2065_v0 }
 0x211   : > { %v9867_v35 = vpop.eup %9866  ;;  %9137 = vmatprep.mubr.msk.f32.mxu1 %vm2117_vm0, %v11298_v53  ;;  %v9479_v37 = vpack.c.bf16 %v9865_v25, %v9863_v59  ;;  %7590 = vst [vmem:[%s11424_s23 + $0xa0] sm:$0xff] %v2622_v45  ;;  %v1687_v8 = vmul.f32 %v1559_v33, %v1559_v33  ;;  %v1688_v31 = vmul.f32 %v1560_v47, %v1560_v47  ;;  %v2071_v17 = vmul.f32 1.442695, %v1824_v15 }
 0x212   : > { %v9869_v32 = vpop.eup %9868  ;;  %9474 = vmatpush3.bf16.msra.mxu0 %v9471_v6  ;;  %9130 = vmatprep.mubr.msk.f32.mxu0 %vm2117_vm0, %v11395_v55  ;;  %v2637_v26 = vadd.f32 %v8682_v9, %v11412_v7  ;;  %v1825_v5 = vmul.f32 %v10353_v12, %v1685_v52  ;;  %v2632_v39 = vadd.f32 %v2631_v51, %v11435_v24  ;;  %9880 = vpow2.f32 %v2067_v10 }
 0x213   : > { %9480 = vmatprep.subr.bf16.mxu0 %v9479_v37  ;;  %v1562_v50 = vsub.f32 %v1358_v23, %v10347_v3  ;;  %v1826_v43 = vmul.f32 %v10355_v14, %v1686_v29  ;;  %v9483_v63 = vpack.c.bf16 %v9869_v32, %v9867_v35  ;;  %v1563_v49 = vsub.f32 %v1362_v2, %v10344_v1  ;;  %v2706_v23 = vpop.f32.mrb[13].mxu0 }
 0x214   : > { %9138 = vmatmul.mubr.msk.f32.vlgmr.msra.gmra.mrb[100].mxu1 %vm2117_vm0, %v11380_v62  ;;  %7593 = vst [vmem:[%s11424_s23 + $0xb8] sm:$0xff] %v2637_v26  ;;  %9131 = vmatmul.mubr.msk.f32.gmra.mrb[102].mxu0 %vm2117_vm0, %v11419_v22  ;;  %7592 = vst [vmem:[%s11424_s23 + $0xb0] sm:$0xff] %v2632_v39  ;;  %v1564_v42 = vsub.f32 %v1362_v2, %v10347_v3  ;;  %9882 = vpow2.f32 %v2069_v18  ;;  %v1827_v36 = vmul.f32 %v10353_v12, %v1687_v8  ;;  %v8692_v35 = vpop.f32.mrb[14].mxu0 }
 0x215   : > { %v9871_v56 = vpop.eup %9870  ;;  %9478 = vmatpush3.bf16.msra.mxu1 %v9475_v44  ;;  %9140 = vmatprep.mubr.msk.f32.mxu1 %vm2117_vm0, %v11395_v55  ;;  %v1689_v20 = vmul.f32 %v1561_v16, %v1561_v16  ;;  %9884 = vpow2.f32 %v2071_v17  ;;  %v2073_v4 = vmul.f32 1.442695, %v1825_v5  ;;  %v1828_v19 = vmul.f32 %v10355_v14, %v1688_v31  ;;  %v2716_v2 = vpop.f32.mrb[15].mxu0 }
 0x216   : > { %v9873_v61 = vpop.eup %9872  ;;  %9484 = vmatprep.subr.bf16.mxu1 %v9483_v63  ;;  %9147 = vmatprep.mubr.msk.f32.mxu0 %vm2117_vm0, %v11298_v53  ;;  %v1690_v6 = vmul.f32 %v1562_v50, %v1562_v50  ;;  %v2075_v1 = vmul.f32 1.442695, %v1826_v43  ;;  %v1691_v13 = vmul.f32 %v1563_v49, %v1563_v49  ;;  %v2077_v30 = vmul.f32 1.442695, %v1827_v36  ;;  %v8709_v5 = vpop.f32.mrb[16].mxu0 }
 0x217   : > { %v9875_v40 = vpop.eup %9874  ;;  %v9487_v60 = vpack.c.bf16 %v9873_v61, %v9871_v56  ;;  %v1692_v46 = vmul.f32 %v1564_v42, %v1564_v42  ;;  %9886 = vpow2.f32 %v2073_v4  ;;  %v2079_v21 = vmul.f32 1.442695, %v1828_v19  ;;  %v2876_v50 = vpop.f32.mrb[17].mxu0 }
 0x218   : > { %9141 = vmatmul.mubr.msk.f32.gmra.mrb[102].mxu1 %vm2117_vm0, %v11419_v22  ;;  %v9877_v3 = vpop.eup %9876  ;;  %9148 = vmatmul.mubr.msk.f32.vlgmr.msra.gmra.mrb[104].mxu0 %vm2117_vm0, %v11380_v62  ;;  %v1829_v48 = vmul.f32 %v10353_v12, %v1689_v20  ;;  %9888 = vpow2.f32 %v2075_v1  ;;  %v1830_v38 = vmul.f32 %v10355_v14, %v1690_v6  ;;  %v2712_v59 = vadd.f32 %v8689_v11, %v11369_v41  ;;  %v8712_v20 = vpop.f32.mrb[18].mxu0  ;;  %v9914_v11 = vld [vmem:[%s12375_s6 + $0x8] sm:$0xff] }
 0x219   : > { %9157 = vmatprep.mubr.msk.f32.mxu1 %vm2117_vm0, %v11298_v53  ;;  %9482 = vmatpush3.bf16.msra.mxu0 %v9479_v37  ;;  %v9491_v54 = vpack.c.bf16 %v9877_v3, %v9875_v40  ;;  %9890 = vpow2.f32 %v2077_v30  ;;  %v1831_v47 = vmul.f32 %v10353_v12, %v1691_v13  ;;  %v2707_v58 = vadd.f32 %v2706_v23, %v11351_v28  ;;  %v11775_v12 = vld [vmem:[%s12375_s6] sm:$0xff] }
 0x21a   : > { %9150 = vmatprep.mubr.msk.f32.mxu0 %vm2117_vm0, %v11395_v55  ;;  %9488 = vmatprep.subr.bf16.mxu0 %v9487_v60  ;;  %v9879_v44 = vpop.eup %9878  ;;  %9892 = vpow2.f32 %v2079_v21  ;;  %v2081_v25 = vmul.f32 1.442695, %v1829_v48  ;;  %7595 = vst [vmem:[%s11424_s23 + $0xc8] sm:$0xff] %v2712_v59  ;;  %v1832_v52 = vmul.f32 %v10355_v14, %v1692_v46  ;;  %v2083_v27 = vmul.f32 1.442695, %v1830_v38  ;;  %v8699_v14 = vpop.f32.mrb[12].mxu1 }
 0x21b   : > { %7594 = vst [vmem:[%s11424_s23 + $0xc0] sm:$0xff] %v2707_v58  ;;  %v2085_v0 = vmul.f32 1.442695, %v1831_v47  ;;  %v2797_v15 = vadd.f32 %v8699_v14, %v11369_v41  ;;  %v2791_v45 = vpop.f32.mrb[13].mxu1  ;;  %v2722_v32 = vadd.f32 %v8692_v35, %v11412_v7  ;;  %v2717_v37 = vadd.f32 %v2716_v2, %v11435_v24  ;;  %v9915_v58 = vld [vmem:[%s12375_s6 + $0x18] sm:$0xff] }
 0x21c   : > { %9158 = vmatmul.mubr.msk.f32.vlgmr.msra.gmra.mrb[104].mxu1 %vm2117_vm0, %v11380_v62  ;;  %9151 = vmatmul.mubr.msk.f32.gmra.mrb[106].mxu0 %vm2117_vm0, %v11419_v22  ;;  %v9881_v33 = vpop.eup %9880  ;;  %9894 = vpow2.f32 %v2081_v25  ;;  %v2087_v29 = vmul.f32 1.442695, %v1832_v52  ;;  %v2792_v10 = vadd.f32 %v2791_v45, %v11351_v28  ;;  %v8702_v8 = vpop.f32.mrb[14].mxu1  ;;  %v2882_v39 = vadd.f32 %v8709_v5, %v11369_v41 }
 0x21d   : > { %9486 = vmatpush3.bf16.msra.mxu1 %v9483_v63  ;;  %9160 = vmatprep.mubr.msk.f32.mxu1 %vm2117_vm0, %v11395_v55  ;;  %9896 = vpow2.f32 %v2083_v27  ;;  %7599 = vst [vmem:[%s11424_s23 + $0xe8] sm:$0xff] %v2797_v15  ;;  %7597 = vst [vmem:[%s11424_s23 + $0xd8] sm:$0xff] %v2722_v32  ;;  %v2807_v18 = vadd.f32 %v8702_v8, %v11412_v7  ;;  %v2801_v26 = vpop.f32.mrb[15].mxu1  ;;  %v2877_v61 = vadd.f32 %v2876_v50, %v11351_v28 }
 0x21e   : > { %9492 = vmatprep.subr.bf16.mxu1 %v9491_v54  ;;  %9167 = vmatprep.mubr.msk.f32.mxu0 %vm2117_vm0, %v11298_v53  ;;  %v9883_v57 = vpop.eup %9882  ;;  %v9495_v53 = vpack.c.bf16 %v9881_v33, %v9879_v44  ;;  %7598 = vst [vmem:[%s11424_s23 + $0xe0] sm:$0xff] %v2792_v10  ;;  %9898 = vpow2.f32 %v2085_v0  ;;  %7596 = vst [vmem:[%s11424_s23 + $0xd0] sm:$0xff] %v2717_v37  ;;  %v2802_v51 = vadd.f32 %v2801_v26, %v11435_v24  ;;  %v8719_v56 = vpop.f32.mrb[16].mxu1 }
 0x21f   : > { %v9885_v34 = vpop.eup %9884  ;;  %9900 = vpow2.f32 %v2087_v29  ;;  %7601 = vst [vmem:[%s11424_s23 + $0xf8] sm:$0xff] %v2807_v18  ;;  %7603 = vst [vmem:[%s11424_s23 + $0x108] sm:$0xff] %v2882_v39  ;;  %v2967_v49 = vadd.f32 %v8719_v56, %v11369_v41  ;;  %v2961_v42 = vpop.f32.mrb[17].mxu1  ;;  %v2892_v19 = vadd.f32 %v8712_v20, %v11412_v7 }
 0x220   : > { %9161 = vmatmul.mubr.msk.f32.gmra.mrb[106].mxu1 %vm2117_vm0, %v11419_v22  ;;  %9168 = vmatmul.mubr.msk.f32.vlgmr.msra.gmra.mrb[108].mxu0 %vm2117_vm0, %v11380_v62  ;;  %v9499_v16 = vpack.c.bf16 %v9885_v34, %v9883_v57  ;;  %7600 = vst [vmem:[%s11424_s23 + $0xf0] sm:$0xff] %v2802_v51  ;;  %7602 = vst [vmem:[%s11424_s23 + $0x100] sm:$0xff] %v2877_v61  ;;  %v2962_v36 = vadd.f32 %v2961_v42, %v11351_v28  ;;  %v8722_v1 = vpop.f32.mrb[18].mxu1 }
 0x221   : > { %9177 = vmatprep.mubr.msk.f32.mxu1 %vm2117_vm0, %v11775_v12  ;;  %9490 = vmatpush3.bf16.msra.mxu0 %v9487_v60  ;;  %v9887_v9 = vpop.eup %9886  ;;  %7607 = vst [vmem:[%s11424_s23 + $0x128] sm:$0xff] %v2967_v49  ;;  %7605 = vst [vmem:[%s11424_s23 + $0x118] sm:$0xff] %v2892_v19  ;;  %v2977_v60 = vadd.f32 %v8722_v1, %v11412_v7  ;;  %v2971_v13 = vpop.f32.mrb[19].mxu1 }
 0x222   : > { %9170 = vmatprep.mubr.msk.f32.mxu0 %vm2117_vm0, %v11395_v55  ;;  %9496 = vmatprep.subr.bf16.mxu0 %v9495_v53  ;;  %v9889_v31 = vpop.eup %9888  ;;  %7606 = vst [vmem:[%s11424_s23 + $0x120] sm:$0xff] %v2962_v36  ;;  %v2972_v30 = vadd.f32 %v2971_v13, %v11435_v24  ;;  %v8739_v52 = vpop.f32.mrb[20].mxu1 }
 0x223   : > { %v9891_v17 = vpop.eup %9890  ;;  %v9503_v63 = vpack.c.bf16 %v9889_v31, %v9887_v9  ;;  %7609 = vst [vmem:[%s11424_s23 + $0x138] sm:$0xff] %v2977_v60  ;;  %v3137_v57 = vadd.f32 %v8739_v52, %v11369_v41  ;;  %v3131_v27 = vpop.f32.mrb[21].mxu1 }
 0x224   : > { %9178 = vmatmul.mubr.msk.f32.vlgmr.msra.gmra.mrb[108].mxu1 %vm2117_vm0, %v11380_v62  ;;  %9171 = vmatmul.mubr.msk.f32.gmra.mrb[110].mxu0 %vm2117_vm0, %v11419_v22  ;;  %v9893_v43 = vpop.eup %9892  ;;  %7608 = vst [vmem:[%s11424_s23 + $0x130] sm:$0xff] %v2972_v30  ;;  %v3132_v34 = vadd.f32 %v3131_v27, %v11351_v28 }
 0x225   : > { %9494 = vmatpush3.bf16.msra.mxu1 %v9491_v54  ;;  %9180 = vmatprep.mubr.msk.f32.mxu1 %vm2117_vm0, %v11395_v55  ;;  %v9507_v4 = vpack.c.bf16 %v9893_v43, %v9891_v17  ;;  %7615 = vst [vmem:[%s11424_s23 + $0x168] sm:$0xff] %v3137_v57 }
 0x226   : > { %9500 = vmatprep.subr.bf16.mxu1 %v9499_v16  ;;  %9187 = vmatprep.mubr.msk.f32.mxu0 %vm2117_vm0, %v11775_v12  ;;  %v9895_v40 = vpop.eup %9894  ;;  %7614 = vst [vmem:[%s11424_s23 + $0x160] sm:$0xff] %v3132_v34 }
 0x227   : > { %v9897_v3 = vpop.eup %9896 }
 0x228   : > { %9181 = vmatmul.mubr.msk.f32.gmra.mrb[110].mxu1 %vm2117_vm0, %v11419_v22  ;;  %9188 = vmatmul.mubr.msk.f32.vlgmr.msra.gmra.mrb[112].mxu0 %vm2117_vm0, %v11380_v62  ;;  %v9899_v21 = vpop.eup %9898  ;;  %v9511_v44 = vpack.c.bf16 %v9897_v3, %v9895_v40 }
 0x229   : > { %9197 = vmatprep.mubr.msk.f32.mxu1 %vm2117_vm0, %v11775_v12  ;;  %9498 = vmatpush3.bf16.msra.mxu0 %v9495_v53  ;;  %v9901_v38 = vpop.eup %9900  ;;  %v8742_v53 = vpop.f32.mrb[22].mxu1 }
 0x22a   : > { %9190 = vmatprep.mubr.msk.f32.mxu0 %vm2117_vm0, %v11395_v55  ;;  %9504 = vmatprep.subr.bf16.mxu0 %v9503_v63  ;;  %v2886_v55 = vpop.f32.mrb[19].mxu0  ;;  %v9515_v23 = vpack.c.bf16 %v9901_v38, %v9899_v21  ;;  %v3147_v14 = vadd.f32 %v8742_v53, %v11412_v7  ;;  %v3141_v0 = vpop.f32.mrb[23].mxu1 }
 0x22b   : > { %v2887_v6 = vadd.f32 %v2886_v55, %v11435_v24  ;;  %v8729_v46 = vpop.f32.mrb[20].mxu0  ;;  %v3142_v15 = vadd.f32 %v3141_v0, %v11435_v24  ;;  %v8759_v35 = vpop.f32.mrb[24].mxu1 }
 0x22c   : > { %9198 = vmatmul.mubr.msk.f32.vlgmr.msra.gmra.mrb[112].mxu1 %vm2117_vm0, %v11380_v62  ;;  %9191 = vmatmul.mubr.msk.f32.gmra.mrb[114].mxu0 %vm2117_vm0, %v11419_v22  ;;  %v11826_v62 = vld [vmem:[%s12375_s6 + $0x10] sm:$0xff]  ;;  %v3052_v48 = vadd.f32 %v8729_v46, %v11369_v41  ;;  %v3046_v54 = vpop.f32.mrb[21].mxu0  ;;  %7617 = vst [vmem:[%s11424_s23 + $0x178] sm:$0xff] %v3147_v14  ;;  %v3307_v10 = vadd.f32 %v8759_v35, %v11369_v41  ;;  %v3301_v2 = vpop.f32.mrb[25].mxu1 }
 0x22d   : > { %9502 = vmatpush3.bf16.msra.mxu1 %v9499_v16  ;;  %9200 = vmatprep.mubr.msk.f32.mxu1 %vm2117_vm0, %v11826_v62  ;;  %7604 = vst [vmem:[%s11424_s23 + $0x110] sm:$0xff] %v2887_v6  ;;  %v3047_v59 = vadd.f32 %v3046_v54, %v11351_v28  ;;  %7616 = vst [vmem:[%s11424_s23 + $0x170] sm:$0xff] %v3142_v15  ;;  %v3302_v16 = vadd.f32 %v3301_v2, %v11351_v28  ;;  %v8762_v9 = vpop.f32.mrb[26].mxu1 }
 0x22e   : > { %9508 = vmatprep.subr.bf16.mxu1 %v9507_v4  ;;  %9207 = vmatprep.mubr.msk.f32.mxu0 %vm2117_vm0, %v11775_v12  ;;  %7611 = vst [vmem:[%s11424_s23 + $0x148] sm:$0xff] %v3052_v48  ;;  %7623 = vst [vmem:[%s11424_s23 + $0x1a8] sm:$0xff] %v3307_v10  ;;  %v3317_v18 = vadd.f32 %v8762_v9, %v11412_v7  ;;  %v3311_v26 = vpop.f32.mrb[27].mxu1 }
 0x22f   : > { %7610 = vst [vmem:[%s11424_s23 + $0x140] sm:$0xff] %v3047_v59  ;;  %7622 = vst [vmem:[%s11424_s23 + $0x1a0] sm:$0xff] %v3302_v16  ;;  %v3312_v5 = vadd.f32 %v3311_v26, %v11435_v24 }
 0x230   : > { %9201 = vmatmul.mubr.msk.f32.gmra.mrb[114].mxu1 %vm2117_vm0, %v11419_v22  ;;  %9208 = vmatmul.mubr.msk.f32.vlgmr.msra.gmra.mrb[116].mxu0 %vm2117_vm0, %v9914_v11  ;;  %v8732_v22 = vpop.f32.mrb[22].mxu0  ;;  %7625 = vst [vmem:[%s11424_s23 + $0x1b8] sm:$0xff] %v3317_v18 }
 0x231   : > { %9217 = vmatprep.mubr.msk.f32.mxu1 %vm2117_vm0, %v11775_v12  ;;  %9506 = vmatpush3.bf16.msra.mxu0 %v9503_v63  ;;  %v3062_v33 = vadd.f32 %v8732_v22, %v11412_v7  ;;  %v3056_v47 = vpop.f32.mrb[23].mxu0  ;;  %7624 = vst [vmem:[%s11424_s23 + $0x1b0] sm:$0xff] %v3312_v5 }
 0x232   : > { %9210 = vmatprep.mubr.msk.f32.mxu0 %vm2117_vm0, %v11826_v62  ;;  %9512 = vmatprep.subr.bf16.mxu0 %v9511_v44  ;;  %v3057_v25 = vadd.f32 %v3056_v47, %v11435_v24  ;;  %v8749_v45 = vpop.f32.mrb[24].mxu0 }
 0x233   : > { %7613 = vst [vmem:[%s11424_s23 + $0x158] sm:$0xff] %v3062_v33  ;;  %v3222_v29 = vadd.f32 %v8749_v45, %v11369_v41  ;;  %v3216_v32 = vpop.f32.mrb[25].mxu0 }
 0x234   : > { %9218 = vmatmul.mubr.msk.f32.vlgmr.msra.gmra.mrb[116].mxu1 %vm2117_vm0, %v9914_v11  ;;  %9211 = vmatmul.mubr.msk.f32.gmra.mrb[118].mxu0 %vm2117_vm0, %v9915_v58  ;;  %7612 = vst [vmem:[%s11424_s23 + $0x150] sm:$0xff] %v3057_v25  ;;  %v8752_v37 = vpop.f32.mrb[26].mxu0 }
 0x235   : > { %9510 = vmatpush3.bf16.msra.mxu1 %v9507_v4  ;;  %9220 = vmatprep.mubr.msk.f32.mxu1 %vm2117_vm0, %v11826_v62  ;;  %7619 = vst [vmem:[%s11424_s23 + $0x188] sm:$0xff] %v3222_v29  ;;  %v3232_v8 = vadd.f32 %v8752_v37, %v11412_v7  ;;  %v3226_v31 = vpop.f32.mrb[27].mxu0 }
 0x236   : > { %9516 = vmatprep.subr.bf16.mxu1 %v9515_v23  ;;  %9227 = vmatprep.mubr.msk.f32.mxu0 %vm2117_vm0, %v11775_v12  ;;  %v3227_v51 = vadd.f32 %v3226_v31, %v11435_v24  ;;  %v8769_v17 = vpop.f32.mrb[28].mxu0 }
 0x237   : > { %7621 = vst [vmem:[%s11424_s23 + $0x198] sm:$0xff] %v3232_v8  ;;  %v3392_v39 = vadd.f32 %v8769_v17, %v11369_v41  ;;  %v3386_v50 = vpop.f32.mrb[29].mxu0 }
 0x238   : > { %9221 = vmatmul.mubr.msk.f32.gmra.mrb[118].mxu1 %vm2117_vm0, %v9915_v58  ;;  %9228 = vmatmul.mubr.msk.f32.vlgmr.msra.gmra.mrb[120].mxu0 %vm2117_vm0, %v9914_v11  ;;  %7620 = vst [vmem:[%s11424_s23 + $0x190] sm:$0xff] %v3227_v51  ;;  %v8779_v43 = vpop.f32.mrb[28].mxu1  ;;  %v3387_v63 = vadd.f32 %v3386_v50, %v11351_v28 }
 0x239   : > { %9237 = vmatprep.mubr.msk.f32.mxu1 %vm2117_vm0, %v11775_v12  ;;  %9514 = vmatpush3.bf16.msra.mxu0 %v9511_v44  ;;  %7627 = vst [vmem:[%s11424_s23 + $0x1c8] sm:$0xff] %v3392_v39  ;;  %v3477_v56 = vadd.f32 %v8779_v43, %v11369_v41  ;;  %v3471_v61 = vpop.f32.mrb[29].mxu1 }
 0x23a   : > { %9230 = vmatprep.mubr.msk.f32.mxu0 %vm2117_vm0, %v11826_v62  ;;  %7626 = vst [vmem:[%s11424_s23 + $0x1c0] sm:$0xff] %v3387_v63  ;;  %v3472_v49 = vadd.f32 %v3471_v61, %v11351_v28 }
 0x23b   : > { %7631 = vst [vmem:[%s11424_s23 + $0x1e8] sm:$0xff] %v3477_v56  ;;  %v8772_v42 = vpop.f32.mrb[30].mxu0 }
 0x23c   : > { %9238 = vmatmul.mubr.msk.f32.vlgmr.msra.gmra.mrb[120].mxu1 %vm2117_vm0, %v9914_v11  ;;  %9231 = vmatmul.mubr.msk.f32.gmra.mrb[122].mxu0 %vm2117_vm0, %v9915_v58  ;;  %7630 = vst [vmem:[%s11424_s23 + $0x1e0] sm:$0xff] %v3472_v49  ;;  %v3402_v36 = vadd.f32 %v8772_v42, %v11412_v7  ;;  %v3396_v20 = vpop.f32.mrb[31].mxu0  ;;  %v8782_v4 = vpop.f32.mrb[30].mxu1 }
 0x23d   : > { %9518 = vmatpush3.bf16.msra.mxu1 %v9515_v23  ;;  %9240 = vmatprep.mubr.msk.f32.mxu1 %vm2117_vm0, %v11826_v62  ;;  %v3397_v19 = vadd.f32 %v3396_v20, %v11435_v24  ;;  %v3487_v55 = vadd.f32 %v8782_v4, %v11412_v7  ;;  %v3481_v40 = vpop.f32.mrb[31].mxu1 }
 0x23e   : > { %9247 = vmatprep.mubr.msk.f32.mxu0 %vm2117_vm0, %v11775_v12  ;;  %7629 = vst [vmem:[%s11424_s23 + $0x1d8] sm:$0xff] %v3402_v36  ;;  %v3482_v6 = vadd.f32 %v3481_v40, %v11435_v24 }
 0x23f   : > { %7628 = vst [vmem:[%s11424_s23 + $0x1d0] sm:$0xff] %v3397_v19  ;;  %7633 = vst [vmem:[%s11424_s23 + $0x1f8] sm:$0xff] %v3487_v55  ;;  %v8789_v1 = vpop.f32.mrb[32].mxu0 }
 0x240   : > { %9241 = vmatmul.mubr.msk.f32.gmra.mrb[122].mxu1 %vm2117_vm0, %v9915_v58  ;;  %9248 = vmatmul.mubr.msk.f32.vlgmr.msra.gmra.mrb[124].mxu0 %vm2117_vm0, %v9914_v11  ;;  %7632 = vst [vmem:[%s11424_s23 + $0x1f0] sm:$0xff] %v3482_v6  ;;  %v3562_v3 = vadd.f32 %v8789_v1, %v11369_v41  ;;  %v3556_v60 = vpop.f32.mrb[33].mxu0 }
 0x241   : > { %9257 = vmatprep.mubr.msk.f32.mxu1 %vm2117_vm0, %v11775_v12  ;;  %9250 = vmatprep.mubr.msk.f32.mxu0 %vm2117_vm0, %v11826_v62  ;;  %v3217_v12 = vadd.f32 %v3216_v32, %v11351_v28  ;;  %v3557_v30 = vadd.f32 %v3556_v60, %v11351_v28 }
 0x242   : > { %7635 = vst [vmem:[%s11424_s23 + $0x208] sm:$0xff] %v3562_v3 }
 0x243   : > { %7618 = vst [vmem:[%s11424_s23 + $0x180] sm:$0xff] %v3217_v12  ;;  %7634 = vst [vmem:[%s11424_s23 + $0x200] sm:$0xff] %v3557_v30  ;;  %v8792_v48 = vpop.f32.mrb[34].mxu0 }
 0x244   : > { %9258 = vmatmul.mubr.msk.f32.vlgmr.msra.gmra.mrb[124].mxu1 %vm2117_vm0, %v9914_v11  ;;  %9251 = vmatmul.mubr.msk.f32.gmra.mrb[126].mxu0 %vm2117_vm0, %v9915_v58  ;;  %v3572_v54 = vadd.f32 %v8792_v48, %v11412_v7  ;;  %v3566_v38 = vpop.f32.mrb[35].mxu0 }
 0x245   : > { %9260 = vmatprep.mubr.msk.f32.mxu1 %vm2117_vm0, %v11826_v62  ;;  %v8799_v62 = vpop.f32.mrb[32].mxu1  ;;  %v3567_v44 = vadd.f32 %v3566_v38, %v11435_v24 }
 0x246   : > { %v3647_v13 = vadd.f32 %v8799_v62, %v11369_v41  ;;  %v3641_v46 = vpop.f32.mrb[33].mxu1  ;;  %7637 = vst [vmem:[%s11424_s23 + $0x218] sm:$0xff] %v3572_v54 }
 0x247   : > { %v3642_v21 = vadd.f32 %v3641_v46, %v11351_v28  ;;  %v8802_v11 = vpop.f32.mrb[34].mxu1  ;;  %7636 = vst [vmem:[%s11424_s23 + $0x210] sm:$0xff] %v3567_v44  ;;  %v8809_v33 = vpop.f32.mrb[36].mxu0 }
 0x248   : > { %9261 = vmatmul.mubr.msk.f32.gmra.mrb[126].mxu1 %vm2117_vm0, %v9915_v58  ;;  %7639 = vst [vmem:[%s11424_s23 + $0x228] sm:$0xff] %v3647_v13  ;;  %v3657_v59 = vadd.f32 %v8802_v11, %v11412_v7  ;;  %v3651_v22 = vpop.f32.mrb[35].mxu1  ;;  %v3732_v47 = vadd.f32 %v8809_v33, %v11369_v41  ;;  %v3726_v25 = vpop.f32.mrb[37].mxu0 }
 0x249   : > { %7638 = vst [vmem:[%s11424_s23 + $0x220] sm:$0xff] %v3642_v21  ;;  %v3652_v23 = vadd.f32 %v3651_v22, %v11435_v24  ;;  %v8819_v58 = vpop.f32.mrb[36].mxu1  ;;  %v3727_v57 = vadd.f32 %v3726_v25, %v11351_v28 }
 0x24a   : > { %7641 = vst [vmem:[%s11424_s23 + $0x238] sm:$0xff] %v3657_v59  ;;  %v3817_v52 = vadd.f32 %v8819_v58, %v11369_v41  ;;  %v3811_v27 = vpop.f32.mrb[37].mxu1  ;;  %7643 = vst [vmem:[%s11424_s23 + $0x248] sm:$0xff] %v3732_v47 }
 0x24b   : > { %7640 = vst [vmem:[%s11424_s23 + $0x230] sm:$0xff] %v3652_v23  ;;  %v3812_v34 = vadd.f32 %v3811_v27, %v11351_v28  ;;  %7642 = vst [vmem:[%s11424_s23 + $0x240] sm:$0xff] %v3727_v57 }
 0x24c   : > { %7647 = vst [vmem:[%s11424_s23 + $0x268] sm:$0xff] %v3817_v52  ;;  %v8812_v53 = vpop.f32.mrb[38].mxu0 }
 0x24d   : > { %7646 = vst [vmem:[%s11424_s23 + $0x260] sm:$0xff] %v3812_v34  ;;  %v3742_v14 = vadd.f32 %v8812_v53, %v11412_v7  ;;  %v3736_v0 = vpop.f32.mrb[39].mxu0  ;;  %v8822_v15 = vpop.f32.mrb[38].mxu1 }
 0x24e   : > { %v3737_v45 = vadd.f32 %v3736_v0, %v11435_v24  ;;  %v3827_v35 = vadd.f32 %v8822_v15, %v11412_v7  ;;  %v3821_v29 = vpop.f32.mrb[39].mxu1 }
 0x24f   : > { %7645 = vst [vmem:[%s11424_s23 + $0x258] sm:$0xff] %v3742_v14  ;;  %v3822_v10 = vadd.f32 %v3821_v29, %v11435_v24 }
 0x250   : > { %7644 = vst [vmem:[%s11424_s23 + $0x250] sm:$0xff] %v3737_v45  ;;  %7649 = vst [vmem:[%s11424_s23 + $0x278] sm:$0xff] %v3827_v35  ;;  %v8829_v32 = vpop.f32.mrb[40].mxu0 }
 0x251   : > { %7648 = vst [vmem:[%s11424_s23 + $0x270] sm:$0xff] %v3822_v10  ;;  %v3902_v2 = vadd.f32 %v8829_v32, %v11369_v41  ;;  %v3896_v12 = vpop.f32.mrb[41].mxu0 }
 0x252   : > { %v3897_v16 = vadd.f32 %v3896_v12, %v11351_v28 }
 0x253   : > { %7651 = vst [vmem:[%s11424_s23 + $0x288] sm:$0xff] %v3902_v2  ;;  %v8839_v37 = vpop.f32.mrb[40].mxu1 }
 0x254   : > { %v3987_v9 = vadd.f32 %v8839_v37, %v11369_v41  ;;  %7650 = vst [vmem:[%s11424_s23 + $0x280] sm:$0xff] %v3897_v16  ;;  %v3981_v8 = vpop.f32.mrb[41].mxu1  ;;  %v8832_v31 = vpop.f32.mrb[42].mxu0 }
 0x255   : > { %v3982_v18 = vadd.f32 %v3981_v8, %v11351_v28  ;;  %v3912_v26 = vadd.f32 %v8832_v31, %v11412_v7  ;;  %v3906_v51 = vpop.f32.mrb[43].mxu0 }
 0x256   : > { %7655 = vst [vmem:[%s11424_s23 + $0x2a8] sm:$0xff] %v3987_v9  ;;  %v3907_v5 = vadd.f32 %v3906_v51, %v11435_v24 }
 0x257   : > { %7654 = vst [vmem:[%s11424_s23 + $0x2a0] sm:$0xff] %v3982_v18  ;;  %7653 = vst [vmem:[%s11424_s23 + $0x298] sm:$0xff] %v3912_v26  ;;  %v8842_v17 = vpop.f32.mrb[42].mxu1 }
 0x258   : > { %7652 = vst [vmem:[%s11424_s23 + $0x290] sm:$0xff] %v3907_v5  ;;  %v3997_v39 = vadd.f32 %v8842_v17, %v11412_v7  ;;  %v3991_v50 = vpop.f32.mrb[43].mxu1  ;;  %v8849_v43 = vpop.f32.mrb[44].mxu0 }
 0x259   : > { %v3992_v63 = vadd.f32 %v3991_v50, %v11435_v24  ;;  %v4072_v56 = vadd.f32 %v8849_v43, %v11369_v41  ;;  %v4066_v61 = vpop.f32.mrb[45].mxu0 }
 0x25a   : > { %7657 = vst [vmem:[%s11424_s23 + $0x2b8] sm:$0xff] %v3997_v39  ;;  %v4067_v49 = vadd.f32 %v4066_v61, %v11351_v28 }
 0x25b   : > { %7656 = vst [vmem:[%s11424_s23 + $0x2b0] sm:$0xff] %v3992_v63  ;;  %7659 = vst [vmem:[%s11424_s23 + $0x2c8] sm:$0xff] %v4072_v56  ;;  %v8859_v42 = vpop.f32.mrb[44].mxu1 }
 0x25c   : > { %v4157_v36 = vadd.f32 %v8859_v42, %v11369_v41  ;;  %7658 = vst [vmem:[%s11424_s23 + $0x2c0] sm:$0xff] %v4067_v49  ;;  %v4151_v20 = vpop.f32.mrb[45].mxu1  ;;  %v8852_v4 = vpop.f32.mrb[46].mxu0 }
 0x25d   : > { %v4152_v19 = vadd.f32 %v4151_v20, %v11351_v28  ;;  %v4082_v55 = vadd.f32 %v8852_v4, %v11412_v7  ;;  %v4076_v40 = vpop.f32.mrb[47].mxu0 }
 0x25e   : > { %7663 = vst [vmem:[%s11424_s23 + $0x2e8] sm:$0xff] %v4157_v36  ;;  %v4077_v6 = vadd.f32 %v4076_v40, %v11435_v24 }
 0x25f   : > { %7662 = vst [vmem:[%s11424_s23 + $0x2e0] sm:$0xff] %v4152_v19  ;;  %7661 = vst [vmem:[%s11424_s23 + $0x2d8] sm:$0xff] %v4082_v55  ;;  %v8862_v1 = vpop.f32.mrb[46].mxu1 }
 0x260   : > { %7660 = vst [vmem:[%s11424_s23 + $0x2d0] sm:$0xff] %v4077_v6  ;;  %v4167_v3 = vadd.f32 %v8862_v1, %v11412_v7  ;;  %v4161_v62 = vpop.f32.mrb[47].mxu1  ;;  %v8869_v60 = vpop.f32.mrb[48].mxu0 }
 0x261   : > { %v4162_v13 = vadd.f32 %v4161_v62, %v11435_v24  ;;  %v4242_v30 = vadd.f32 %v8869_v60, %v11369_v41  ;;  %v4236_v46 = vpop.f32.mrb[49].mxu0 }
 0x262   : > { %7665 = vst [vmem:[%s11424_s23 + $0x2f8] sm:$0xff] %v4167_v3  ;;  %v4237_v21 = vadd.f32 %v4236_v46, %v11351_v28 }
 0x263   : > { %7664 = vst [vmem:[%s11424_s23 + $0x2f0] sm:$0xff] %v4162_v13  ;;  %7667 = vst [vmem:[%s11424_s23 + $0x308] sm:$0xff] %v4242_v30  ;;  %v8879_v48 = vpop.f32.mrb[48].mxu1 }
 0x264   : > { %v4327_v54 = vadd.f32 %v8879_v48, %v11369_v41  ;;  %7666 = vst [vmem:[%s11424_s23 + $0x300] sm:$0xff] %v4237_v21  ;;  %v4321_v38 = vpop.f32.mrb[49].mxu1  ;;  %v8872_v11 = vpop.f32.mrb[50].mxu0 }
 0x265   : > { %v4322_v44 = vadd.f32 %v4321_v38, %v11351_v28  ;;  %v4252_v59 = vadd.f32 %v8872_v11, %v11412_v7  ;;  %v4246_v22 = vpop.f32.mrb[51].mxu0 }
 0x266   : > { %7671 = vst [vmem:[%s11424_s23 + $0x328] sm:$0xff] %v4327_v54  ;;  %v4247_v23 = vadd.f32 %v4246_v22, %v11435_v24 }
 0x267   : > { %7670 = vst [vmem:[%s11424_s23 + $0x320] sm:$0xff] %v4322_v44  ;;  %7669 = vst [vmem:[%s11424_s23 + $0x318] sm:$0xff] %v4252_v59  ;;  %v8882_v33 = vpop.f32.mrb[50].mxu1 }
 0x268   : > { %7668 = vst [vmem:[%s11424_s23 + $0x310] sm:$0xff] %v4247_v23  ;;  %v4337_v47 = vadd.f32 %v8882_v33, %v11412_v7  ;;  %v4331_v58 = vpop.f32.mrb[51].mxu1  ;;  %v8889_v25 = vpop.f32.mrb[52].mxu0 }
 0x269   : > { %v4332_v52 = vadd.f32 %v4331_v58, %v11435_v24  ;;  %v4412_v57 = vadd.f32 %v8889_v25, %v11369_v41  ;;  %v4406_v27 = vpop.f32.mrb[53].mxu0 }
 0x26a   : > { %7673 = vst [vmem:[%s11424_s23 + $0x338] sm:$0xff] %v4337_v47  ;;  %v4407_v34 = vadd.f32 %v4406_v27, %v11351_v28 }
 0x26b   : > { %7672 = vst [vmem:[%s11424_s23 + $0x330] sm:$0xff] %v4332_v52  ;;  %7675 = vst [vmem:[%s11424_s23 + $0x348] sm:$0xff] %v4412_v57  ;;  %v8899_v53 = vpop.f32.mrb[52].mxu1 }
 0x26c   : > { %v4497_v14 = vadd.f32 %v8899_v53, %v11369_v41  ;;  %7674 = vst [vmem:[%s11424_s23 + $0x340] sm:$0xff] %v4407_v34  ;;  %v4491_v0 = vpop.f32.mrb[53].mxu1  ;;  %v8892_v15 = vpop.f32.mrb[54].mxu0 }
 0x26d   : > { %v4492_v45 = vadd.f32 %v4491_v0, %v11351_v28  ;;  %v4422_v35 = vadd.f32 %v8892_v15, %v11412_v7  ;;  %v4416_v29 = vpop.f32.mrb[55].mxu0 }
 0x26e   : > { %7679 = vst [vmem:[%s11424_s23 + $0x368] sm:$0xff] %v4497_v14  ;;  %v4417_v10 = vadd.f32 %v4416_v29, %v11435_v24 }
 0x26f   : > { %7678 = vst [vmem:[%s11424_s23 + $0x360] sm:$0xff] %v4492_v45  ;;  %7677 = vst [vmem:[%s11424_s23 + $0x358] sm:$0xff] %v4422_v35  ;;  %v8902_v32 = vpop.f32.mrb[54].mxu1 }
 0x270   : > { %7676 = vst [vmem:[%s11424_s23 + $0x350] sm:$0xff] %v4417_v10  ;;  %v4507_v2 = vadd.f32 %v8902_v32, %v11412_v7  ;;  %v4501_v12 = vpop.f32.mrb[55].mxu1  ;;  %v8909_v16 = vpop.f32.mrb[56].mxu0 }
 0x271   : > { %v4502_v37 = vadd.f32 %v4501_v12, %v11435_v24  ;;  %v4582_v9 = vadd.f32 %v8909_v16, %v11369_v41  ;;  %v4576_v8 = vpop.f32.mrb[57].mxu0 }
 0x272   : > { %7681 = vst [vmem:[%s11424_s23 + $0x378] sm:$0xff] %v4507_v2  ;;  %v4577_v31 = vadd.f32 %v4576_v8, %v11351_v28 }
 0x273   : > { %7680 = vst [vmem:[%s11424_s23 + $0x370] sm:$0xff] %v4502_v37  ;;  %7683 = vst [vmem:[%s11424_s23 + $0x388] sm:$0xff] %v4582_v9  ;;  %v8919_v18 = vpop.f32.mrb[56].mxu1 }
 0x274   : > { %v4667_v26 = vadd.f32 %v8919_v18, %v11369_v41  ;;  %7682 = vst [vmem:[%s11424_s23 + $0x380] sm:$0xff] %v4577_v31  ;;  %v4661_v51 = vpop.f32.mrb[57].mxu1  ;;  %v8912_v5 = vpop.f32.mrb[58].mxu0 }
 0x275   : > { %v4662_v17 = vadd.f32 %v4661_v51, %v11351_v28  ;;  %v4592_v39 = vadd.f32 %v8912_v5, %v11412_v7  ;;  %v4586_v50 = vpop.f32.mrb[59].mxu0 }
 0x276   : > { %7687 = vst [vmem:[%s11424_s23 + $0x3a8] sm:$0xff] %v4667_v26  ;;  %v4587_v43 = vadd.f32 %v4586_v50, %v11435_v24 }
 0x277   : > { %7686 = vst [vmem:[%s11424_s23 + $0x3a0] sm:$0xff] %v4662_v17  ;;  %7685 = vst [vmem:[%s11424_s23 + $0x398] sm:$0xff] %v4592_v39  ;;  %v8922_v63 = vpop.f32.mrb[58].mxu1 }
 0x278   : > { %7684 = vst [vmem:[%s11424_s23 + $0x390] sm:$0xff] %v4587_v43  ;;  %v4677_v56 = vadd.f32 %v8922_v63, %v11412_v7  ;;  %v4671_v61 = vpop.f32.mrb[59].mxu1  ;;  %v8929_v49 = vpop.f32.mrb[60].mxu0 }
 0x279   : > { %v4672_v42 = vadd.f32 %v4671_v61, %v11435_v24  ;;  %v4752_v36 = vadd.f32 %v8929_v49, %v11369_v41  ;;  %v4746_v20 = vpop.f32.mrb[61].mxu0 }
 0x27a   : > { %7689 = vst [vmem:[%s11424_s23 + $0x3b8] sm:$0xff] %v4677_v56  ;;  %v4747_v4 = vadd.f32 %v4746_v20, %v11351_v28 }
 0x27b   : > { %7688 = vst [vmem:[%s11424_s23 + $0x3b0] sm:$0xff] %v4672_v42  ;;  %7691 = vst [vmem:[%s11424_s23 + $0x3c8] sm:$0xff] %v4752_v36  ;;  %v8939_v19 = vpop.f32.mrb[60].mxu1 }
 0x27c   : > { %v4837_v55 = vadd.f32 %v8939_v19, %v11369_v41  ;;  %7690 = vst [vmem:[%s11424_s23 + $0x3c0] sm:$0xff] %v4747_v4  ;;  %v4831_v40 = vpop.f32.mrb[61].mxu1  ;;  %v8932_v6 = vpop.f32.mrb[62].mxu0 }
 0x27d   : > { %v4832_v1 = vadd.f32 %v4831_v40, %v11351_v28  ;;  %v4762_v3 = vadd.f32 %v8932_v6, %v11412_v7  ;;  %v4756_v62 = vpop.f32.mrb[63].mxu0 }
 0x27e   : > { %7695 = vst [vmem:[%s11424_s23 + $0x3e8] sm:$0xff] %v4837_v55  ;;  %v4757_v60 = vadd.f32 %v4756_v62, %v11435_v24 }
 0x27f   : > { %7694 = vst [vmem:[%s11424_s23 + $0x3e0] sm:$0xff] %v4832_v1  ;;  %7693 = vst [vmem:[%s11424_s23 + $0x3d8] sm:$0xff] %v4762_v3  ;;  %v8942_v13 = vpop.f32.mrb[62].mxu1 }
 0x280   : > { %7692 = vst [vmem:[%s11424_s23 + $0x3d0] sm:$0xff] %v4757_v60  ;;  %v4847_v30 = vadd.f32 %v8942_v13, %v11412_v7  ;;  %v4841_v46 = vpop.f32.mrb[63].mxu1  ;;  %v8949_v21 = vpop.f32.mrb[64].mxu0 }
 0x281   : > { %v4842_v48 = vadd.f32 %v4841_v46, %v11435_v24  ;;  %v4922_v54 = vadd.f32 %v8949_v21, %v11369_v41  ;;  %v4916_v38 = vpop.f32.mrb[65].mxu0 }
 0x282   : > { %7697 = vst [vmem:[%s11424_s23 + $0x3f8] sm:$0xff] %v4847_v30  ;;  %v4917_v11 = vadd.f32 %v4916_v38, %v11351_v28 }
 0x283   : > { %7696 = vst [vmem:[%s11424_s23 + $0x3f0] sm:$0xff] %v4842_v48  ;;  %7699 = vst [vmem:[%s11424_s23 + $0x408] sm:$0xff] %v4922_v54  ;;  %v8959_v44 = vpop.f32.mrb[64].mxu1 }
 0x284   : > { %v5007_v59 = vadd.f32 %v8959_v44, %v11369_v41  ;;  %7698 = vst [vmem:[%s11424_s23 + $0x400] sm:$0xff] %v4917_v11  ;;  %v5001_v22 = vpop.f32.mrb[65].mxu1  ;;  %v8952_v23 = vpop.f32.mrb[66].mxu0 }
 0x285   : > { %v5002_v33 = vadd.f32 %v5001_v22, %v11351_v28  ;;  %v4932_v47 = vadd.f32 %v8952_v23, %v11412_v7  ;;  %v4926_v58 = vpop.f32.mrb[67].mxu0 }
 0x286   : > { %7703 = vst [vmem:[%s11424_s23 + $0x428] sm:$0xff] %v5007_v59  ;;  %v4927_v25 = vadd.f32 %v4926_v58, %v11435_v24 }
 0x287   : > { %7702 = vst [vmem:[%s11424_s23 + $0x420] sm:$0xff] %v5002_v33  ;;  %7701 = vst [vmem:[%s11424_s23 + $0x418] sm:$0xff] %v4932_v47  ;;  %v8962_v52 = vpop.f32.mrb[66].mxu1 }
 0x288   : > { %7700 = vst [vmem:[%s11424_s23 + $0x410] sm:$0xff] %v4927_v25  ;;  %v5017_v57 = vadd.f32 %v8962_v52, %v11412_v7  ;;  %v5011_v27 = vpop.f32.mrb[67].mxu1  ;;  %v8969_v34 = vpop.f32.mrb[68].mxu0 }
 0x289   : > { %v5012_v53 = vadd.f32 %v5011_v27, %v11435_v24  ;;  %v5092_v14 = vadd.f32 %v8969_v34, %v11369_v41  ;;  %v5086_v0 = vpop.f32.mrb[69].mxu0 }
 0x28a   : > { %7705 = vst [vmem:[%s11424_s23 + $0x438] sm:$0xff] %v5017_v57  ;;  %v5087_v15 = vadd.f32 %v5086_v0, %v11351_v28 }
 0x28b   : > { %7704 = vst [vmem:[%s11424_s23 + $0x430] sm:$0xff] %v5012_v53  ;;  %7707 = vst [vmem:[%s11424_s23 + $0x448] sm:$0xff] %v5092_v14  ;;  %v8979_v45 = vpop.f32.mrb[68].mxu1 }
 0x28c   : > { %v5177_v35 = vadd.f32 %v8979_v45, %v11369_v41  ;;  %7706 = vst [vmem:[%s11424_s23 + $0x440] sm:$0xff] %v5087_v15  ;;  %v5171_v29 = vpop.f32.mrb[69].mxu1  ;;  %v8972_v10 = vpop.f32.mrb[70].mxu0 }
 0x28d   : > { %v5172_v32 = vadd.f32 %v5171_v29, %v11351_v28  ;;  %v5102_v2 = vadd.f32 %v8972_v10, %v11412_v7  ;;  %v5096_v12 = vpop.f32.mrb[71].mxu0 }
 0x28e   : > { %7711 = vst [vmem:[%s11424_s23 + $0x468] sm:$0xff] %v5177_v35  ;;  %v5097_v16 = vadd.f32 %v5096_v12, %v11435_v24 }
 0x28f   : > { %7710 = vst [vmem:[%s11424_s23 + $0x460] sm:$0xff] %v5172_v32  ;;  %7709 = vst [vmem:[%s11424_s23 + $0x458] sm:$0xff] %v5102_v2  ;;  %v8982_v37 = vpop.f32.mrb[70].mxu1 }
 0x290   : > { %7708 = vst [vmem:[%s11424_s23 + $0x450] sm:$0xff] %v5097_v16  ;;  %v5187_v9 = vadd.f32 %v8982_v37, %v11412_v7  ;;  %v5181_v8 = vpop.f32.mrb[71].mxu1  ;;  %v8989_v31 = vpop.f32.mrb[72].mxu0 }
 0x291   : > { %v5182_v18 = vadd.f32 %v5181_v8, %v11435_v24  ;;  %v5262_v26 = vadd.f32 %v8989_v31, %v11369_v41  ;;  %v5256_v51 = vpop.f32.mrb[73].mxu0 }
 0x292   : > { %7713 = vst [vmem:[%s11424_s23 + $0x478] sm:$0xff] %v5187_v9  ;;  %v5257_v5 = vadd.f32 %v5256_v51, %v11351_v28 }
 0x293   : > { %7712 = vst [vmem:[%s11424_s23 + $0x470] sm:$0xff] %v5182_v18  ;;  %7715 = vst [vmem:[%s11424_s23 + $0x488] sm:$0xff] %v5262_v26  ;;  %v8999_v17 = vpop.f32.mrb[72].mxu1 }
 0x294   : > { %v5347_v39 = vadd.f32 %v8999_v17, %v11369_v41  ;;  %7714 = vst [vmem:[%s11424_s23 + $0x480] sm:$0xff] %v5257_v5  ;;  %v5341_v50 = vpop.f32.mrb[73].mxu1  ;;  %v8992_v43 = vpop.f32.mrb[74].mxu0 }
 0x295   : > { %v5342_v63 = vadd.f32 %v5341_v50, %v11351_v28  ;;  %v5272_v56 = vadd.f32 %v8992_v43, %v11412_v7  ;;  %v5266_v61 = vpop.f32.mrb[75].mxu0 }
 0x296   : > { %7719 = vst [vmem:[%s11424_s23 + $0x4a8] sm:$0xff] %v5347_v39  ;;  %v5267_v49 = vadd.f32 %v5266_v61, %v11435_v24 }
 0x297   : > { %7718 = vst [vmem:[%s11424_s23 + $0x4a0] sm:$0xff] %v5342_v63  ;;  %7717 = vst [vmem:[%s11424_s23 + $0x498] sm:$0xff] %v5272_v56  ;;  %v9002_v42 = vpop.f32.mrb[74].mxu1 }
 0x298   : > { %7716 = vst [vmem:[%s11424_s23 + $0x490] sm:$0xff] %v5267_v49  ;;  %v5357_v36 = vadd.f32 %v9002_v42, %v11412_v7  ;;  %v5351_v20 = vpop.f32.mrb[75].mxu1  ;;  %v9009_v4 = vpop.f32.mrb[76].mxu0 }
 0x299   : > { %v5352_v19 = vadd.f32 %v5351_v20, %v11435_v24  ;;  %v5432_v55 = vadd.f32 %v9009_v4, %v11369_v41  ;;  %v5426_v40 = vpop.f32.mrb[77].mxu0 }
 0x29a   : > { %7721 = vst [vmem:[%s11424_s23 + $0x4b8] sm:$0xff] %v5357_v36  ;;  %v5427_v6 = vadd.f32 %v5426_v40, %v11351_v28 }
 0x29b   : > { %7720 = vst [vmem:[%s11424_s23 + $0x4b0] sm:$0xff] %v5352_v19  ;;  %7723 = vst [vmem:[%s11424_s23 + $0x4c8] sm:$0xff] %v5432_v55  ;;  %v9019_v1 = vpop.f32.mrb[76].mxu1 }
 0x29c   : > { %v5517_v3 = vadd.f32 %v9019_v1, %v11369_v41  ;;  %7722 = vst [vmem:[%s11424_s23 + $0x4c0] sm:$0xff] %v5427_v6  ;;  %v5511_v62 = vpop.f32.mrb[77].mxu1  ;;  %v9012_v60 = vpop.f32.mrb[78].mxu0 }
 0x29d   : > { %v5512_v13 = vadd.f32 %v5511_v62, %v11351_v28  ;;  %v5442_v30 = vadd.f32 %v9012_v60, %v11412_v7  ;;  %v5436_v46 = vpop.f32.mrb[79].mxu0 }
 0x29e   : > { %7727 = vst [vmem:[%s11424_s23 + $0x4e8] sm:$0xff] %v5517_v3  ;;  %v5437_v21 = vadd.f32 %v5436_v46, %v11435_v24 }
 0x29f   : > { %7726 = vst [vmem:[%s11424_s23 + $0x4e0] sm:$0xff] %v5512_v13  ;;  %7725 = vst [vmem:[%s11424_s23 + $0x4d8] sm:$0xff] %v5442_v30  ;;  %v9022_v48 = vpop.f32.mrb[78].mxu1 }
 0x2a0   : > { %7724 = vst [vmem:[%s11424_s23 + $0x4d0] sm:$0xff] %v5437_v21  ;;  %v5527_v54 = vadd.f32 %v9022_v48, %v11412_v7  ;;  %v5521_v38 = vpop.f32.mrb[79].mxu1  ;;  %v9029_v11 = vpop.f32.mrb[80].mxu0 }
 0x2a1   : > { %v5522_v44 = vadd.f32 %v5521_v38, %v11435_v24  ;;  %v5602_v59 = vadd.f32 %v9029_v11, %v11369_v41  ;;  %v5596_v22 = vpop.f32.mrb[81].mxu0 }
 0x2a2   : > { %7729 = vst [vmem:[%s11424_s23 + $0x4f8] sm:$0xff] %v5527_v54  ;;  %v5597_v23 = vadd.f32 %v5596_v22, %v11351_v28 }
 0x2a3   : > { %7728 = vst [vmem:[%s11424_s23 + $0x4f0] sm:$0xff] %v5522_v44  ;;  %7731 = vst [vmem:[%s11424_s23 + $0x508] sm:$0xff] %v5602_v59  ;;  %v9039_v33 = vpop.f32.mrb[80].mxu1 }
 0x2a4   : > { %v5687_v47 = vadd.f32 %v9039_v33, %v11369_v41  ;;  %7730 = vst [vmem:[%s11424_s23 + $0x500] sm:$0xff] %v5597_v23  ;;  %v5681_v58 = vpop.f32.mrb[81].mxu1  ;;  %v9032_v25 = vpop.f32.mrb[82].mxu0 }
 0x2a5   : > { %v5682_v52 = vadd.f32 %v5681_v58, %v11351_v28  ;;  %v5612_v57 = vadd.f32 %v9032_v25, %v11412_v7  ;;  %v5606_v27 = vpop.f32.mrb[83].mxu0 }
 0x2a6   : > { %7735 = vst [vmem:[%s11424_s23 + $0x528] sm:$0xff] %v5687_v47  ;;  %v5607_v34 = vadd.f32 %v5606_v27, %v11435_v24 }
 0x2a7   : > { %7734 = vst [vmem:[%s11424_s23 + $0x520] sm:$0xff] %v5682_v52  ;;  %7733 = vst [vmem:[%s11424_s23 + $0x518] sm:$0xff] %v5612_v57  ;;  %v9042_v53 = vpop.f32.mrb[82].mxu1 }
 0x2a8   : > { %7732 = vst [vmem:[%s11424_s23 + $0x510] sm:$0xff] %v5607_v34  ;;  %v5697_v14 = vadd.f32 %v9042_v53, %v11412_v7  ;;  %v5691_v0 = vpop.f32.mrb[83].mxu1  ;;  %v9049_v15 = vpop.f32.mrb[84].mxu0 }
 0x2a9   : > { %v5692_v45 = vadd.f32 %v5691_v0, %v11435_v24  ;;  %v5772_v35 = vadd.f32 %v9049_v15, %v11369_v41  ;;  %v5766_v29 = vpop.f32.mrb[85].mxu0 }
 0x2aa   : > { %7737 = vst [vmem:[%s11424_s23 + $0x538] sm:$0xff] %v5697_v14  ;;  %v5767_v10 = vadd.f32 %v5766_v29, %v11351_v28 }
 0x2ab   : > { %7736 = vst [vmem:[%s11424_s23 + $0x530] sm:$0xff] %v5692_v45  ;;  %7739 = vst [vmem:[%s11424_s23 + $0x548] sm:$0xff] %v5772_v35  ;;  %v9059_v32 = vpop.f32.mrb[84].mxu1 }
 0x2ac   : > { %v5857_v2 = vadd.f32 %v9059_v32, %v11369_v41  ;;  %7738 = vst [vmem:[%s11424_s23 + $0x540] sm:$0xff] %v5767_v10  ;;  %v5851_v12 = vpop.f32.mrb[85].mxu1  ;;  %v9052_v16 = vpop.f32.mrb[86].mxu0 }
 0x2ad   : > { %v5852_v37 = vadd.f32 %v5851_v12, %v11351_v28  ;;  %v5782_v9 = vadd.f32 %v9052_v16, %v11412_v7  ;;  %v5776_v8 = vpop.f32.mrb[87].mxu0 }
 0x2ae   : > { %7743 = vst [vmem:[%s11424_s23 + $0x568] sm:$0xff] %v5857_v2  ;;  %v5777_v31 = vadd.f32 %v5776_v8, %v11435_v24 }
 0x2af   : > { %7742 = vst [vmem:[%s11424_s23 + $0x560] sm:$0xff] %v5852_v37  ;;  %7741 = vst [vmem:[%s11424_s23 + $0x558] sm:$0xff] %v5782_v9  ;;  %v9062_v18 = vpop.f32.mrb[86].mxu1 }
 0x2b0   : > { %7740 = vst [vmem:[%s11424_s23 + $0x550] sm:$0xff] %v5777_v31  ;;  %v5867_v26 = vadd.f32 %v9062_v18, %v11412_v7  ;;  %v5861_v51 = vpop.f32.mrb[87].mxu1 }
 0x2b1   : > { %v5862_v17 = vadd.f32 %v5861_v51, %v11435_v24 }
 0x2b2   : > { %7745 = vst [vmem:[%s11424_s23 + $0x578] sm:$0xff] %v5867_v26 }
 0x2b3   : > { %7744 = vst [vmem:[%s11424_s23 + $0x570] sm:$0xff] %v5862_v17 }
 0x2c5   : > { %v9069_v5 = vpop.f32.mrb[88].mxu0 }
 0x2c6   : > { %v5942_v39 = vadd.f32 %v9069_v5, %v11369_v41  ;;  %v5936_v50 = vpop.f32.mrb[89].mxu0 }
 0x2c7   : > { %v5937_v43 = vadd.f32 %v5936_v50, %v11351_v28 }
 0x2c8   : > { %7747 = vst [vmem:[%s11424_s23 + $0x588] sm:$0xff] %v5942_v39 }
 0x2c9   : > { %v9079_v63 = vpop.f32.mrb[88].mxu1  ;;  %7746 = vst [vmem:[%s11424_s23 + $0x580] sm:$0xff] %v5937_v43 }
 0x2ca   : > { %v6027_v56 = vadd.f32 %v9079_v63, %v11369_v41  ;;  %v6021_v61 = vpop.f32.mrb[89].mxu1  ;;  %v9072_v49 = vpop.f32.mrb[90].mxu0 }
 0x2cb   : > { %v6022_v42 = vadd.f32 %v6021_v61, %v11351_v28  ;;  %v5952_v36 = vadd.f32 %v9072_v49, %v11412_v7  ;;  %v5946_v20 = vpop.f32.mrb[91].mxu0 }
 0x2cc   : > { %7751 = vst [vmem:[%s11424_s23 + $0x5a8] sm:$0xff] %v6027_v56  ;;  %v5947_v4 = vadd.f32 %v5946_v20, %v11435_v24 }
 0x2cd   : > { %7750 = vst [vmem:[%s11424_s23 + $0x5a0] sm:$0xff] %v6022_v42  ;;  %7749 = vst [vmem:[%s11424_s23 + $0x598] sm:$0xff] %v5952_v36 }
 0x2ce   : > { %7748 = vst [vmem:[%s11424_s23 + $0x590] sm:$0xff] %v5947_v4 }
 0x2d1   : > { %v9082_v19 = vpop.f32.mrb[90].mxu1  ;;  %v9089_v6 = vpop.f32.mrb[92].mxu0 }
 0x2d2   : > { %v6037_v55 = vadd.f32 %v9082_v19, %v11412_v7  ;;  %v6031_v40 = vpop.f32.mrb[91].mxu1  ;;  %v6112_v3 = vadd.f32 %v9089_v6, %v11369_v41  ;;  %v6106_v62 = vpop.f32.mrb[93].mxu0 }
 0x2d3   : > { %v6032_v1 = vadd.f32 %v6031_v40, %v11435_v24  ;;  %v6107_v60 = vadd.f32 %v6106_v62, %v11351_v28 }
 0x2d4   : > { %7753 = vst [vmem:[%s11424_s23 + $0x5b8] sm:$0xff] %v6037_v55  ;;  %7755 = vst [vmem:[%s11424_s23 + $0x5c8] sm:$0xff] %v6112_v3 }
 0x2d5   : > { %7752 = vst [vmem:[%s11424_s23 + $0x5b0] sm:$0xff] %v6032_v1  ;;  %v9099_v13 = vpop.f32.mrb[92].mxu1  ;;  %7754 = vst [vmem:[%s11424_s23 + $0x5c0] sm:$0xff] %v6107_v60 }
 0x2d6   : > { %v6197_v30 = vadd.f32 %v9099_v13, %v11369_v41  ;;  %v6191_v46 = vpop.f32.mrb[93].mxu1 }
 0x2d7   : > { %v9092_v21 = vpop.f32.mrb[94].mxu0  ;;  %v6192_v48 = vadd.f32 %v6191_v46, %v11351_v28 }
 0x2d8   : > { %v6122_v54 = vadd.f32 %v9092_v21, %v11412_v7  ;;  %v6116_v38 = vpop.f32.mrb[95].mxu0  ;;  %7759 = vst [vmem:[%s11424_s23 + $0x5e8] sm:$0xff] %v6197_v30 }
 0x2d9   : > { %v6117_v11 = vadd.f32 %v6116_v38, %v11435_v24  ;;  %7758 = vst [vmem:[%s11424_s23 + $0x5e0] sm:$0xff] %v6192_v48 }
 0x2da   : > { %7757 = vst [vmem:[%s11424_s23 + $0x5d8] sm:$0xff] %v6122_v54 }
 0x2db   : > { %v9102_v44 = vpop.f32.mrb[94].mxu1  ;;  %7756 = vst [vmem:[%s11424_s23 + $0x5d0] sm:$0xff] %v6117_v11  ;;  %v9109_v23 = vpop.f32.mrb[96].mxu0 }
 0x2dc   : > { %v6207_v59 = vadd.f32 %v9102_v44, %v11412_v7  ;;  %v6201_v22 = vpop.f32.mrb[95].mxu1  ;;  %v6282_v47 = vadd.f32 %v9109_v23, %v11369_v41  ;;  %v6276_v58 = vpop.f32.mrb[97].mxu0 }
 0x2dd   : > { %v6202_v33 = vadd.f32 %v6201_v22, %v11435_v24  ;;  %v6277_v25 = vadd.f32 %v6276_v58, %v11351_v28 }
 0x2de   : > { %7761 = vst [vmem:[%s11424_s23 + $0x5f8] sm:$0xff] %v6207_v59  ;;  %7763 = vst [vmem:[%s11424_s23 + $0x608] sm:$0xff] %v6282_v47 }
 0x2df   : > { %7760 = vst [vmem:[%s11424_s23 + $0x5f0] sm:$0xff] %v6202_v33  ;;  %v9119_v52 = vpop.f32.mrb[96].mxu1  ;;  %7762 = vst [vmem:[%s11424_s23 + $0x600] sm:$0xff] %v6277_v25  ;;  %v9112_v34 = vpop.f32.mrb[98].mxu0 }
 0x2e0   : > { %v6367_v57 = vadd.f32 %v9119_v52, %v11369_v41  ;;  %v6361_v27 = vpop.f32.mrb[97].mxu1  ;;  %v6292_v14 = vadd.f32 %v9112_v34, %v11412_v7  ;;  %v6286_v0 = vpop.f32.mrb[99].mxu0 }
 0x2e1   : > { %v6362_v53 = vadd.f32 %v6361_v27, %v11351_v28  ;;  %v6287_v15 = vadd.f32 %v6286_v0, %v11435_v24 }
 0x2e2   : > { %7767 = vst [vmem:[%s11424_s23 + $0x628] sm:$0xff] %v6367_v57  ;;  %7765 = vst [vmem:[%s11424_s23 + $0x618] sm:$0xff] %v6292_v14 }
 0x2e3   : > { %7766 = vst [vmem:[%s11424_s23 + $0x620] sm:$0xff] %v6362_v53  ;;  %v9122_v45 = vpop.f32.mrb[98].mxu1  ;;  %7764 = vst [vmem:[%s11424_s23 + $0x610] sm:$0xff] %v6287_v15  ;;  %v9129_v10 = vpop.f32.mrb[100].mxu0 }
 0x2e4   : > { %v6377_v35 = vadd.f32 %v9122_v45, %v11412_v7  ;;  %v6371_v29 = vpop.f32.mrb[99].mxu1  ;;  %v6452_v2 = vadd.f32 %v9129_v10, %v11369_v41  ;;  %v6446_v12 = vpop.f32.mrb[101].mxu0 }
 0x2e5   : > { %v6372_v32 = vadd.f32 %v6371_v29, %v11435_v24  ;;  %v6447_v16 = vadd.f32 %v6446_v12, %v11351_v28 }
 0x2e6   : > { %7769 = vst [vmem:[%s11424_s23 + $0x638] sm:$0xff] %v6377_v35  ;;  %7771 = vst [vmem:[%s11424_s23 + $0x648] sm:$0xff] %v6452_v2 }
 0x2e7   : > { %7768 = vst [vmem:[%s11424_s23 + $0x630] sm:$0xff] %v6372_v32  ;;  %v9139_v37 = vpop.f32.mrb[100].mxu1  ;;  %7770 = vst [vmem:[%s11424_s23 + $0x640] sm:$0xff] %v6447_v16  ;;  %v9132_v31 = vpop.f32.mrb[102].mxu0 }
 0x2e8   : > { %v6537_v9 = vadd.f32 %v9139_v37, %v11369_v41  ;;  %v6531_v8 = vpop.f32.mrb[101].mxu1  ;;  %v6462_v26 = vadd.f32 %v9132_v31, %v11412_v7  ;;  %v6456_v51 = vpop.f32.mrb[103].mxu0 }
 0x2e9   : > { %v6532_v18 = vadd.f32 %v6531_v8, %v11351_v28  ;;  %v6457_v5 = vadd.f32 %v6456_v51, %v11435_v24 }
 0x2ea   : > { %7775 = vst [vmem:[%s11424_s23 + $0x668] sm:$0xff] %v6537_v9  ;;  %7773 = vst [vmem:[%s11424_s23 + $0x658] sm:$0xff] %v6462_v26 }
 0x2eb   : > { %7774 = vst [vmem:[%s11424_s23 + $0x660] sm:$0xff] %v6532_v18  ;;  %v9142_v17 = vpop.f32.mrb[102].mxu1  ;;  %7772 = vst [vmem:[%s11424_s23 + $0x650] sm:$0xff] %v6457_v5  ;;  %v9149_v43 = vpop.f32.mrb[104].mxu0 }
 0x2ec   : > { %v6547_v39 = vadd.f32 %v9142_v17, %v11412_v7  ;;  %v6541_v50 = vpop.f32.mrb[103].mxu1  ;;  %v6622_v56 = vadd.f32 %v9149_v43, %v11369_v41  ;;  %v6616_v61 = vpop.f32.mrb[105].mxu0 }
 0x2ed   : > { %v6542_v63 = vadd.f32 %v6541_v50, %v11435_v24  ;;  %v6617_v49 = vadd.f32 %v6616_v61, %v11351_v28 }
 0x2ee   : > { %7777 = vst [vmem:[%s11424_s23 + $0x678] sm:$0xff] %v6547_v39  ;;  %7779 = vst [vmem:[%s11424_s23 + $0x688] sm:$0xff] %v6622_v56 }
 0x2ef   : > { %7776 = vst [vmem:[%s11424_s23 + $0x670] sm:$0xff] %v6542_v63  ;;  %v9159_v42 = vpop.f32.mrb[104].mxu1  ;;  %7778 = vst [vmem:[%s11424_s23 + $0x680] sm:$0xff] %v6617_v49  ;;  %v9152_v4 = vpop.f32.mrb[106].mxu0 }
 0x2f0   : > { %v6707_v36 = vadd.f32 %v9159_v42, %v11369_v41  ;;  %v6701_v20 = vpop.f32.mrb[105].mxu1  ;;  %v6632_v55 = vadd.f32 %v9152_v4, %v11412_v7  ;;  %v6626_v40 = vpop.f32.mrb[107].mxu0 }
 0x2f1   : > { %v6702_v19 = vadd.f32 %v6701_v20, %v11351_v28  ;;  %v6627_v6 = vadd.f32 %v6626_v40, %v11435_v24 }
 0x2f2   : > { %7783 = vst [vmem:[%s11424_s23 + $0x6a8] sm:$0xff] %v6707_v36  ;;  %7781 = vst [vmem:[%s11424_s23 + $0x698] sm:$0xff] %v6632_v55 }
 0x2f3   : > { %7782 = vst [vmem:[%s11424_s23 + $0x6a0] sm:$0xff] %v6702_v19  ;;  %v9162_v1 = vpop.f32.mrb[106].mxu1  ;;  %7780 = vst [vmem:[%s11424_s23 + $0x690] sm:$0xff] %v6627_v6  ;;  %v9169_v60 = vpop.f32.mrb[108].mxu0 }
 0x2f4   : > { %v6717_v3 = vadd.f32 %v9162_v1, %v11412_v7  ;;  %v6711_v62 = vpop.f32.mrb[107].mxu1  ;;  %v6792_v30 = vadd.f32 %v9169_v60, %v11369_v41  ;;  %v6786_v46 = vpop.f32.mrb[109].mxu0 }
 0x2f5   : > { %v6712_v13 = vadd.f32 %v6711_v62, %v11435_v24  ;;  %v6787_v21 = vadd.f32 %v6786_v46, %v11351_v28 }
 0x2f6   : > { %7785 = vst [vmem:[%s11424_s23 + $0x6b8] sm:$0xff] %v6717_v3  ;;  %7787 = vst [vmem:[%s11424_s23 + $0x6c8] sm:$0xff] %v6792_v30 }
 0x2f7   : > { %7784 = vst [vmem:[%s11424_s23 + $0x6b0] sm:$0xff] %v6712_v13  ;;  %v9179_v48 = vpop.f32.mrb[108].mxu1  ;;  %7786 = vst [vmem:[%s11424_s23 + $0x6c0] sm:$0xff] %v6787_v21  ;;  %v9172_v11 = vpop.f32.mrb[110].mxu0 }
 0x2f8   : > { %v6877_v54 = vadd.f32 %v9179_v48, %v11369_v41  ;;  %v6871_v38 = vpop.f32.mrb[109].mxu1  ;;  %v6802_v59 = vadd.f32 %v9172_v11, %v11412_v7  ;;  %v6796_v22 = vpop.f32.mrb[111].mxu0 }
 0x2f9   : > { %v6872_v44 = vadd.f32 %v6871_v38, %v11351_v28  ;;  %v6797_v23 = vadd.f32 %v6796_v22, %v11435_v24 }
 0x2fa   : > { %7791 = vst [vmem:[%s11424_s23 + $0x6e8] sm:$0xff] %v6877_v54  ;;  %7789 = vst [vmem:[%s11424_s23 + $0x6d8] sm:$0xff] %v6802_v59 }
 0x2fb   : > { %7790 = vst [vmem:[%s11424_s23 + $0x6e0] sm:$0xff] %v6872_v44  ;;  %v9182_v33 = vpop.f32.mrb[110].mxu1  ;;  %7788 = vst [vmem:[%s11424_s23 + $0x6d0] sm:$0xff] %v6797_v23  ;;  %v9189_v25 = vpop.f32.mrb[112].mxu0 }
 0x2fc   : > { %v6887_v47 = vadd.f32 %v9182_v33, %v11412_v7  ;;  %v6881_v58 = vpop.f32.mrb[111].mxu1  ;;  %v6962_v57 = vadd.f32 %v9189_v25, %v11369_v41  ;;  %v6956_v27 = vpop.f32.mrb[113].mxu0 }
 0x2fd   : > { %v6882_v52 = vadd.f32 %v6881_v58, %v11435_v24  ;;  %v6957_v34 = vadd.f32 %v6956_v27, %v11351_v28 }
 0x2fe   : > { %7793 = vst [vmem:[%s11424_s23 + $0x6f8] sm:$0xff] %v6887_v47  ;;  %7795 = vst [vmem:[%s11424_s23 + $0x708] sm:$0xff] %v6962_v57 }
 0x2ff   : > { %7792 = vst [vmem:[%s11424_s23 + $0x6f0] sm:$0xff] %v6882_v52  ;;  %v9199_v53 = vpop.f32.mrb[112].mxu1  ;;  %7794 = vst [vmem:[%s11424_s23 + $0x700] sm:$0xff] %v6957_v34  ;;  %v9192_v15 = vpop.f32.mrb[114].mxu0 }
 0x300   : > { %v7047_v14 = vadd.f32 %v9199_v53, %v11369_v41  ;;  %v7041_v0 = vpop.f32.mrb[113].mxu1  ;;  %v6972_v35 = vadd.f32 %v9192_v15, %v11412_v7  ;;  %v6966_v29 = vpop.f32.mrb[115].mxu0 }
 0x301   : > { %v7042_v45 = vadd.f32 %v7041_v0, %v11351_v28  ;;  %v6967_v10 = vadd.f32 %v6966_v29, %v11435_v24 }
 0x302   : > { %7799 = vst [vmem:[%s11424_s23 + $0x728] sm:$0xff] %v7047_v14  ;;  %7797 = vst [vmem:[%s11424_s23 + $0x718] sm:$0xff] %v6972_v35 }
 0x303   : > { %7798 = vst [vmem:[%s11424_s23 + $0x720] sm:$0xff] %v7042_v45  ;;  %v9202_v32 = vpop.f32.mrb[114].mxu1  ;;  %7796 = vst [vmem:[%s11424_s23 + $0x710] sm:$0xff] %v6967_v10  ;;  %v9209_v16 = vpop.f32.mrb[116].mxu0 }
 0x304   : > { %v7057_v2 = vadd.f32 %v9202_v32, %v11412_v7  ;;  %v7051_v12 = vpop.f32.mrb[115].mxu1  ;;  %v7132_v9 = vadd.f32 %v9209_v16, %v11369_v41  ;;  %v7126_v8 = vpop.f32.mrb[117].mxu0 }
 0x305   : > { %v7052_v37 = vadd.f32 %v7051_v12, %v11435_v24  ;;  %v7127_v31 = vadd.f32 %v7126_v8, %v11351_v28 }
 0x306   : > { %7801 = vst [vmem:[%s11424_s23 + $0x738] sm:$0xff] %v7057_v2  ;;  %7803 = vst [vmem:[%s11424_s23 + $0x748] sm:$0xff] %v7132_v9 }
 0x307   : > { %7800 = vst [vmem:[%s11424_s23 + $0x730] sm:$0xff] %v7052_v37  ;;  %v9219_v18 = vpop.f32.mrb[116].mxu1  ;;  %7802 = vst [vmem:[%s11424_s23 + $0x740] sm:$0xff] %v7127_v31  ;;  %v9212_v5 = vpop.f32.mrb[118].mxu0 }
 0x308   : > { %v7217_v26 = vadd.f32 %v9219_v18, %v11369_v41  ;;  %v7211_v51 = vpop.f32.mrb[117].mxu1  ;;  %v7142_v39 = vadd.f32 %v9212_v5, %v11412_v7  ;;  %v7136_v50 = vpop.f32.mrb[119].mxu0 }
 0x309   : > { %v7212_v17 = vadd.f32 %v7211_v51, %v11351_v28  ;;  %v7137_v43 = vadd.f32 %v7136_v50, %v11435_v24 }
 0x30a   : > { %7807 = vst [vmem:[%s11424_s23 + $0x768] sm:$0xff] %v7217_v26  ;;  %7805 = vst [vmem:[%s11424_s23 + $0x758] sm:$0xff] %v7142_v39 }
 0x30b   : > { %7806 = vst [vmem:[%s11424_s23 + $0x760] sm:$0xff] %v7212_v17  ;;  %v9222_v63 = vpop.f32.mrb[118].mxu1  ;;  %7804 = vst [vmem:[%s11424_s23 + $0x750] sm:$0xff] %v7137_v43  ;;  %v9229_v49 = vpop.f32.mrb[120].mxu0 }
 0x30c   : > { %v7227_v56 = vadd.f32 %v9222_v63, %v11412_v7  ;;  %v7221_v61 = vpop.f32.mrb[119].mxu1  ;;  %v7302_v36 = vadd.f32 %v9229_v49, %v11369_v41  ;;  %v7296_v20 = vpop.f32.mrb[121].mxu0 }
 0x30d   : > { %v7222_v42 = vadd.f32 %v7221_v61, %v11435_v24  ;;  %v7297_v4 = vadd.f32 %v7296_v20, %v11351_v28 }
 0x30e   : > { %7809 = vst [vmem:[%s11424_s23 + $0x778] sm:$0xff] %v7227_v56  ;;  %7811 = vst [vmem:[%s11424_s23 + $0x788] sm:$0xff] %v7302_v36 }
 0x30f   : > { %7808 = vst [vmem:[%s11424_s23 + $0x770] sm:$0xff] %v7222_v42  ;;  %v9239_v19 = vpop.f32.mrb[120].mxu1  ;;  %7810 = vst [vmem:[%s11424_s23 + $0x780] sm:$0xff] %v7297_v4  ;;  %v9232_v6 = vpop.f32.mrb[122].mxu0 }
 0x310   : > { %v7387_v55 = vadd.f32 %v9239_v19, %v11369_v41  ;;  %v7381_v40 = vpop.f32.mrb[121].mxu1  ;;  %v7312_v3 = vadd.f32 %v9232_v6, %v11412_v7  ;;  %v7306_v62 = vpop.f32.mrb[123].mxu0 }
 0x311   : > { %v7382_v1 = vadd.f32 %v7381_v40, %v11351_v28  ;;  %v7307_v60 = vadd.f32 %v7306_v62, %v11435_v24 }
 0x312   : > { %7815 = vst [vmem:[%s11424_s23 + $0x7a8] sm:$0xff] %v7387_v55  ;;  %7813 = vst [vmem:[%s11424_s23 + $0x798] sm:$0xff] %v7312_v3 }
 0x313   : > { %7814 = vst [vmem:[%s11424_s23 + $0x7a0] sm:$0xff] %v7382_v1  ;;  %v9242_v13 = vpop.f32.mrb[122].mxu1  ;;  %7812 = vst [vmem:[%s11424_s23 + $0x790] sm:$0xff] %v7307_v60  ;;  %v9249_v21 = vpop.f32.mrb[124].mxu0 }
 0x314   : > { %v7397_v30 = vadd.f32 %v9242_v13, %v11412_v7  ;;  %v7391_v46 = vpop.f32.mrb[123].mxu1  ;;  %v7472_v54 = vadd.f32 %v9249_v21, %v11369_v41  ;;  %v7466_v38 = vpop.f32.mrb[125].mxu0 }
 0x315   : > { %v7392_v48 = vadd.f32 %v7391_v46, %v11435_v24  ;;  %v7467_v11 = vadd.f32 %v7466_v38, %v11351_v28 }
 0x316   : > { %7817 = vst [vmem:[%s11424_s23 + $0x7b8] sm:$0xff] %v7397_v30  ;;  %7819 = vst [vmem:[%s11424_s23 + $0x7c8] sm:$0xff] %v7472_v54 }
 0x317   : > { %7816 = vst [vmem:[%s11424_s23 + $0x7b0] sm:$0xff] %v7392_v48  ;;  %v9259_v44 = vpop.f32.mrb[124].mxu1  ;;  %7818 = vst [vmem:[%s11424_s23 + $0x7c0] sm:$0xff] %v7467_v11  ;;  %v9252_v23 = vpop.f32.mrb[126].mxu0 }
 0x318   : > { %v7557_v59 = vadd.f32 %v9259_v44, %v11369_v41  ;;  %v7551_v22 = vpop.f32.mrb[125].mxu1  ;;  %v7482_v47 = vadd.f32 %v9252_v23, %v11412_v7  ;;  %v7476_v58 = vpop.f32.mrb[127].mxu0 }
 0x319   : > { %v7552_v33 = vadd.f32 %v7551_v22, %v11351_v28  ;;  %v7477_v25 = vadd.f32 %v7476_v58, %v11435_v24 }
 0x31a   : > { %7823 = vst [vmem:[%s11424_s23 + $0x7e8] sm:$0xff] %v7557_v59  ;;  %7821 = vst [vmem:[%s11424_s23 + $0x7d8] sm:$0xff] %v7482_v47 }
 0x31b   : > { %7822 = vst [vmem:[%s11424_s23 + $0x7e0] sm:$0xff] %v7552_v33  ;;  %v9262_v41 = vpop.f32.mrb[126].mxu1  ;;  %7820 = vst [vmem:[%s11424_s23 + $0x7d0] sm:$0xff] %v7477_v25 }
 0x31c   : > { %v7567_v52 = vadd.f32 %v9262_v41, %v11412_v7  ;;  %v7561_v57 = vpop.f32.mrb[127].mxu1 }
 0x31d   : > { %v7562_v28 = vadd.f32 %v7561_v57, %v11435_v24 }
 0x31e   : > { %7825 = vst [vmem:[%s11424_s23 + $0x7f8] sm:$0xff] %v7567_v52 }
 0x31f   : > { %7824 = vst [vmem:[%s11424_s23 + $0x7f0] sm:$0xff] %v7562_v28 }
 0x320   : > { %9985 = shalt.err (!%p9982_p6)
}
 0x321   : > { %s9986_s25 = scalar_lea.hbm %s12314_s13, 32768  ;;  %s9990_s24 = scalar_lea.hbm %s12377_s8, 65536 }
 0x322   : > { %p9987_p7 = scmp.ne.s32.totalorder %s12314_s13, %s9986_s25  ;;  %p9991_p0 = scmp.lt.u32.totalorder %s12314_s13, %s12377_s8 }
 0x323   : > { %p9992_p1 = scmp.lt.u32.totalorder %s9990_s24, %s9986_s25  ;;  %p9994_p4 = scmp.lt.u32.totalorder %s9986_s25, %s12314_s13 }
 0x324   : > { %p9988_p9 = pnand %p9987_p7, %p12393_p8 }
 0x325   : > { %p9993_p13 = por %p9992_p1, %p9991_p0 }
 0x326   : > { %p9989_p12 = pneg %p9988_p9 }
 0x327   : > { %p9995_p10 = por %p9994_p4, %p9993_p13 }
 0x329   : > { %p9996_p11 = pnand %p9995_p10, %p9989_p12 }
 0x32b   : > { %9999 = shalt.err (!%p9996_p11)
}
 0x32c   : > { %s10068_s16 = smov 128   ;;  %s10069_s21 = smov 8  }
 0x32d   : > { %9527 = dma.vmem_to_hbm [thread:$0]  (%p12393_p8), %s12316_s20, 32768, %s12314_s13, %s12323_s30, %s10068_s16, %s10068_s16, %s10069_s21  }
 0x32e PF: > { %p9544_p2 = scmp.ge.s32.totalorder %s10058_s10, 2  ;;  %s7857_s22 = sand.u32 1, %s10038_s27  }
 0x32f   : > { %p12394_p3 = scmp.ne.s32.totalorder %s12387_s17, 0  ;;  %s7858_s26 = scalar_lea.sflag [#allocation4], %s7857_s22 }
 0x331   : > { %p9537_p5 = pnand %p9544_p2, %p12394_p3 }
 0x333   : > { %10033 = dma.done.wait (!%p9537_p5), %s7858_s26, 32768  }
 0x334   : > { %10035 = vsyncadd (!%p9537_p5), %s7858_s26, 4294934528  ;;  %s23_s10 = sadd.s32 1, %s10058_s10   ;;  %s12395_s30 = sld [smem:[#allocation11_spill]] }
 0x335   : > { %p20_p6 = scmp.ge.s32.totalorder %s23_s10, 4   ;;  %s12396_s9 = sld [smem:[#allocation12_spill]] }
 0x336   : > { %s12397_s27 = smov %s10042_s28  ;;  %s12398_s28 = smov %s10046_s29 }
 0x337   : > { %s12399_s29 = smov %s10168_s18  ;;  %22 = sbr.rel (!%p20_p6) target bundleno = 6 (0x6), region = 101 }
 0x33e   :  { %7863 = vsyncpa [#allocation3], 1 }
 0x33f   :  { %7865 = vsyncpa [#allocation3 + $0x1], 1 }
 0x340   :  { %7866 = vsyncpa [#allocation6], 1 }
 0x341   :  { %7867 = vsyncpa [#allocation4], 1 }
 0x342   :  { %7869 = vsyncpa [#allocation4 + $0x1], 1 }

</bundles_post_ra>
